<compile_context>
chip_gen: v7x
topology: tpu7x:2x2x1
jax: 0.10.0
libtpu: 0.0.40
codegen_flags: <defaults>
</compile_context>

<pallas_src>
from functools import partial

import jax
import jax.numpy as jnp
from jax.experimental import pallas as pl
from jax.experimental.pallas import tpu as pltpu

_LANE = 128
_BN_EPS = 1e-5


# --------------------------------------------------------------------------- #
# helpers
# --------------------------------------------------------------------------- #
def _round_up(n, m):
    return (n + m - 1) // m * m


def _pad2d(a, rows, cols, dtype):
    a = jnp.asarray(a, dtype)
    return jnp.pad(a, ((0, rows - a.shape[0]), (0, cols - a.shape[1])))


def _row_tiling(n, max_tile):
    """(padded_rows, row_tile): both multiples of 128, tile divides rows."""
    base = _round_up(n, _LANE)
    tile = min(_round_up(max_tile, _LANE), base)
    rows = _round_up(n, tile)
    return rows, tile


def _query_vmem_limit_bytes():
    """~75% of the chip's physical per-core VMEM (v5e/v6e: 128 MiB -> 96 MiB,
    v7x: 64 MiB -> 48 MiB); conservative 48 MiB fallback if the query fails."""
    default = 48 * 1024 * 1024
    try:
        cap = int(getattr(pltpu.get_tpu_info(), "vmem_capacity_bytes", 0) or 0)
        if cap > 0:
            return min(cap * 3 // 4, 100 * 1024 * 1024)
    except Exception:
        pass
    return default


_VMEM_LIMIT_BYTES = None   # resolved lazily at first trace


def _compiler_params(semantics):
    global _VMEM_LIMIT_BYTES
    if _VMEM_LIMIT_BYTES is None:
        _VMEM_LIMIT_BYTES = _query_vmem_limit_bytes()
    return pltpu.CompilerParams(
        dimension_semantics=semantics,
        vmem_limit_bytes=_VMEM_LIMIT_BYTES,
    )


def _resident_spec(arr):
    """Full-array block with a constant index_map -> stays resident in VMEM."""
    shape = arr.shape
    return pl.BlockSpec(shape, lambda i: (0,) * len(shape))


# --------------------------------------------------------------------------- #
# kernels
# --------------------------------------------------------------------------- #
def _fused_layer_kernel(mode, compute_dtype, *refs):
    """One fused GCN layer; one grid step = one row tile of p = aff @ y.

    step 0     : build y = producer(...) @ W + b into the resident VMEM
                 scratch (and, for mode 'bn_relu', emit the activation g used
                 as the next layer's residual); zero the BN-stat accumulators.
    every step : p_tile = aff_tile @ y (single MXU dot, f32 accumulate) and
                 accumulate per-feature sum / sum-of-squares for folded BN.
    """
    if mode == "lin":
        (x_ref, w_ref, b_ref, aff_ref,
         p_ref, sum_ref, sq_ref, y_ref) = refs
    elif mode == "bn_relu":
        (pp_ref, scale_ref, shift_ref, w_ref, b_ref, aff_ref,
         p_ref, sum_ref, sq_ref, g_ref, y_ref) = refs
    else:  # "bn_relu_res"
        (pp_ref, res_ref, scale_ref, shift_ref, w_ref, b_ref, aff_ref,
         p_ref, sum_ref, sq_ref, y_ref) = refs

    @pl.when(pl.program_id(0) == 0)
    def _build_y():
        if mode == "lin":
            src = x_ref[...]
        else:
            h = pp_ref[...] * scale_ref[...] + shift_ref[...]   # folded BatchNorm
            if mode == "bn_relu_res":
                h = h + res_ref[...]                            # residual add
            g = jnp.maximum(h, 0.0)                             # ReLU
            if mode == "bn_relu":
                g_ref[...] = g.astype(g_ref.dtype)
            src = g.astype(compute_dtype)
        y = jnp.dot(src, w_ref[...], preferred_element_type=jnp.float32)
        y_ref[...] = (y + b_ref[...]).astype(y_ref.dtype)
        sum_ref[...] = jnp.zeros_like(sum_ref)
        sq_ref[...] = jnp.zeros_like(sq_ref)

    p = jnp.dot(aff_ref[...], y_ref[...], preferred_element_type=jnp.float32)
    p_ref[...] = p
    sum_ref[...] += jnp.sum(p, axis=0, keepdims=True)
    sq_ref[...] += jnp.sum(p * p, axis=0, keepdims=True)


def _bn_tanh_fc_kernel(compute_dtype, p_ref, scale_ref, shift_ref,
                       wfc_ref, bfc_ref, out_ref, pred_ref):
    """out = tanh(p * scale + shift);  pred = out @ wfc + bfc  (one row tile)."""
    h = jnp.tanh(p_ref[...] * scale_ref[...] + shift_ref[...])
    out_ref[...] = h
    pred_ref[...] = (jnp.dot(h.astype(compute_dtype), wfc_ref[...],
                             preferred_element_type=jnp.float32)
                     + bfc_ref[...])


# --------------------------------------------------------------------------- #
# pallas_call wrappers
# --------------------------------------------------------------------------- #
def _gcn_layer(aff, rhs, w, b, *, mode, row_tile, compute_dtype):
    """Fused layer:  y = producer(rhs) @ w + b  (VMEM-resident),
    p = aff @ y (row-tiled), per-feature BN statistics.
    Returns (p, bn_sum, bn_sumsq[, activation])."""
    rout, rin = aff.shape
    din, dout = w.shape
    assert rout % row_tile == 0
    assert rin == rhs[0].shape[0], "aff lane dim must equal producer rows"

    cp = _compiler_params(("arbitrary",))

    # Approximate VMEM working set (resident operands + y scratch + pipeline
    # buffers).  TODO(synk): fall back to a K-tiled two-call path when the
    # producer output y does not fit VMEM (not needed at these sizes).
    cd_bytes = jnp.dtype(compute_dtype).itemsize
    resident = (sum(int(t.nbytes) for t in rhs) + int(w.nbytes) + int(b.nbytes)
                + rin * dout * cd_bytes
                + 2 * row_tile * (rin * cd_bytes + dout * 4)
                + (int(rhs[0].nbytes) if mode == "bn_relu" else 0))
    if resident > _VMEM_LIMIT_BYTES:
        raise ValueError(
            f"fused GCN layer working set (~{resident / 2**20:.1f} MiB) exceeds "
            f"the VMEM budget ({_VMEM_LIMIT_BYTES / 2**20:.0f} MiB)")

    in_specs = ([_resident_spec(t) for t in rhs]
                + [_resident_spec(w), _resident_spec(b),
                   pl.BlockSpec((row_tile, rin), lambda i: (i, 0))])
    out_shape = [jax.ShapeDtypeStruct((rout, dout), jnp.float32),
                 jax.ShapeDtypeStruct((1, dout), jnp.float32),
                 jax.ShapeDtypeStruct((1, dout), jnp.float32)]
    out_specs = [pl.BlockSpec((row_tile, dout), lambda i: (i, 0)),
                 pl.BlockSpec((1, dout), lambda i: (0, 0)),
                 pl.BlockSpec((1, dout), lambda i: (0, 0))]
    if mode == "bn_relu":
        rp, dp = rhs[0].shape
        out_shape.append(jax.ShapeDtypeStruct((rp, dp), compute_dtype))
        out_specs.append(pl.BlockSpec((rp, dp), lambda i: (0, 0)))

    cost = pl.CostEstimate(
        flops=2 * rin * din * dout + 2 * rout * rin * dout,
        transcendentals=0,
        bytes_accessed=int(aff.nbytes + sum(int(t.nbytes) for t in rhs)
                           + w.nbytes + b.nbytes + rout * dout * 4
                           + (rhs[0].nbytes if mode == "bn_relu" else 0)))

    return pl.pallas_call(
        partial(_fused_layer_kernel, mode, compute_dtype),
        grid=(rout // row_tile,),
        in_specs=in_specs,
        out_specs=tuple(out_specs),
        out_shape=tuple(out_shape),
        scratch_shapes=[pltpu.VMEM((rin, dout), compute_dtype)],   # resident y
        compiler_params=cp,
        cost_estimate=cost,
    )(*rhs, w, b, aff)


def _fold_bn(psum, psq, gamma, beta, n_rows, eps=_BN_EPS):
    """Fold training-mode BatchNorm1d into per-feature (scale, shift).
    Padded rows of the pre-BN tensor are exactly zero, so dividing by the TRUE
    row count keeps the batch statistics exact despite row padding."""
    mu = psum / n_rows
    var = jnp.maximum(psq / n_rows - mu * mu, 0.0)   # biased variance
    scale = gamma * jax.lax.rsqrt(var + eps)
    shift = beta - mu * scale
    return scale, shift


def _bn_tanh_fc(p, scale, shift, wfc, bfc, *, row_tile, compute_dtype):
    r, d = p.shape
    c = wfc.shape[1]
    cost = pl.CostEstimate(
        flops=2 * r * d * c + 2 * r * d, transcendentals=r * d,
        bytes_accessed=int(p.nbytes + wfc.nbytes + bfc.nbytes
                           + r * d * 4 + r * c * 4))
    return pl.pallas_call(
        partial(_bn_tanh_fc_kernel, compute_dtype),
        grid=(r // row_tile,),
        in_specs=[
            pl.BlockSpec((row_tile, d), lambda i: (i, 0)),
            pl.BlockSpec((1, d), lambda i: (0, 0)),
            pl.BlockSpec((1, d), lambda i: (0, 0)),
            pl.BlockSpec((d, c), lambda i: (0, 0)),
            pl.BlockSpec((1, c), lambda i: (0, 0)),
        ],
        out_specs=(
            pl.BlockSpec((row_tile, d), lambda i: (i, 0)),
            pl.BlockSpec((row_tile, c), lambda i: (i, 0)),
        ),
        out_shape=(
            jax.ShapeDtypeStruct((r, d), jnp.float32),
            jax.ShapeDtypeStruct((r, c), jnp.float32),
        ),
        compiler_params=_compiler_params(("parallel",)),
        cost_estimate=cost,
    )(p, scale, shift, wfc, bfc)


# --------------------------------------------------------------------------- #
# forward pass
# --------------------------------------------------------------------------- #
def gcn_stack_forward(x, in_aff, anchor_aff, out_aff, params, s,
                      *, compute_dtype=jnp.bfloat16, row_tile=256):
    """GCN_stack forward (depth=1).  `params` holds nn.Linear weights stored
    pre-transposed as [in_features, out_features], biases as [1, out], and BN
    gamma/beta as [1, features]."""
    f32 = jnp.float32
    cd = jnp.dtype(compute_dtype)

    N, n_input = x.shape
    A = in_aff.shape[0]
    M = out_aff.shape[0]
    n_dim = params["w1"].shape[1]
    n_output = params["w3"].shape[1]
    n_class = params["wfc"].shape[1]

    # ---- lane-dense padding: feature dims and the row counts N/A/M (which
    # appear as lane / contraction dims of the affinity matmuls) -> x128 ------
    in_p, dim_p = _round_up(n_input, _LANE), _round_up(n_dim, _LANE)
    out_p, cls_p = _round_up(n_output, _LANE), _round_up(n_class, _LANE)
    n_pad = _round_up(N, _LANE)
    a_pad, tr_a = _row_tiling(A, row_tile)
    m_pad, tr_m = _row_tiling(M, row_tile)

    x_p = _pad2d(x, n_pad, in_p, cd)
    in_aff_p = _pad2d(in_aff, a_pad, n_pad, cd)
    anchor_p = _pad2d(anchor_aff, a_pad, a_pad, cd)
    out_aff_p = _pad2d(out_aff, m_pad, a_pad, cd)

    w1 = _pad2d(params["w1"], in_p, dim_p, cd)
    w2 = _pad2d(params["w2"], dim_p, dim_p, cd)
    w3 = _pad2d(params["w3"], dim_p, out_p, cd)
    wfc = _pad2d(params["wfc"], out_p, cls_p, cd)
    b1 = _pad2d(params["b1"], 1, dim_p, f32)
    b2 = _pad2d(params["b2"], 1, dim_p, f32)
    b3 = _pad2d(params["b3"], 1, out_p, f32)
    bfc = _pad2d(params["bfc"], 1, cls_p, f32)
    g1, be1 = _pad2d(params["g1"], 1, dim_p, f32), _pad2d(params["be1"], 1, dim_p, f32)
    g2, be2 = _pad2d(params["g2"], 1, dim_p, f32), _pad2d(params["be2"], 1, dim_p, f32)
    g3, be3 = _pad2d(params["g3"], 1, out_p, f32), _pad2d(params["be3"], 1, out_p, f32)

    # ---- layer 1 (fused):  y1 = x @ W1 + b1 ; p1 = in_aff @ y1 ; BN1 stats --
    p1, s1, q1 = _gcn_layer(in_aff_p, (x_p,), w1, b1,
                            mode="lin", row_tile=tr_a, compute_dtype=cd)
    sc1, sh1 = _fold_bn(s1, q1, g1, be1, A)

    # ---- layer 2 (fused): g = ReLU(BN1(p1)) ; y2 = g @ W2 + b2 ;
    #      p2 = anchor_aff @ y2 ; BN2 stats ; emit g (residual, compute dtype) -
    p2, s2, q2, act1 = _gcn_layer(anchor_p, (p1, sc1, sh1), w2, b2,
                                  mode="bn_relu", row_tile=tr_a, compute_dtype=cd)
    sc2, sh2 = _fold_bn(s2, q2, g2, be2, A)

    # ---- layer 3 (fused): g = ReLU(BN2(p2) + residual) ; y3 = g @ W3 + b3 ;
    #      p3 = out_aff @ y3 ; BN3 stats  (no activation output needed) -------
    p3, s3, q3 = _gcn_layer(out_aff_p, (p2, act1, sc2, sh2), w3, b3,
                            mode="bn_relu_res", row_tile=tr_m, compute_dtype=cd)
    sc3, sh3 = _fold_bn(s3, q3, g3, be3, M)

    # ---- tanh(BN3) + fc head; use >=2 "parallel" row tiles when possible so
    # both v7x TensorCores get work (this call has no cross-step state) -------
    tr_fin = m_pad // 2 if (m_pad == tr_m and m_pad % (2 * _LANE) == 0) else tr_m
    out_full, pred_full = _bn_tanh_fc(p3, sc3, sh3, wfc, bfc,
                                      row_tile=tr_fin, compute_dtype=cd)

    return out_full[:M, :n_output], pred_full[:s, :n_class]


# --------------------------------------------------------------------------- #
# pure-JAX reference (mirrors the PyTorch forward, training-mode BatchNorm1d)
# --------------------------------------------------------------------------- #
def _reference(x, in_aff, anchor_aff, out_aff, p, s, compute_dtype=jnp.float32):
    cd = jnp.dtype(compute_dtype)
    f32 = jnp.float32

    def dot(a, b):
        return jnp.dot(a.astype(cd), b.astype(cd), preferred_element_type=f32)

    def bn(h, gamma, beta, eps=_BN_EPS):
        mu = jnp.mean(h, axis=0, keepdims=True)
        var = jnp.mean((h - mu) ** 2, axis=0, keepdims=True)
        return (h - mu) * jax.lax.rsqrt(var + eps) * gamma + beta

    y = (dot(x, p["w1"]) + p["b1"]).astype(cd)
    h = jnp.maximum(bn(dot(in_aff, y), p["g1"], p["be1"]), 0.0)
    r = h.astype(cd).astype(f32)       # residual stored at compute precision
    y = (dot(h, p["w2"]) + p["b2"]).astype(cd)
    h = jnp.maximum(bn(dot(anchor_aff, y), p["g2"], p["be2"]) + r, 0.0)
    y = (dot(h, p["w3"]) + p["b3"]).astype(cd)
    h = jnp.tanh(bn(dot(out_aff, y), p["g3"], p["be3"]))
    pred = dot(h, p["wfc"]) + p["bfc"]
    return h, pred[:s]


# --------------------------------------------------------------------------- #
# demo / self-test
# --------------------------------------------------------------------------- #
if __name__ == "__main__":
    # Small GCN-style problem.  Shapes are deliberately non-multiples of 8/128
    # to exercise the lane-dense padding path.
    N, A, M, s = 256, 40, 200, 24
    n_input, n_dim, n_output, n_class = 20, 256, 24, 10

    key = jax.random.PRNGKey(0)
    ks = jax.random.split(key, 8)

    x = jax.random.normal(ks[0], (N, n_input), jnp.float32)
    in_aff = jax.random.uniform(ks[1], (A, N), jnp.float32) / N
    anchor_aff = jax.random.uniform(ks[2], (A, A), jnp.float32) / A
    out_aff = jax.random.uniform(ks[3], (M, A), jnp.float32) / A

    def lin(k, fan_in, fan_out):
        kw, kb = jax.random.split(k)
        bound = 1.0 / float(fan_in) ** 0.5
        w = jax.random.uniform(kw, (fan_in, fan_out), jnp.float32, -bound, bound)
        b = jax.random.uniform(kb, (1, fan_out), jnp.float32, -bound, bound)
        return w, b

    w1, b1 = lin(ks[4], n_input, n_dim)
    w2, b2 = lin(ks[5], n_dim, n_dim)
    w3, b3 = lin(ks[6], n_dim, n_output)
    wfc, bfc = lin(ks[7], n_output, n_class)

    params = dict(
        w1=w1, b1=b1, g1=jnp.ones((1, n_dim), jnp.float32),
        be1=jnp.zeros((1, n_dim), jnp.float32),
        w2=w2, b2=b2, g2=jnp.ones((1, n_dim), jnp.float32),
        be2=jnp.zeros((1, n_dim), jnp.float32),
        w3=w3, b3=b3, g3=jnp.ones((1, n_output), jnp.float32),
        be3=jnp.zeros((1, n_output), jnp.float32),
        wfc=wfc, bfc=bfc,
    )

    # f32 run: strict check against the PyTorch-equivalent f32 reference.
    fwd_f32 = jax.jit(lambda *a: gcn_stack_forward(*a, s=s,
                                                   compute_dtype=jnp.float32))
    out32, pred32 = jax.block_until_ready(
        fwd_f32(x, in_aff, anchor_aff, out_aff, params))
    ref_out, ref_pred = _reference(x, in_aff, anchor_aff, out_aff, params, s)
    assert out32.shape == (M, n_output) and pred32.shape == (s, n_class)
    assert jnp.allclose(out32, ref_out, atol=1e-3, rtol=1e-3), \
        float(jnp.max(jnp.abs(out32 - ref_out)))
    assert jnp.allclose(pred32, ref_pred, atol=1e-3, rtol=1e-3), \
        float(jnp.max(jnp.abs(pred32 - ref_pred)))

    # bf16-MXU run (f32 accumulation, f32 BN/activations, bf16 residual):
    # checked against a reference evaluated with the same precision policy.
    fwd_bf16 = jax.jit(lambda *a: gcn_stack_forward(*a, s=s,
                                                    compute_dtype=jnp.bfloat16))
    out16, pred16 = jax.block_until_ready(
        fwd_bf16(x, in_aff, anchor_aff, out_aff, params))
    ref_out16, ref_pred16 = _reference(x, in_aff, anchor_aff, out_aff, params, s,
                                       compute_dtype=jnp.bfloat16)
    assert out16.shape == (M, n_output) and pred16.shape == (s, n_class)
    assert jnp.allclose(out16, ref_out16, atol=2e-2, rtol=2e-2), \
        float(jnp.max(jnp.abs(out16 - ref_out16)))
    assert jnp.allclose(pred16, ref_pred16, atol=2e-2, rtol=2e-2), \
        float(jnp.max(jnp.abs(pred16 - ref_pred16)))

    print("KERNEL_OK")
</pallas_src>

<mosaic_0001>
module attributes {stable_mosaic.version = 11 : i64} {
  func.func @_fused_layer_kernel(%arg0: i32, %arg1: memref<256x128xf32, #tpu.memory_space<vmem>>, %arg2: memref<128x256xf32, #tpu.memory_space<vmem>>, %arg3: memref<1x256xf32, #tpu.memory_space<vmem>>, %arg4: memref<128x256xf32, #tpu.memory_space<vmem>>, %arg5: memref<128x256xf32, #tpu.memory_space<vmem>>, %arg6: memref<1x256xf32, #tpu.memory_space<vmem>>, %arg7: memref<1x256xf32, #tpu.memory_space<vmem>>, %arg8: memref<256x256xf32, #tpu.memory_space<vmem>>) attributes {dimension_semantics = [#tpu.dimension_semantics<arbitrary>], iteration_bounds = array<i64: 1>, scalar_prefetch = 0 : i64, scratch_operands = 1 : i64, tpu.core_type = #tpu.core_type<tc>, window_params = [{pipeline_mode = #tpu.pipeline_mode<synchronous>, transform_indices = @transform_0, window_bounds = array<i64: 256, 128>}, {pipeline_mode = #tpu.pipeline_mode<synchronous>, transform_indices = @transform_1, window_bounds = array<i64: 128, 256>}, {pipeline_mode = #tpu.pipeline_mode<synchronous>, transform_indices = @transform_2, window_bounds = array<i64: 1, 256>}, {transform_indices = @transform_3, window_bounds = array<i64: 128, 256>}, {transform_indices = @transform_4, window_bounds = array<i64: 128, 256>}, {pipeline_mode = #tpu.pipeline_mode<synchronous>, transform_indices = @transform_5, window_bounds = array<i64: 1, 256>}, {pipeline_mode = #tpu.pipeline_mode<synchronous>, transform_indices = @transform_6, window_bounds = array<i64: 1, 256>}]} {
    %c0_i32 = arith.constant 0 : i32
    %0 = arith.cmpi eq, %arg0, %c0_i32 : i32
    %1 = arith.extui %0 : i1 to i32
    %c0_i32_0 = arith.constant 0 : i32
    %2 = arith.cmpi ne, %1, %c0_i32_0 : i32
    scf.if %2 {
      %c0_16 = arith.constant 0 : index
      %c0_17 = arith.constant 0 : index
      %18 = vector.load %arg1[%c0_16, %c0_17] : memref<256x128xf32, #tpu.memory_space<vmem>>, vector<256x128xf32>
      %c0_18 = arith.constant 0 : index
      %c0_19 = arith.constant 0 : index
      %19 = vector.load %arg2[%c0_18, %c0_19] : memref<128x256xf32, #tpu.memory_space<vmem>>, vector<128x256xf32>
      %cst_20 = arith.constant dense<0.000000e+00> : vector<256x256xf32>
      %20 = tpu.matmul %18, %19, %cst_20 {dimension_numbers = #tpu.dot_dimension_numbers<[1], [0], [0], [1], [0, 0, 1, 1], [], []>} : vector<256x128xf32>, vector<128x256xf32>, vector<256x256xf32> -> vector<256x256xf32>
      %c0_21 = arith.constant 0 : index
      %c0_22 = arith.constant 0 : index
      %21 = vector.load %arg3[%c0_21, %c0_22] : memref<1x256xf32, #tpu.memory_space<vmem>>, vector<1x256xf32>
      %22 = vector.broadcast %21 : vector<1x256xf32> to vector<256x256xf32>
      %23 = arith.addf %20, %22 : vector<256x256xf32>
      %c0_23 = arith.constant 0 : index
      %c0_24 = arith.constant 0 : index
      %24 = vector.load %arg8[%c0_23, %c0_24] : memref<256x256xf32, #tpu.memory_space<vmem>>, vector<256x256xf32>
      tpu.vector_store %arg8[%c0_23, %c0_24], %23 {strides = array<i32>} : memref<256x256xf32, #tpu.memory_space<vmem>>, vector<256x256xf32>,
      %cst_25 = arith.constant 0.000000e+00 : f32
      %25 = vector.broadcast %cst_25 : f32 to vector<1x256xf32>
      %c0_26 = arith.constant 0 : index
      %c0_27 = arith.constant 0 : index
      %26 = vector.load %arg6[%c0_26, %c0_27] : memref<1x256xf32, #tpu.memory_space<vmem>>, vector<1x256xf32>
      tpu.vector_store %arg6[%c0_26, %c0_27], %25 {strides = array<i32>} : memref<1x256xf32, #tpu.memory_space<vmem>>, vector<1x256xf32>,
      %cst_28 = arith.constant 0.000000e+00 : f32
      %27 = vector.broadcast %cst_28 : f32 to vector<1x256xf32>
      %c0_29 = arith.constant 0 : index
      %c0_30 = arith.constant 0 : index
      %28 = vector.load %arg7[%c0_29, %c0_30] : memref<1x256xf32, #tpu.memory_space<vmem>>, vector<1x256xf32>
      tpu.vector_store %arg7[%c0_29, %c0_30], %27 {strides = array<i32>} : memref<1x256xf32, #tpu.memory_space<vmem>>, vector<1x256xf32>,
    } else {
    }
    %c0 = arith.constant 0 : index
    %c0_1 = arith.constant 0 : index
    %3 = vector.load %arg4[%c0, %c0_1] : memref<128x256xf32, #tpu.memory_space<vmem>>, vector<128x256xf32>
    %c0_2 = arith.constant 0 : index
    %c0_3 = arith.constant 0 : index
    %4 = vector.load %arg8[%c0_2, %c0_3] : memref<256x256xf32, #tpu.memory_space<vmem>>, vector<256x256xf32>
    %cst = arith.constant dense<0.000000e+00> : vector<128x256xf32>
    %5 = tpu.matmul %3, %4, %cst {dimension_numbers = #tpu.dot_dimension_numbers<[1], [0], [0], [1], [0, 0, 1, 1], [], []>} : vector<128x256xf32>, vector<256x256xf32>, vector<128x256xf32> -> vector<128x256xf32>
    %c0_4 = arith.constant 0 : index
    %c0_5 = arith.constant 0 : index
    %6 = vector.load %arg5[%c0_4, %c0_5] : memref<128x256xf32, #tpu.memory_space<vmem>>, vector<128x256xf32>
    tpu.vector_store %arg5[%c0_4, %c0_5], %5 {strides = array<i32>} : memref<128x256xf32, #tpu.memory_space<vmem>>, vector<128x256xf32>,
    %c0_6 = arith.constant 0 : index
    %c0_7 = arith.constant 0 : index
    %7 = vector.load %arg6[%c0_6, %c0_7] : memref<1x256xf32, #tpu.memory_space<vmem>>, vector<1x256xf32>
    %cst_8 = arith.constant dense<0.000000e+00> : vector<256xf32>
    %8 = vector.multi_reduction <add>, %5, %cst_8 [0] : vector<128x256xf32> to vector<256xf32>
    %9 = vector.shape_cast %8 : vector<256xf32> to vector<1x256xf32>
    %10 = arith.addf %7, %9 : vector<1x256xf32>
    %c0_9 = arith.constant 0 : index
    %c0_10 = arith.constant 0 : index
    %11 = vector.load %arg6[%c0_9, %c0_10] : memref<1x256xf32, #tpu.memory_space<vmem>>, vector<1x256xf32>
    tpu.vector_store %arg6[%c0_9, %c0_10], %10 {strides = array<i32>} : memref<1x256xf32, #tpu.memory_space<vmem>>, vector<1x256xf32>,
    %c0_11 = arith.constant 0 : index
    %c0_12 = arith.constant 0 : index
    %12 = vector.load %arg7[%c0_11, %c0_12] : memref<1x256xf32, #tpu.memory_space<vmem>>, vector<1x256xf32>
    %13 = arith.mulf %5, %5 : vector<128x256xf32>
    %cst_13 = arith.constant dense<0.000000e+00> : vector<256xf32>
    %14 = vector.multi_reduction <add>, %13, %cst_13 [0] : vector<128x256xf32> to vector<256xf32>
    %15 = vector.shape_cast %14 : vector<256xf32> to vector<1x256xf32>
    %16 = arith.addf %12, %15 : vector<1x256xf32>
    %c0_14 = arith.constant 0 : index
    %c0_15 = arith.constant 0 : index
    %17 = vector.load %arg7[%c0_14, %c0_15] : memref<1x256xf32, #tpu.memory_space<vmem>>, vector<1x256xf32>
    tpu.vector_store %arg7[%c0_14, %c0_15], %16 {strides = array<i32>} : memref<1x256xf32, #tpu.memory_space<vmem>>, vector<1x256xf32>,
    return
  }
  func.func @transform_0(%arg0: i32) -> (i32, i32) {
    %c0_i32 = arith.constant 0 : i32
    %c0_i32_0 = arith.constant 0 : i32
    %c0_i32_1 = arith.constant 0 : i32
    return %c0_i32, %c0_i32_0 : i32, i32
  }
  func.func @transform_1(%arg0: i32) -> (i32, i32) {
    %c0_i32 = arith.constant 0 : i32
    %c0_i32_0 = arith.constant 0 : i32
    %c0_i32_1 = arith.constant 0 : i32
    return %c0_i32, %c0_i32_0 : i32, i32
  }
  func.func @transform_2(%arg0: i32) -> (i32, i32) {
    %c0_i32 = arith.constant 0 : i32
    %c0_i32_0 = arith.constant 0 : i32
    %c0_i32_1 = arith.constant 0 : i32
    return %c0_i32, %c0_i32_0 : i32, i32
  }
  func.func @transform_3(%arg0: i32) -> (i32, i32) {
    %c0_i32 = arith.constant 0 : i32
    %c0_i32_0 = arith.constant 0 : i32
    return %arg0, %c0_i32 : i32, i32
  }
  func.func @transform_4(%arg0: i32) -> (i32, i32) {
    %c0_i32 = arith.constant 0 : i32
    %c0_i32_0 = arith.constant 0 : i32
    return %arg0, %c0_i32 : i32, i32
  }
  func.func @transform_5(%arg0: i32) -> (i32, i32) {
    %c0_i32 = arith.constant 0 : i32
    %c0_i32_0 = arith.constant 0 : i32
    %c0_i32_1 = arith.constant 0 : i32
    return %c0_i32, %c0_i32_0 : i32, i32
  }
  func.func @transform_6(%arg0: i32) -> (i32, i32) {
    %c0_i32 = arith.constant 0 : i32
    %c0_i32_0 = arith.constant 0 : i32
    %c0_i32_1 = arith.constant 0 : i32
    return %c0_i32, %c0_i32_0 : i32, i32
  }
}

module attributes {stable_mosaic.version = 11 : i64} {
  func.func @_fused_layer_kernel(%arg0: i32, %arg1: memref<128x256xf32, #tpu.memory_space<vmem>>, %arg2: memref<1x256xf32, #tpu.memory_space<vmem>>, %arg3: memref<1x256xf32, #tpu.memory_space<vmem>>, %arg4: memref<256x256xf32, #tpu.memory_space<vmem>>, %arg5: memref<1x256xf32, #tpu.memory_space<vmem>>, %arg6: memref<128x128xf32, #tpu.memory_space<vmem>>, %arg7: memref<128x256xf32, #tpu.memory_space<vmem>>, %arg8: memref<1x256xf32, #tpu.memory_space<vmem>>, %arg9: memref<1x256xf32, #tpu.memory_space<vmem>>, %arg10: memref<128x256xf32, #tpu.memory_space<vmem>>, %arg11: memref<128x256xf32, #tpu.memory_space<vmem>>) attributes {dimension_semantics = [#tpu.dimension_semantics<arbitrary>], iteration_bounds = array<i64: 1>, scalar_prefetch = 0 : i64, scratch_operands = 1 : i64, tpu.core_type = #tpu.core_type<tc>, window_params = [{pipeline_mode = #tpu.pipeline_mode<synchronous>, transform_indices = @transform_0, window_bounds = array<i64: 128, 256>}, {pipeline_mode = #tpu.pipeline_mode<synchronous>, transform_indices = @transform_1, window_bounds = array<i64: 1, 256>}, {pipeline_mode = #tpu.pipeline_mode<synchronous>, transform_indices = @transform_2, window_bounds = array<i64: 1, 256>}, {pipeline_mode = #tpu.pipeline_mode<synchronous>, transform_indices = @transform_3, window_bounds = array<i64: 256, 256>}, {pipeline_mode = #tpu.pipeline_mode<synchronous>, transform_indices = @transform_4, window_bounds = array<i64: 1, 256>}, {transform_indices = @transform_5, window_bounds = array<i64: 128, 128>}, {transform_indices = @transform_6, window_bounds = array<i64: 128, 256>}, {pipeline_mode = #tpu.pipeline_mode<synchronous>, transform_indices = @transform_7, window_bounds = array<i64: 1, 256>}, {pipeline_mode = #tpu.pipeline_mode<synchronous>, transform_indices = @transform_8, window_bounds = array<i64: 1, 256>}, {pipeline_mode = #tpu.pipeline_mode<synchronous>, transform_indices = @transform_9, window_bounds = array<i64: 128, 256>}]} {
    %c0_i32 = arith.constant 0 : i32
    %0 = arith.cmpi eq, %arg0, %c0_i32 : i32
    %1 = arith.extui %0 : i1 to i32
    %c0_i32_0 = arith.constant 0 : i32
    %2 = arith.cmpi ne, %1, %c0_i32_0 : i32
    scf.if %2 {
      %c0_16 = arith.constant 0 : index
      %c0_17 = arith.constant 0 : index
      %18 = vector.load %arg1[%c0_16, %c0_17] : memref<128x256xf32, #tpu.memory_space<vmem>>, vector<128x256xf32>
      %c0_18 = arith.constant 0 : index
      %c0_19 = arith.constant 0 : index
      %19 = vector.load %arg2[%c0_18, %c0_19] : memref<1x256xf32, #tpu.memory_space<vmem>>, vector<1x256xf32>
      %20 = vector.broadcast %19 : vector<1x256xf32> to vector<128x256xf32>
      %21 = arith.mulf %18, %20 : vector<128x256xf32>
      %c0_20 = arith.constant 0 : index
      %c0_21 = arith.constant 0 : index
      %22 = vector.load %arg3[%c0_20, %c0_21] : memref<1x256xf32, #tpu.memory_space<vmem>>, vector<1x256xf32>
      %23 = vector.broadcast %22 : vector<1x256xf32> to vector<128x256xf32>
      %24 = arith.addf %21, %23 : vector<128x256xf32>
      %cst_22 = arith.constant 0.000000e+00 : f32
      %25 = vector.broadcast %cst_22 : f32 to vector<128x256xf32>
      %26 = arith.maximumf %24, %25 : vector<128x256xf32>
      %c0_23 = arith.constant 0 : index
      %c0_24 = arith.constant 0 : index
      %27 = vector.load %arg10[%c0_23, %c0_24] : memref<128x256xf32, #tpu.memory_space<vmem>>, vector<128x256xf32>
      tpu.vector_store %arg10[%c0_23, %c0_24], %26 {strides = array<i32>} : memref<128x256xf32, #tpu.memory_space<vmem>>, vector<128x256xf32>,
      %c0_25 = arith.constant 0 : index
      %c0_26 = arith.constant 0 : index
      %28 = vector.load %arg4[%c0_25, %c0_26] : memref<256x256xf32, #tpu.memory_space<vmem>>, vector<256x256xf32>
      %cst_27 = arith.constant dense<0.000000e+00> : vector<128x256xf32>
      %29 = tpu.matmul %26, %28, %cst_27 {dimension_numbers = #tpu.dot_dimension_numbers<[1], [0], [0], [1], [0, 0, 1, 1], [], []>} : vector<128x256xf32>, vector<256x256xf32>, vector<128x256xf32> -> vector<128x256xf32>
      %c0_28 = arith.constant 0 : index
      %c0_29 = arith.constant 0 : index
      %30 = vector.load %arg5[%c0_28, %c0_29] : memref<1x256xf32, #tpu.memory_space<vmem>>, vector<1x256xf32>
      %31 = vector.broadcast %30 : vector<1x256xf32> to vector<128x256xf32>
      %32 = arith.addf %29, %31 : vector<128x256xf32>
      %c0_30 = arith.constant 0 : index
      %c0_31 = arith.constant 0 : index
      %33 = vector.load %arg11[%c0_30, %c0_31] : memref<128x256xf32, #tpu.memory_space<vmem>>, vector<128x256xf32>
      tpu.vector_store %arg11[%c0_30, %c0_31], %32 {strides = array<i32>} : memref<128x256xf32, #tpu.memory_space<vmem>>, vector<128x256xf32>,
      %cst_32 = arith.constant 0.000000e+00 : f32
      %34 = vector.broadcast %cst_32 : f32 to vector<1x256xf32>
      %c0_33 = arith.constant 0 : index
      %c0_34 = arith.constant 0 : index
      %35 = vector.load %arg8[%c0_33, %c0_34] : memref<1x256xf32, #tpu.memory_space<vmem>>, vector<1x256xf32>
      tpu.vector_store %arg8[%c0_33, %c0_34], %34 {strides = array<i32>} : memref<1x256xf32, #tpu.memory_space<vmem>>, vector<1x256xf32>,
      %cst_35 = arith.constant 0.000000e+00 : f32
      %36 = vector.broadcast %cst_35 : f32 to vector<1x256xf32>
      %c0_36 = arith.constant 0 : index
      %c0_37 = arith.constant 0 : index
      %37 = vector.load %arg9[%c0_36, %c0_37] : memref<1x256xf32, #tpu.memory_space<vmem>>, vector<1x256xf32>
      tpu.vector_store %arg9[%c0_36, %c0_37], %36 {strides = array<i32>} : memref<1x256xf32, #tpu.memory_space<vmem>>, vector<1x256xf32>,
    } else {
    }
    %c0 = arith.constant 0 : index
    %c0_1 = arith.constant 0 : index
    %3 = vector.load %arg6[%c0, %c0_1] : memref<128x128xf32, #tpu.memory_space<vmem>>, vector<128x128xf32>
    %c0_2 = arith.constant 0 : index
    %c0_3 = arith.constant 0 : index
    %4 = vector.load %arg11[%c0_2, %c0_3] : memref<128x256xf32, #tpu.memory_space<vmem>>, vector<128x256xf32>
    %cst = arith.constant dense<0.000000e+00> : vector<128x256xf32>
    %5 = tpu.matmul %3, %4, %cst {dimension_numbers = #tpu.dot_dimension_numbers<[1], [0], [0], [1], [0, 0, 1, 1], [], []>} : vector<128x128xf32>, vector<128x256xf32>, vector<128x256xf32> -> vector<128x256xf32>
    %c0_4 = arith.constant 0 : index
    %c0_5 = arith.constant 0 : index
    %6 = vector.load %arg7[%c0_4, %c0_5] : memref<128x256xf32, #tpu.memory_space<vmem>>, vector<128x256xf32>
    tpu.vector_store %arg7[%c0_4, %c0_5], %5 {strides = array<i32>} : memref<128x256xf32, #tpu.memory_space<vmem>>, vector<128x256xf32>,
    %c0_6 = arith.constant 0 : index
    %c0_7 = arith.constant 0 : index
    %7 = vector.load %arg8[%c0_6, %c0_7] : memref<1x256xf32, #tpu.memory_space<vmem>>, vector<1x256xf32>
    %cst_8 = arith.constant dense<0.000000e+00> : vector<256xf32>
    %8 = vector.multi_reduction <add>, %5, %cst_8 [0] : vector<128x256xf32> to vector<256xf32>
    %9 = vector.shape_cast %8 : vector<256xf32> to vector<1x256xf32>
    %10 = arith.addf %7, %9 : vector<1x256xf32>
    %c0_9 = arith.constant 0 : index
    %c0_10 = arith.constant 0 : index
    %11 = vector.load %arg8[%c0_9, %c0_10] : memref<1x256xf32, #tpu.memory_space<vmem>>, vector<1x256xf32>
    tpu.vector_store %arg8[%c0_9, %c0_10], %10 {strides = array<i32>} : memref<1x256xf32, #tpu.memory_space<vmem>>, vector<1x256xf32>,
    %c0_11 = arith.constant 0 : index
    %c0_12 = arith.constant 0 : index
    %12 = vector.load %arg9[%c0_11, %c0_12] : memref<1x256xf32, #tpu.memory_space<vmem>>, vector<1x256xf32>
    %13 = arith.mulf %5, %5 : vector<128x256xf32>
    %cst_13 = arith.constant dense<0.000000e+00> : vector<256xf32>
    %14 = vector.multi_reduction <add>, %13, %cst_13 [0] : vector<128x256xf32> to vector<256xf32>
    %15 = vector.shape_cast %14 : vector<256xf32> to vector<1x256xf32>
    %16 = arith.addf %12, %15 : vector<1x256xf32>
    %c0_14 = arith.constant 0 : index
    %c0_15 = arith.constant 0 : index
    %17 = vector.load %arg9[%c0_14, %c0_15] : memref<1x256xf32, #tpu.memory_space<vmem>>, vector<1x256xf32>
    tpu.vector_store %arg9[%c0_14, %c0_15], %16 {strides = array<i32>} : memref<1x256xf32, #tpu.memory_space<vmem>>, vector<1x256xf32>,
    return
  }
  func.func @transform_0(%arg0: i32) -> (i32, i32) {
    %c0_i32 = arith.constant 0 : i32
    %c0_i32_0 = arith.constant 0 : i32
    %c0_i32_1 = arith.constant 0 : i32
    return %c0_i32, %c0_i32_0 : i32, i32
  }
  func.func @transform_1(%arg0: i32) -> (i32, i32) {
    %c0_i32 = arith.constant 0 : i32
    %c0_i32_0 = arith.constant 0 : i32
    %c0_i32_1 = arith.constant 0 : i32
    return %c0_i32, %c0_i32_0 : i32, i32
  }
  func.func @transform_2(%arg0: i32) -> (i32, i32) {
    %c0_i32 = arith.constant 0 : i32
    %c0_i32_0 = arith.constant 0 : i32
    %c0_i32_1 = arith.constant 0 : i32
    return %c0_i32, %c0_i32_0 : i32, i32
  }
  func.func @transform_3(%arg0: i32) -> (i32, i32) {
    %c0_i32 = arith.constant 0 : i32
    %c0_i32_0 = arith.constant 0 : i32
    %c0_i32_1 = arith.constant 0 : i32
    return %c0_i32, %c0_i32_0 : i32, i32
  }
  func.func @transform_4(%arg0: i32) -> (i32, i32) {
    %c0_i32 = arith.constant 0 : i32
    %c0_i32_0 = arith.constant 0 : i32
    %c0_i32_1 = arith.constant 0 : i32
    return %c0_i32, %c0_i32_0 : i32, i32
  }
  func.func @transform_5(%arg0: i32) -> (i32, i32) {
    %c0_i32 = arith.constant 0 : i32
    %c0_i32_0 = arith.constant 0 : i32
    return %arg0, %c0_i32 : i32, i32
  }
  func.func @transform_6(%arg0: i32) -> (i32, i32) {
    %c0_i32 = arith.constant 0 : i32
    %c0_i32_0 = arith.constant 0 : i32
    return %arg0, %c0_i32 : i32, i32
  }
  func.func @transform_7(%arg0: i32) -> (i32, i32) {
    %c0_i32 = arith.constant 0 : i32
    %c0_i32_0 = arith.constant 0 : i32
    %c0_i32_1 = arith.constant 0 : i32
    return %c0_i32, %c0_i32_0 : i32, i32
  }
  func.func @transform_8(%arg0: i32) -> (i32, i32) {
    %c0_i32 = arith.constant 0 : i32
    %c0_i32_0 = arith.constant 0 : i32
    %c0_i32_1 = arith.constant 0 : i32
    return %c0_i32, %c0_i32_0 : i32, i32
  }
  func.func @transform_9(%arg0: i32) -> (i32, i32) {
    %c0_i32 = arith.constant 0 : i32
    %c0_i32_0 = arith.constant 0 : i32
    %c0_i32_1 = arith.constant 0 : i32
    return %c0_i32, %c0_i32_0 : i32, i32
  }
}

module attributes {stable_mosaic.version = 11 : i64} {
  func.func @_fused_layer_kernel(%arg0: i32, %arg1: memref<128x256xf32, #tpu.memory_space<vmem>>, %arg2: memref<128x256xf32, #tpu.memory_space<vmem>>, %arg3: memref<1x256xf32, #tpu.memory_space<vmem>>, %arg4: memref<1x256xf32, #tpu.memory_space<vmem>>, %arg5: memref<256x128xf32, #tpu.memory_space<vmem>>, %arg6: memref<1x128xf32, #tpu.memory_space<vmem>>, %arg7: memref<256x128xf32, #tpu.memory_space<vmem>>, %arg8: memref<256x128xf32, #tpu.memory_space<vmem>>, %arg9: memref<1x128xf32, #tpu.memory_space<vmem>>, %arg10: memref<1x128xf32, #tpu.memory_space<vmem>>, %arg11: memref<128x128xf32, #tpu.memory_space<vmem>>) attributes {dimension_semantics = [#tpu.dimension_semantics<arbitrary>], iteration_bounds = array<i64: 1>, scalar_prefetch = 0 : i64, scratch_operands = 1 : i64, tpu.core_type = #tpu.core_type<tc>, window_params = [{pipeline_mode = #tpu.pipeline_mode<synchronous>, transform_indices = @transform_0, window_bounds = array<i64: 128, 256>}, {pipeline_mode = #tpu.pipeline_mode<synchronous>, transform_indices = @transform_1, window_bounds = array<i64: 128, 256>}, {pipeline_mode = #tpu.pipeline_mode<synchronous>, transform_indices = @transform_2, window_bounds = array<i64: 1, 256>}, {pipeline_mode = #tpu.pipeline_mode<synchronous>, transform_indices = @transform_3, window_bounds = array<i64: 1, 256>}, {pipeline_mode = #tpu.pipeline_mode<synchronous>, transform_indices = @transform_4, window_bounds = array<i64: 256, 128>}, {pipeline_mode = #tpu.pipeline_mode<synchronous>, transform_indices = @transform_5, window_bounds = array<i64: 1, 128>}, {transform_indices = @transform_6, window_bounds = array<i64: 256, 128>}, {transform_indices = @transform_7, window_bounds = array<i64: 256, 128>}, {pipeline_mode = #tpu.pipeline_mode<synchronous>, transform_indices = @transform_8, window_bounds = array<i64: 1, 128>}, {pipeline_mode = #tpu.pipeline_mode<synchronous>, transform_indices = @transform_9, window_bounds = array<i64: 1, 128>}]} {
    %c0_i32 = arith.constant 0 : i32
    %0 = arith.cmpi eq, %arg0, %c0_i32 : i32
    %1 = arith.extui %0 : i1 to i32
    %c0_i32_0 = arith.constant 0 : i32
    %2 = arith.cmpi ne, %1, %c0_i32_0 : i32
    scf.if %2 {
      %c0_16 = arith.constant 0 : index
      %c0_17 = arith.constant 0 : index
      %18 = vector.load %arg1[%c0_16, %c0_17] : memref<128x256xf32, #tpu.memory_space<vmem>>, vector<128x256xf32>
      %c0_18 = arith.constant 0 : index
      %c0_19 = arith.constant 0 : index
      %19 = vector.load %arg3[%c0_18, %c0_19] : memref<1x256xf32, #tpu.memory_space<vmem>>, vector<1x256xf32>
      %20 = vector.broadcast %19 : vector<1x256xf32> to vector<128x256xf32>
      %21 = arith.mulf %18, %20 : vector<128x256xf32>
      %c0_20 = arith.constant 0 : index
      %c0_21 = arith.constant 0 : index
      %22 = vector.load %arg4[%c0_20, %c0_21] : memref<1x256xf32, #tpu.memory_space<vmem>>, vector<1x256xf32>
      %23 = vector.broadcast %22 : vector<1x256xf32> to vector<128x256xf32>
      %24 = arith.addf %21, %23 : vector<128x256xf32>
      %c0_22 = arith.constant 0 : index
      %c0_23 = arith.constant 0 : index
      %25 = vector.load %arg2[%c0_22, %c0_23] : memref<128x256xf32, #tpu.memory_space<vmem>>, vector<128x256xf32>
      %26 = arith.addf %24, %25 : vector<128x256xf32>
      %cst_24 = arith.constant 0.000000e+00 : f32
      %27 = vector.broadcast %cst_24 : f32 to vector<128x256xf32>
      %28 = arith.maximumf %26, %27 : vector<128x256xf32>
      %c0_25 = arith.constant 0 : index
      %c0_26 = arith.constant 0 : index
      %29 = vector.load %arg5[%c0_25, %c0_26] : memref<256x128xf32, #tpu.memory_space<vmem>>, vector<256x128xf32>
      %cst_27 = arith.constant dense<0.000000e+00> : vector<128x128xf32>
      %30 = tpu.matmul %28, %29, %cst_27 {dimension_numbers = #tpu.dot_dimension_numbers<[1], [0], [0], [1], [0, 0, 1, 1], [], []>} : vector<128x256xf32>, vector<256x128xf32>, vector<128x128xf32> -> vector<128x128xf32>
      %c0_28 = arith.constant 0 : index
      %c0_29 = arith.constant 0 : index
      %31 = vector.load %arg6[%c0_28, %c0_29] : memref<1x128xf32, #tpu.memory_space<vmem>>, vector<1x128xf32>
      %32 = vector.broadcast %31 : vector<1x128xf32> to vector<128x128xf32>
      %33 = arith.addf %30, %32 : vector<128x128xf32>
      %c0_30 = arith.constant 0 : index
      %c0_31 = arith.constant 0 : index
      %34 = vector.load %arg11[%c0_30, %c0_31] : memref<128x128xf32, #tpu.memory_space<vmem>>, vector<128x128xf32>
      tpu.vector_store %arg11[%c0_30, %c0_31], %33 {strides = array<i32>} : memref<128x128xf32, #tpu.memory_space<vmem>>, vector<128x128xf32>,
      %cst_32 = arith.constant 0.000000e+00 : f32
      %35 = vector.broadcast %cst_32 : f32 to vector<1x128xf32>
      %c0_33 = arith.constant 0 : index
      %c0_34 = arith.constant 0 : index
      %36 = vector.load %arg9[%c0_33, %c0_34] : memref<1x128xf32, #tpu.memory_space<vmem>>, vector<1x128xf32>
      tpu.vector_store %arg9[%c0_33, %c0_34], %35 {strides = array<i32>} : memref<1x128xf32, #tpu.memory_space<vmem>>, vector<1x128xf32>,
      %cst_35 = arith.constant 0.000000e+00 : f32
      %37 = vector.broadcast %cst_35 : f32 to vector<1x128xf32>
      %c0_36 = arith.constant 0 : index
      %c0_37 = arith.constant 0 : index
      %38 = vector.load %arg10[%c0_36, %c0_37] : memref<1x128xf32, #tpu.memory_space<vmem>>, vector<1x128xf32>
      tpu.vector_store %arg10[%c0_36, %c0_37], %37 {strides = array<i32>} : memref<1x128xf32, #tpu.memory_space<vmem>>, vector<1x128xf32>,
    } else {
    }
    %c0 = arith.constant 0 : index
    %c0_1 = arith.constant 0 : index
    %3 = vector.load %arg7[%c0, %c0_1] : memref<256x128xf32, #tpu.memory_space<vmem>>, vector<256x128xf32>
    %c0_2 = arith.constant 0 : index
    %c0_3 = arith.constant 0 : index
    %4 = vector.load %arg11[%c0_2, %c0_3] : memref<128x128xf32, #tpu.memory_space<vmem>>, vector<128x128xf32>
    %cst = arith.constant dense<0.000000e+00> : vector<256x128xf32>
    %5 = tpu.matmul %3, %4, %cst {dimension_numbers = #tpu.dot_dimension_numbers<[1], [0], [0], [1], [0, 0, 1, 1], [], []>} : vector<256x128xf32>, vector<128x128xf32>, vector<256x128xf32> -> vector<256x128xf32>
    %c0_4 = arith.constant 0 : index
    %c0_5 = arith.constant 0 : index
    %6 = vector.load %arg8[%c0_4, %c0_5] : memref<256x128xf32, #tpu.memory_space<vmem>>, vector<256x128xf32>
    tpu.vector_store %arg8[%c0_4, %c0_5], %5 {strides = array<i32>} : memref<256x128xf32, #tpu.memory_space<vmem>>, vector<256x128xf32>,
    %c0_6 = arith.constant 0 : index
    %c0_7 = arith.constant 0 : index
    %7 = vector.load %arg9[%c0_6, %c0_7] : memref<1x128xf32, #tpu.memory_space<vmem>>, vector<1x128xf32>
    %cst_8 = arith.constant dense<0.000000e+00> : vector<128xf32>
    %8 = vector.multi_reduction <add>, %5, %cst_8 [0] : vector<256x128xf32> to vector<128xf32>
    %9 = vector.shape_cast %8 : vector<128xf32> to vector<1x128xf32>
    %10 = arith.addf %7, %9 : vector<1x128xf32>
    %c0_9 = arith.constant 0 : index
    %c0_10 = arith.constant 0 : index
    %11 = vector.load %arg9[%c0_9, %c0_10] : memref<1x128xf32, #tpu.memory_space<vmem>>, vector<1x128xf32>
    tpu.vector_store %arg9[%c0_9, %c0_10], %10 {strides = array<i32>} : memref<1x128xf32, #tpu.memory_space<vmem>>, vector<1x128xf32>,
    %c0_11 = arith.constant 0 : index
    %c0_12 = arith.constant 0 : index
    %12 = vector.load %arg10[%c0_11, %c0_12] : memref<1x128xf32, #tpu.memory_space<vmem>>, vector<1x128xf32>
    %13 = arith.mulf %5, %5 : vector<256x128xf32>
    %cst_13 = arith.constant dense<0.000000e+00> : vector<128xf32>
    %14 = vector.multi_reduction <add>, %13, %cst_13 [0] : vector<256x128xf32> to vector<128xf32>
    %15 = vector.shape_cast %14 : vector<128xf32> to vector<1x128xf32>
    %16 = arith.addf %12, %15 : vector<1x128xf32>
    %c0_14 = arith.constant 0 : index
    %c0_15 = arith.constant 0 : index
    %17 = vector.load %arg10[%c0_14, %c0_15] : memref<1x128xf32, #tpu.memory_space<vmem>>, vector<1x128xf32>
    tpu.vector_store %arg10[%c0_14, %c0_15], %16 {strides = array<i32>} : memref<1x128xf32, #tpu.memory_space<vmem>>, vector<1x128xf32>,
    return
  }
  func.func @transform_0(%arg0: i32) -> (i32, i32) {
    %c0_i32 = arith.constant 0 : i32
    %c0_i32_0 = arith.constant 0 : i32
    %c0_i32_1 = arith.constant 0 : i32
    return %c0_i32, %c0_i32_0 : i32, i32
  }
  func.func @transform_1(%arg0: i32) -> (i32, i32) {
    %c0_i32 = arith.constant 0 : i32
    %c0_i32_0 = arith.constant 0 : i32
    %c0_i32_1 = arith.constant 0 : i32
    return %c0_i32, %c0_i32_0 : i32, i32
  }
  func.func @transform_2(%arg0: i32) -> (i32, i32) {
    %c0_i32 = arith.constant 0 : i32
    %c0_i32_0 = arith.constant 0 : i32
    %c0_i32_1 = arith.constant 0 : i32
    return %c0_i32, %c0_i32_0 : i32, i32
  }
  func.func @transform_3(%arg0: i32) -> (i32, i32) {
    %c0_i32 = arith.constant 0 : i32
    %c0_i32_0 = arith.constant 0 : i32
    %c0_i32_1 = arith.constant 0 : i32
    return %c0_i32, %c0_i32_0 : i32, i32
  }
  func.func @transform_4(%arg0: i32) -> (i32, i32) {
    %c0_i32 = arith.constant 0 : i32
    %c0_i32_0 = arith.constant 0 : i32
    %c0_i32_1 = arith.constant 0 : i32
    return %c0_i32, %c0_i32_0 : i32, i32
  }
  func.func @transform_5(%arg0: i32) -> (i32, i32) {
    %c0_i32 = arith.constant 0 : i32
    %c0_i32_0 = arith.constant 0 : i32
    %c0_i32_1 = arith.constant 0 : i32
    return %c0_i32, %c0_i32_0 : i32, i32
  }
  func.func @transform_6(%arg0: i32) -> (i32, i32) {
    %c0_i32 = arith.constant 0 : i32
    %c0_i32_0 = arith.constant 0 : i32
    return %arg0, %c0_i32 : i32, i32
  }
  func.func @transform_7(%arg0: i32) -> (i32, i32) {
    %c0_i32 = arith.constant 0 : i32
    %c0_i32_0 = arith.constant 0 : i32
    return %arg0, %c0_i32 : i32, i32
  }
  func.func @transform_8(%arg0: i32) -> (i32, i32) {
    %c0_i32 = arith.constant 0 : i32
    %c0_i32_0 = arith.constant 0 : i32
    %c0_i32_1 = arith.constant 0 : i32
    return %c0_i32, %c0_i32_0 : i32, i32
  }
  func.func @transform_9(%arg0: i32) -> (i32, i32) {
    %c0_i32 = arith.constant 0 : i32
    %c0_i32_0 = arith.constant 0 : i32
    %c0_i32_1 = arith.constant 0 : i32
    return %c0_i32, %c0_i32_0 : i32, i32
  }
}

module attributes {stable_mosaic.version = 11 : i64} {
  func.func @_bn_tanh_fc_kernel(%arg0: i32, %arg1: memref<128x128xf32, #tpu.memory_space<vmem>>, %arg2: memref<1x128xf32, #tpu.memory_space<vmem>>, %arg3: memref<1x128xf32, #tpu.memory_space<vmem>>, %arg4: memref<128x128xf32, #tpu.memory_space<vmem>>, %arg5: memref<1x128xf32, #tpu.memory_space<vmem>>, %arg6: memref<128x128xf32, #tpu.memory_space<vmem>>, %arg7: memref<128x128xf32, #tpu.memory_space<vmem>>) attributes {dimension_semantics = [#tpu.dimension_semantics<parallel>], iteration_bounds = array<i64: 2>, scalar_prefetch = 0 : i64, scratch_operands = 0 : i64, tpu.core_type = #tpu.core_type<tc>, window_params = [{transform_indices = @transform_0, window_bounds = array<i64: 128, 128>}, {pipeline_mode = #tpu.pipeline_mode<synchronous>, transform_indices = @transform_1, window_bounds = array<i64: 1, 128>}, {pipeline_mode = #tpu.pipeline_mode<synchronous>, transform_indices = @transform_2, window_bounds = array<i64: 1, 128>}, {pipeline_mode = #tpu.pipeline_mode<synchronous>, transform_indices = @transform_3, window_bounds = array<i64: 128, 128>}, {pipeline_mode = #tpu.pipeline_mode<synchronous>, transform_indices = @transform_4, window_bounds = array<i64: 1, 128>}, {transform_indices = @transform_5, window_bounds = array<i64: 128, 128>}, {transform_indices = @transform_6, window_bounds = array<i64: 128, 128>}]} {
    %c0 = arith.constant 0 : index
    %c0_0 = arith.constant 0 : index
    %0 = vector.load %arg1[%c0, %c0_0] : memref<128x128xf32, #tpu.memory_space<vmem>>, vector<128x128xf32>
    %c0_1 = arith.constant 0 : index
    %c0_2 = arith.constant 0 : index
    %1 = vector.load %arg2[%c0_1, %c0_2] : memref<1x128xf32, #tpu.memory_space<vmem>>, vector<1x128xf32>
    %2 = vector.broadcast %1 : vector<1x128xf32> to vector<128x128xf32>
    %3 = arith.mulf %0, %2 : vector<128x128xf32>
    %c0_3 = arith.constant 0 : index
    %c0_4 = arith.constant 0 : index
    %4 = vector.load %arg3[%c0_3, %c0_4] : memref<1x128xf32, #tpu.memory_space<vmem>>, vector<1x128xf32>
    %5 = vector.broadcast %4 : vector<1x128xf32> to vector<128x128xf32>
    %6 = arith.addf %3, %5 : vector<128x128xf32>
    %7 = math.tanh %6 : vector<128x128xf32>
    %c0_5 = arith.constant 0 : index
    %c0_6 = arith.constant 0 : index
    %8 = vector.load %arg6[%c0_5, %c0_6] : memref<128x128xf32, #tpu.memory_space<vmem>>, vector<128x128xf32>
    tpu.vector_store %arg6[%c0_5, %c0_6], %7 {strides = array<i32>} : memref<128x128xf32, #tpu.memory_space<vmem>>, vector<128x128xf32>,
    %c0_7 = arith.constant 0 : index
    %c0_8 = arith.constant 0 : index
    %9 = vector.load %arg4[%c0_7, %c0_8] : memref<128x128xf32, #tpu.memory_space<vmem>>, vector<128x128xf32>
    %cst = arith.constant dense<0.000000e+00> : vector<128x128xf32>
    %10 = tpu.matmul %7, %9, %cst {dimension_numbers = #tpu.dot_dimension_numbers<[1], [0], [0], [1], [0, 0, 1, 1], [], []>} : vector<128x128xf32>, vector<128x128xf32>, vector<128x128xf32> -> vector<128x128xf32>
    %c0_9 = arith.constant 0 : index
    %c0_10 = arith.constant 0 : index
    %11 = vector.load %arg5[%c0_9, %c0_10] : memref<1x128xf32, #tpu.memory_space<vmem>>, vector<1x128xf32>
    %12 = vector.broadcast %11 : vector<1x128xf32> to vector<128x128xf32>
    %13 = arith.addf %10, %12 : vector<128x128xf32>
    %c0_11 = arith.constant 0 : index
    %c0_12 = arith.constant 0 : index
    %14 = vector.load %arg7[%c0_11, %c0_12] : memref<128x128xf32, #tpu.memory_space<vmem>>, vector<128x128xf32>
    tpu.vector_store %arg7[%c0_11, %c0_12], %13 {strides = array<i32>} : memref<128x128xf32, #tpu.memory_space<vmem>>, vector<128x128xf32>,
    return
  }
  func.func @transform_0(%arg0: i32) -> (i32, i32) {
    %c0_i32 = arith.constant 0 : i32
    %c0_i32_0 = arith.constant 0 : i32
    return %arg0, %c0_i32 : i32, i32
  }
  func.func @transform_1(%arg0: i32) -> (i32, i32) {
    %c0_i32 = arith.constant 0 : i32
    %c0_i32_0 = arith.constant 0 : i32
    %c0_i32_1 = arith.constant 0 : i32
    return %c0_i32, %c0_i32_0 : i32, i32
  }
  func.func @transform_2(%arg0: i32) -> (i32, i32) {
    %c0_i32 = arith.constant 0 : i32
    %c0_i32_0 = arith.constant 0 : i32
    %c0_i32_1 = arith.constant 0 : i32
    return %c0_i32, %c0_i32_0 : i32, i32
  }
  func.func @transform_3(%arg0: i32) -> (i32, i32) {
    %c0_i32 = arith.constant 0 : i32
    %c0_i32_0 = arith.constant 0 : i32
    %c0_i32_1 = arith.constant 0 : i32
    return %c0_i32, %c0_i32_0 : i32, i32
  }
  func.func @transform_4(%arg0: i32) -> (i32, i32) {
    %c0_i32 = arith.constant 0 : i32
    %c0_i32_0 = arith.constant 0 : i32
    %c0_i32_1 = arith.constant 0 : i32
    return %c0_i32, %c0_i32_0 : i32, i32
  }
  func.func @transform_5(%arg0: i32) -> (i32, i32) {
    %c0_i32 = arith.constant 0 : i32
    %c0_i32_0 = arith.constant 0 : i32
    return %arg0, %c0_i32 : i32, i32
  }
  func.func @transform_6(%arg0: i32) -> (i32, i32) {
    %c0_i32 = arith.constant 0 : i32
    %c0_i32_0 = arith.constant 0 : i32
    return %arg0, %c0_i32 : i32, i32
  }
}

</mosaic_0001>

<bundles_post_ra>
// kernel: _lambda_.7
= control target key start
LH: loop header
LB: loop body
LE: loop exit
PB: predicated region body
PF: predicated region fallthrough
CT: control target
= control target key end

     0   :  { %s872_s21 = smov 0   ;;  %s1044_s0 = inlined_call_operand.vmem [shape: f32[256,128], index: 0, kind: input, shape index: {}]   ;;  %s1045_s1 = inlined_call_operand.vmem [shape: f32[1,128], index: 1, kind: input, shape index: {}]   ;;  %s1046_s2 = inlined_call_operand.vmem [shape: f32[1,128], index: 2, kind: input, shape index: {}]   ;;  %s1047_s3 = inlined_call_operand.vmem [shape: f32[128,128], index: 3, kind: input, shape index: {}]   ;;  %s1048_s4 = inlined_call_operand.vmem [shape: f32[1,128], index: 4, kind: input, shape index: {}]   ;;  %s1049_s5 = inlined_call_operand.vmem [shape: f32[256,128], index: 5, kind: output, shape index: {0}]   ;;  %s1050_s6 = inlined_call_operand.vmem [shape: f32[256,128], index: 6, kind: output, shape index: {1}]  }
   0x1 LB: > { %s637_s22 = sadd.s32 4294967295, %s835_s21   ;;  %p641_p0 = scmp.ge.s32.totalorder %s835_s21, 1  ;;  %s835_s21 = sphi %s872_s21, %s17_s21  }
   0x2   : > { %p216_p1 = scmp.lt.s32.totalorder %s835_s21, 3 }
   0x4   : > { %p217_p2 = pnand %p641_p0, %p216_p1 }
   0x5   : > { %v363_v0 = vld [vmem:[%s1047_s3] sm:$0xff] (!%p217_p2)  ;;  %v364_v1 = vld [vmem:[%s1047_s3 + $0x8] sm:$0xff] (!%p217_p2)  ;;  %v365_v2 = vld [vmem:[%s1047_s3 + $0x10] sm:$0xff] (!%p217_p2)  ;;  %s642_s29 = sshll.u32 (!%p217_p2), %s637_s22, 4 }
   0x6   : > { %220 = sbr.rel (%p217_p2) target bundleno = 269 (0x10d), region = 40  ;;  %v741_v3 = vpack.c.bf16 (!%p217_p2), %v364_v1, %v363_v0  ;;  %v366_v4 = vld [vmem:[%s1047_s3 + $0x18] sm:$0xff] (!%p217_p2)  ;;  %p252_p3 = scmp.lt.s32.totalorder (!%p217_p2), %s642_s29, 31  ;;  %v367_v6 = vld [vmem:[%s1047_s3 + $0x20] sm:$0xff] (!%p217_p2)  ;;  %v368_v7 = vld [vmem:[%s1047_s3 + $0x28] sm:$0xff] (!%p217_p2) }
   0x7   : > { %v745_v5 = vpack.c.bf16 (!%p217_p2), %v366_v4, %v365_v2  ;;  %v369_v8 = vld [vmem:[%s1047_s3 + $0x30] sm:$0xff] (!%p217_p2)  ;;  %v370_v9 = vld [vmem:[%s1047_s3 + $0x38] sm:$0xff] (!%p217_p2)  ;;  %v749_v10 = vpack.c.bf16 (!%p217_p2), %v368_v7, %v367_v6  ;;  %v909_v11 = vld [vmem:[%s1045_s1] ss:$0 sm:$0xff] (!%p217_p2) }
   0x8   : > { %742 = vmatprep.subr.bf16.mxu0 (!%p217_p2), %v741_v3  ;;  %773 = vmatprep.subr.bf16.mxu1 (!%p217_p2), %v741_v3  ;;  %v920_v12 = vld [vmem:[%s1046_s2] ss:$0 sm:$0xff] (!%p217_p2)  ;;  %v753_v13 = vpack.c.bf16 (!%p217_p2), %v370_v9, %v369_v8  ;;  %v372_v30 = vld [vmem:[%s1047_s3 + $0x48] sm:$0xff] (!%p217_p2)  ;;  %v373_v46 = vld [vmem:[%s1047_s3 + $0x50] sm:$0xff] (!%p217_p2) }
   0x9   : > { %744 = vmatpush3.bf16.msra.mxu0 (!%p217_p2), %v741_v3  ;;  %781 = vmatpush3.bf16.msra.mxu1 (!%p217_p2), %v741_v3  ;;  %v371_v29 = vld [vmem:[%s1047_s3 + $0x40] sm:$0xff] (!%p217_p2)  ;;  %v374_v47 = vld [vmem:[%s1047_s3 + $0x58] sm:$0xff] (!%p217_p2)  ;;  %v376_v61 = vld [vmem:[%s1047_s3 + $0x68] sm:$0xff] (!%p217_p2) }
   0xa   : > { %746 = vmatprep.subr.bf16.mxu0 (!%p217_p2), %v745_v5  ;;  %774 = vmatprep.subr.bf16.mxu1 (!%p217_p2), %v745_v5  ;;  %v757_v42 = vpack.c.bf16 (!%p217_p2), %v372_v30, %v371_v29  ;;  %v761_v57 = vpack.c.bf16 (!%p217_p2), %v374_v47, %v373_v46  ;;  %v375_v60 = vld [vmem:[%s1047_s3 + $0x60] sm:$0xff] (!%p217_p2)  ;;  %v377_v6 = vld [vmem:[%s1047_s3 + $0x70] sm:$0xff] (!%p217_p2)  ;;  %v378_v7 = vld [vmem:[%s1047_s3 + $0x78] sm:$0xff] (!%p217_p2) }
   0xb   : > { %v765_v3 = vpack.c.bf16 (!%p217_p2), %v376_v61, %v375_v60 }
   0xd   : > { %s1052_s29 = smov (!%p252_p3, %s642_s29), 31  ;;  %748 = vmatpush3.bf16.msra.mxu0 %v745_v5  ;;  %782 = vmatpush3.bf16.msra.mxu1 %v745_v5 }
   0xe   : > { %s904_s16 = sshll.u32 %s1052_s29, 3  ;;  %750 = vmatprep.subr.bf16.mxu0 %v749_v10  ;;  %775 = vmatprep.subr.bf16.mxu1 %v749_v10 }
   0xf   : > { %s915_s22 = scalar_lea.vmem %s1044_s0, %s904_s16  ;;  %s988_s15 = scalar_lea.vmem %s1049_s5, %s904_s16 }
  0x10   : > { %v269_v14 = vld [vmem:[%s915_s22] sm:$0xff]  ;;  %v270_v16 = vld [vmem:[%s915_s22 + $0x8] sm:$0xff]  ;;  %v271_v21 = vld [vmem:[%s915_s22 + $0x10] sm:$0xff]  ;;  %s1023_s26 = scalar_lea.vmem %s1050_s6, %s904_s16 }
  0x11   : > { %v277_v15 = vld [vmem:[%s915_s22 + $0x40] sm:$0xff]  ;;  %v292_v17 = vmul.f32 %v909_v11, %v269_v14  ;;  %v293_v19 = vmul.f32 %v909_v11, %v270_v16  ;;  %v278_v20 = vld [vmem:[%s915_s22 + $0x48] sm:$0xff]  ;;  %v279_v22 = vld [vmem:[%s915_s22 + $0x50] sm:$0xff]  ;;  %v294_v24 = vmul.f32 %v909_v11, %v271_v21  ;;  %752 = vmatpush3.bf16.msra.mxu0 %v749_v10  ;;  %783 = vmatpush3.bf16.msra.mxu1 %v749_v10 }
  0x12   : > { %v300_v18 = vmul.f32 %v909_v11, %v277_v15  ;;  %v301_v23 = vmul.f32 %v909_v11, %v278_v20  ;;  %v302_v25 = vmul.f32 %v909_v11, %v279_v22  ;;  %v272_v26 = vld [vmem:[%s915_s22 + $0x18] sm:$0xff]  ;;  %v273_v28 = vld [vmem:[%s915_s22 + $0x20] sm:$0xff]  ;;  %v274_v38 = vld [vmem:[%s915_s22 + $0x28] sm:$0xff]  ;;  %754 = vmatprep.subr.bf16.mxu0 %v753_v13  ;;  %776 = vmatprep.subr.bf16.mxu1 %v753_v13 }
  0x13   : > { %v280_v27 = vld [vmem:[%s915_s22 + $0x58] sm:$0xff]  ;;  %v315_v31 = vadd.f32 %v920_v12, %v292_v17  ;;  %v316_v33 = vadd.f32 %v920_v12, %v293_v19  ;;  %v295_v34 = vmul.f32 %v909_v11, %v272_v26  ;;  %v281_v35 = vld [vmem:[%s915_s22 + $0x60] sm:$0xff]  ;;  %v317_v39 = vadd.f32 %v920_v12, %v294_v24  ;;  %v282_v41 = vld [vmem:[%s915_s22 + $0x68] sm:$0xff] }
  0x14   : > { %v323_v32 = vadd.f32 %v920_v12, %v300_v18  ;;  %v324_v36 = vadd.f32 %v920_v12, %v301_v23  ;;  %v303_v37 = vmul.f32 %v909_v11, %v280_v27  ;;  %v296_v40 = vmul.f32 %v909_v11, %v273_v28  ;;  %v275_v45 = vld [vmem:[%s915_s22 + $0x30] sm:$0xff]  ;;  %v276_v53 = vld [vmem:[%s915_s22 + $0x38] sm:$0xff]  ;;  %v650_v26 = vld [vmem:[%s1048_s4] ss:$0 sm:$0xff] }
  0x15   : > { %797 = vtanh.f32 %v315_v31  ;;  %v325_v43 = vadd.f32 %v920_v12, %v302_v25  ;;  %v304_v44 = vmul.f32 %v909_v11, %v281_v35  ;;  %v318_v48 = vadd.f32 %v920_v12, %v295_v34  ;;  %v283_v50 = vld [vmem:[%s915_s22 + $0x70] sm:$0xff]  ;;  %756 = vmatpush3.bf16.msra.mxu0 %v753_v13  ;;  %784 = vmatpush3.bf16.msra.mxu1 %v753_v13  ;;  %v284_v56 = vld [vmem:[%s915_s22 + $0x78] sm:$0xff] }
  0x16   : > { %799 = vtanh.f32 %v323_v32  ;;  %v297_v49 = vmul.f32 %v909_v11, %v274_v38  ;;  %v326_v51 = vadd.f32 %v920_v12, %v303_v37  ;;  %v305_v52 = vmul.f32 %v909_v11, %v282_v41  ;;  %758 = vmatprep.subr.bf16.mxu0 %v757_v42  ;;  %777 = vmatprep.subr.bf16.mxu1 %v757_v42 }
  0x17   : > { %801 = vtanh.f32 %v316_v33  ;;  %v319_v54 = vadd.f32 %v920_v12, %v296_v40  ;;  %v298_v55 = vmul.f32 %v909_v11, %v275_v45  ;;  %v327_v58 = vadd.f32 %v920_v12, %v304_v44 }
  0x18   : > { %803 = vtanh.f32 %v324_v36  ;;  %v306_v59 = vmul.f32 %v909_v11, %v283_v50  ;;  %v320_v62 = vadd.f32 %v920_v12, %v297_v49  ;;  %v299_v63 = vmul.f32 %v909_v11, %v276_v53 }
  0x19   : > { %805 = vtanh.f32 %v317_v39  ;;  %v328_v0 = vadd.f32 %v920_v12, %v305_v52  ;;  %v307_v1 = vmul.f32 %v909_v11, %v284_v56  ;;  %760 = vmatpush3.bf16.msra.mxu0 %v757_v42  ;;  %785 = vmatpush3.bf16.msra.mxu1 %v757_v42  ;;  %v321_v2 = vadd.f32 %v920_v12, %v298_v55 }
  0x1a   : > { %807 = vtanh.f32 %v325_v43  ;;  %762 = vmatprep.subr.bf16.mxu0 %v761_v57  ;;  %778 = vmatprep.subr.bf16.mxu1 %v761_v57  ;;  %v329_v4 = vadd.f32 %v920_v12, %v306_v59  ;;  %v322_v8 = vadd.f32 %v920_v12, %v299_v63  ;;  %v769_v14 = vpack.c.bf16 %v378_v7, %v377_v6 }
  0x1b   : > { %809 = vtanh.f32 %v318_v48  ;;  %v330_v10 = vadd.f32 %v920_v12, %v307_v1 }
  0x1c   : > { %811 = vtanh.f32 %v326_v51 }
  0x1d   : > { %813 = vtanh.f32 %v319_v54  ;;  %764 = vmatpush3.bf16.msra.mxu0 %v761_v57  ;;  %786 = vmatpush3.bf16.msra.mxu1 %v761_v57 }
  0x1e   : > { %815 = vtanh.f32 %v327_v58  ;;  %766 = vmatprep.subr.bf16.mxu0 %v765_v3  ;;  %779 = vmatprep.subr.bf16.mxu1 %v765_v3 }
  0x1f   : > { %v798_v5 = vpop.eup %797  ;;  %817 = vtanh.f32 %v320_v62 }
  0x20   : > { %v800_v9 = vpop.eup %799  ;;  %347 = vst [vmem:[%s988_s15] sm:$0xff] %v798_v5  ;;  %717 = vmatprep.mubr.f32.mxu0 %v798_v5  ;;  %819 = vtanh.f32 %v328_v0 }
  0x21   : > { %v802_v11 = vpop.eup %801  ;;  %355 = vst [vmem:[%s988_s15 + $0x40] sm:$0xff] %v800_v9  ;;  %821 = vtanh.f32 %v321_v2  ;;  %729 = vmatprep.mubr.f32.mxu1 %v800_v9  ;;  %768 = vmatpush3.bf16.msra.mxu0 %v765_v3 }
  0x22   : > { %v804_v13 = vpop.eup %803  ;;  %348 = vst [vmem:[%s988_s15 + $0x8] sm:$0xff] %v802_v11  ;;  %823 = vtanh.f32 %v329_v4  ;;  %787 = vmatpush3.bf16.msra.mxu1 %v765_v3  ;;  %770 = vmatprep.subr.bf16.mxu0 %v769_v14 }
  0x23   : > { %v806_v15 = vpop.eup %805  ;;  %356 = vst [vmem:[%s988_s15 + $0x48] sm:$0xff] %v804_v13  ;;  %825 = vtanh.f32 %v322_v8  ;;  %780 = vmatprep.subr.bf16.mxu1 %v769_v14 }
  0x24   : > { %v808_v12 = vpop.eup %807  ;;  %349 = vst [vmem:[%s988_s15 + $0x10] sm:$0xff] %v806_v15  ;;  %827 = vtanh.f32 %v330_v10 }
  0x25   : > { %v810_v16 = vpop.eup %809  ;;  %357 = vst [vmem:[%s988_s15 + $0x50] sm:$0xff] %v808_v12  ;;  %772 = vmatpush3.bf16.msra.mxu0 %v769_v14 }
  0x26   : > { %v812_v17 = vpop.eup %811  ;;  %350 = vst [vmem:[%s988_s15 + $0x18] sm:$0xff] %v810_v16  ;;  %788 = vmatpush3.bf16.msra.mxu1 %v769_v14 }
  0x27   : > { %v814_v18 = vpop.eup %813  ;;  %358 = vst [vmem:[%s988_s15 + $0x58] sm:$0xff] %v812_v17 }
  0x28   : > { %v816_v19 = vpop.eup %815  ;;  %351 = vst [vmem:[%s988_s15 + $0x20] sm:$0xff] %v814_v18  ;;  %718 = vmatmul.mubr.f32.vlgmr.msra.gmra.mrb[0].mxu0 %v802_v11 }
  0x29   : > { %v818_v20 = vpop.eup %817  ;;  %359 = vst [vmem:[%s988_s15 + $0x60] sm:$0xff] %v816_v19  ;;  %730 = vmatmul.mubr.f32.vlgmr.msra.gmra.mrb[0].mxu1 %v804_v13  ;;  %720 = vmatprep.mubr.f32.mxu0 %v806_v15 }
  0x2a   : > { %v820_v21 = vpop.eup %819  ;;  %352 = vst [vmem:[%s988_s15 + $0x28] sm:$0xff] %v818_v20  ;;  %732 = vmatprep.mubr.f32.mxu1 %v808_v12 }
  0x2b   : > { %v822_v22 = vpop.eup %821  ;;  %360 = vst [vmem:[%s988_s15 + $0x68] sm:$0xff] %v820_v21 }
  0x2c   : > { %v824_v23 = vpop.eup %823  ;;  %353 = vst [vmem:[%s988_s15 + $0x30] sm:$0xff] %v822_v22  ;;  %721 = vmatmul.mubr.f32.gmra.mrb[2].mxu0 %v810_v16 }
  0x2d   : > { %v826_v24 = vpop.eup %825  ;;  %361 = vst [vmem:[%s988_s15 + $0x70] sm:$0xff] %v824_v23  ;;  %733 = vmatmul.mubr.f32.gmra.mrb[2].mxu1 %v812_v17  ;;  %723 = vmatprep.mubr.f32.mxu0 %v814_v18 }
  0x2e   : > { %v828_v25 = vpop.eup %827  ;;  %354 = vst [vmem:[%s988_s15 + $0x38] sm:$0xff] %v826_v24  ;;  %735 = vmatprep.mubr.f32.mxu1 %v816_v19 }
  0x2f   : > { %362 = vst [vmem:[%s988_s15 + $0x78] sm:$0xff] %v828_v25 }
  0x30   : > { %724 = vmatmul.mubr.f32.gmra.mrb[4].mxu0 %v818_v20 }
  0x31   : > { %736 = vmatmul.mubr.f32.gmra.mrb[4].mxu1 %v820_v21  ;;  %726 = vmatprep.mubr.f32.mxu0 %v822_v22 }
  0x32   : > { %738 = vmatprep.mubr.f32.mxu1 %v824_v23 }
  0x34   : > { %727 = vmatmul.mubr.f32.gmra.mrb[6].mxu0 %v826_v24 }
  0x35   : > { %739 = vmatmul.mubr.f32.gmra.mrb[6].mxu1 %v828_v25 }
  0xfb   : > { %v719_v27 = vpop.f32.mrb[0].mxu0 }
  0xfc   : > { %v731_v28 = vpop.f32.mrb[0].mxu1  ;;  %v458_v29 = vadd.f32 %v719_v27, %v650_v26  ;;  %v452_v31 = vpop.f32.mrb[1].mxu0 }
  0xfd   : > { %v498_v30 = vadd.f32 %v731_v28, %v650_v26  ;;  %v492_v32 = vpop.f32.mrb[1].mxu1  ;;  %v453_v33 = vadd.f32 %v650_v26, %v452_v31 }
  0xfe   : > { %v493_v34 = vadd.f32 %v650_v26, %v492_v32  ;;  %532 = vst [vmem:[%s1023_s26 + $0x8] sm:$0xff] %v458_v29 }
  0xff   : > { %540 = vst [vmem:[%s1023_s26 + $0x48] sm:$0xff] %v498_v30  ;;  %531 = vst [vmem:[%s1023_s26] sm:$0xff] %v453_v33  ;;  %v722_v35 = vpop.f32.mrb[2].mxu0 }
 0x100   : > { %539 = vst [vmem:[%s1023_s26 + $0x40] sm:$0xff] %v493_v34  ;;  %v734_v36 = vpop.f32.mrb[2].mxu1  ;;  %v468_v37 = vadd.f32 %v722_v35, %v650_v26  ;;  %v462_v39 = vpop.f32.mrb[3].mxu0 }
 0x101   : > { %v508_v38 = vadd.f32 %v734_v36, %v650_v26  ;;  %v502_v40 = vpop.f32.mrb[3].mxu1  ;;  %v463_v41 = vadd.f32 %v650_v26, %v462_v39 }
 0x102   : > { %v503_v42 = vadd.f32 %v650_v26, %v502_v40  ;;  %534 = vst [vmem:[%s1023_s26 + $0x18] sm:$0xff] %v468_v37 }
 0x103   : > { %542 = vst [vmem:[%s1023_s26 + $0x58] sm:$0xff] %v508_v38  ;;  %533 = vst [vmem:[%s1023_s26 + $0x10] sm:$0xff] %v463_v41  ;;  %v725_v43 = vpop.f32.mrb[4].mxu0 }
 0x104   : > { %541 = vst [vmem:[%s1023_s26 + $0x50] sm:$0xff] %v503_v42  ;;  %v737_v44 = vpop.f32.mrb[4].mxu1  ;;  %v478_v45 = vadd.f32 %v725_v43, %v650_v26  ;;  %v472_v47 = vpop.f32.mrb[5].mxu0 }
 0x105   : > { %v518_v46 = vadd.f32 %v737_v44, %v650_v26  ;;  %v512_v48 = vpop.f32.mrb[5].mxu1  ;;  %v473_v49 = vadd.f32 %v650_v26, %v472_v47 }
 0x106   : > { %v513_v50 = vadd.f32 %v650_v26, %v512_v48  ;;  %536 = vst [vmem:[%s1023_s26 + $0x28] sm:$0xff] %v478_v45 }
 0x107   : > { %544 = vst [vmem:[%s1023_s26 + $0x68] sm:$0xff] %v518_v46  ;;  %535 = vst [vmem:[%s1023_s26 + $0x20] sm:$0xff] %v473_v49  ;;  %v728_v51 = vpop.f32.mrb[6].mxu0 }
 0x108   : > { %543 = vst [vmem:[%s1023_s26 + $0x60] sm:$0xff] %v513_v50  ;;  %v740_v52 = vpop.f32.mrb[6].mxu1  ;;  %v488_v53 = vadd.f32 %v728_v51, %v650_v26  ;;  %v482_v55 = vpop.f32.mrb[7].mxu0 }
 0x109   : > { %v528_v54 = vadd.f32 %v740_v52, %v650_v26  ;;  %v522_v56 = vpop.f32.mrb[7].mxu1  ;;  %v483_v57 = vadd.f32 %v650_v26, %v482_v55 }
 0x10a   : > { %v523_v58 = vadd.f32 %v650_v26, %v522_v56  ;;  %538 = vst [vmem:[%s1023_s26 + $0x38] sm:$0xff] %v488_v53 }
 0x10b   : > { %546 = vst [vmem:[%s1023_s26 + $0x78] sm:$0xff] %v528_v54  ;;  %537 = vst [vmem:[%s1023_s26 + $0x30] sm:$0xff] %v483_v57 }
 0x10c   : > { %545 = vst [vmem:[%s1023_s26 + $0x70] sm:$0xff] %v523_v58 }
 0x10d PF: > { %s17_s21 = sadd.s32 1, %s835_s21  }
 0x10e   : > { %p14_p4 = scmp.ge.s32.totalorder %s17_s21, 4  }
 0x110   :  { %16 = sbr.rel (!%p14_p4) target bundleno = 1 (0x1), region = 82 }

// kernel: _lambda_.6
= control target key start
LH: loop header
LB: loop body
LE: loop exit
PB: predicated region body
PF: predicated region fallthrough
CT: control target
= control target key end

     0   :  { %v67_v3 = vlaneseq  ;;  %s1817_s4 = inlined_call_operand.vmem [shape: f32[256,128], index: 4, kind: input, shape index: {}]   ;;  %s1818_s0 = inlined_call_operand.vmem [shape: f32[128,256], index: 0, kind: input, shape index: {}]   ;;  %s1819_s2 = inlined_call_operand.vmem [shape: f32[1,256], index: 2, kind: input, shape index: {}]   ;;  %s1820_s3 = inlined_call_operand.vmem [shape: f32[1,256], index: 3, kind: input, shape index: {}]   ;;  %s1821_s1 = inlined_call_operand.vmem [shape: f32[128,256], index: 1, kind: input, shape index: {}]   ;;  %s1822_s6 = inlined_call_operand.vmem [shape: f32[256,128], index: 6, kind: input, shape index: {}]   ;;  %s1823_s5 = inlined_call_operand.vmem [shape: f32[1,128], index: 5, kind: input, shape index: {}]   ;;  %s1824_s8 = inlined_call_operand.vmem [shape: f32[1,128], index: 8, kind: output, shape index: {1}]   ;;  %s1825_s9 = inlined_call_operand.vmem [shape: f32[1,128], index: 9, kind: output, shape index: {2}]   ;;  %s1826_s7 = inlined_call_operand.vmem [shape: f32[256,128], index: 7, kind: output, shape index: {0}]  }
   0x1   :  { %v265_v0 = vld [vmem:[%s1817_s4 + $0x80] sm:$0xff]  ;;  %v266_v1 = vld [vmem:[%s1817_s4 + $0x88] sm:$0xff]  ;;  %v267_v6 = vld [vmem:[%s1817_s4 + $0x90] sm:$0xff] }
   0x2   :  { %v249_v2 = vld [vmem:[%s1817_s4] sm:$0xff]  ;;  %v1089_v4 = vpack.c.bf16 %v266_v1, %v265_v0  ;;  %v250_v5 = vld [vmem:[%s1817_s4 + $0x8] sm:$0xff]  ;;  %v268_v7 = vld [vmem:[%s1817_s4 + $0x98] sm:$0xff]  ;;  %v68_v15 = vshrl.u32 %v67_v3, 7 }
   0x3   :  { %v1091_v8 = vpack.c.bf16 %v250_v5, %v249_v2  ;;  %v1093_v9 = vpack.c.bf16 %v268_v7, %v267_v6  ;;  %v251_v10 = vld [vmem:[%s1817_s4 + $0x10] sm:$0xff]  ;;  %v252_v11 = vld [vmem:[%s1817_s4 + $0x18] sm:$0xff]  ;;  %v269_v12 = vld [vmem:[%s1817_s4 + $0xa0] sm:$0xff] }
   0x4   :  { %1090 = vmatprep.subr.bf16.mxu0 %v1089_v4  ;;  %v270_v13 = vld [vmem:[%s1817_s4 + $0xa8] sm:$0xff]  ;;  %v1095_v14 = vpack.c.bf16 %v252_v11, %v251_v10  ;;  %v253_v17 = vld [vmem:[%s1817_s4 + $0x20] sm:$0xff]  ;;  %v271_v19 = vld [vmem:[%s1817_s4 + $0xb0] sm:$0xff]  ;;  %v73_v22 = vsub.s32 1, %v68_v15  ;;  %v69_v30 = vsub.s32 0, %v68_v15 }
   0x5   :  { %1092 = vmatpush3.bf16.msra.mxu0 %v1091_v8  ;;  %v1097_v16 = vpack.c.bf16 %v270_v13, %v269_v12  ;;  %v254_v18 = vld [vmem:[%s1817_s4 + $0x28] sm:$0xff]  ;;  %v272_v20 = vld [vmem:[%s1817_s4 + $0xb8] sm:$0xff]  ;;  %v255_v24 = vld [vmem:[%s1817_s4 + $0x30] sm:$0xff] }
   0x6   :  { %1094 = vmatprep.subr.bf16.mxu0 %v1093_v9  ;;  %v1099_v21 = vpack.c.bf16 %v254_v18, %v253_v17  ;;  %v1101_v23 = vpack.c.bf16 %v272_v20, %v271_v19  ;;  %v256_v25 = vld [vmem:[%s1817_s4 + $0x38] sm:$0xff]  ;;  %v273_v26 = vld [vmem:[%s1817_s4 + $0xc0] sm:$0xff]  ;;  %v274_v27 = vld [vmem:[%s1817_s4 + $0xc8] sm:$0xff] }
   0x7   :  { %v34_v28 = vld [vmem:[%s1818_s0 + $0x8] sm:$0xff]  ;;  %v65_v29 = vld [vmem:[%s1819_s2] sm:$0x3]  ;;  %v1103_v32 = vpack.c.bf16 %v256_v25, %v255_v24  ;;  %v1105_v35 = vpack.c.bf16 %v274_v27, %v273_v26  ;;  %v275_v38 = vld [vmem:[%s1817_s4 + $0xd0] sm:$0xff] }
   0x8   :  { %v109_v31 = vld [vmem:[%s1820_s3] sm:$0x3]  ;;  %v1268_v33 = vrot.slane %v65_v29, %v73_v22  ;;  %v258_v37 = vld [vmem:[%s1817_s4 + $0x48] sm:$0xff]  ;;  %v276_v39 = vld [vmem:[%s1817_s4 + $0xd8] sm:$0xff]  ;;  %v1285_v41 = vrot.slane %v65_v29, %v69_v30 }
   0x9   :  { %1096 = vmatpush3.bf16.msra.mxu0 %v1095_v14  ;;  %v1270_v34 = vrot.slane %v109_v31, %v73_v22  ;;  %v257_v36 = vld [vmem:[%s1817_s4 + $0x40] sm:$0xff]  ;;  %v154_v42 = vld [vmem:[%s1821_s1 + $0x8] sm:$0xff]  ;;  %v1109_v46 = vpack.c.bf16 %v276_v39, %v275_v38  ;;  %v259_v47 = vld [vmem:[%s1817_s4 + $0x50] sm:$0xff]  ;;  %v1309_v53 = vrot.slane %v109_v31, %v69_v30 }
   0xa   :  { %1098 = vmatprep.subr.bf16.mxu0 %v1097_v16  ;;  %v78_v40 = vmul.f32 %v1268_v33, %v34_v28  ;;  %v1107_v43 = vpack.c.bf16 %v258_v37, %v257_v36  ;;  %v33_v45 = vld [vmem:[%s1818_s0] sm:$0xff]  ;;  %v260_v48 = vld [vmem:[%s1817_s4 + $0x58] sm:$0xff]  ;;  %v278_v51 = vld [vmem:[%s1817_s4 + $0xe8] sm:$0xff] }
   0xb   :  { %v36_v49 = vld [vmem:[%s1818_s0 + $0x18] sm:$0xff]  ;;  %v277_v50 = vld [vmem:[%s1817_s4 + $0xe0] sm:$0xff]  ;;  %v77_v54 = vmul.f32 %v1285_v41, %v33_v45  ;;  %v1111_v55 = vpack.c.bf16 %v260_v48, %v259_v47  ;;  %v35_v58 = vld [vmem:[%s1818_s0 + $0x10] sm:$0xff] }
   0xc   :  { %v122_v44 = vadd.f32 %v1270_v34, %v78_v40  ;;  %v80_v57 = vmul.f32 %v1268_v33, %v36_v49  ;;  %v1113_v59 = vpack.c.bf16 %v278_v51, %v277_v50  ;;  %v261_v60 = vld [vmem:[%s1817_s4 + $0x60] sm:$0xff]  ;;  %v262_v61 = vld [vmem:[%s1817_s4 + $0x68] sm:$0xff]  ;;  %v279_v63 = vld [vmem:[%s1817_s4 + $0xf0] sm:$0xff]  ;;  %v79_v2 = vmul.f32 %v1285_v41, %v35_v58 }
   0xd   :  { %1100 = vmatpush3.bf16.msra.mxu0 %v1099_v21  ;;  %v38_v62 = vld [vmem:[%s1818_s0 + $0x28] sm:$0xff]  ;;  %v280_v0 = vld [vmem:[%s1817_s4 + $0xf8] sm:$0xff]  ;;  %v121_v1 = vadd.f32 %v1309_v53, %v77_v54  ;;  %v37_v3 = vld [vmem:[%s1818_s0 + $0x20] sm:$0xff]  ;;  %v1115_v4 = vpack.c.bf16 %v262_v61, %v261_v60 }
   0xe   :  { %1102 = vmatprep.subr.bf16.mxu0 %v1101_v23  ;;  %v186_v52 = vadd.f32 %v154_v42, %v122_v44  ;;  %v153_v5 = vld [vmem:[%s1821_s1] sm:$0xff]  ;;  %v124_v6 = vadd.f32 %v1270_v34, %v80_v57  ;;  %v82_v7 = vmul.f32 %v1268_v33, %v38_v62  ;;  %v40_v8 = vld [vmem:[%s1818_s0 + $0x38] sm:$0xff]  ;;  %v39_v9 = vld [vmem:[%s1818_s0 + $0x30] sm:$0xff]  ;;  %v1117_v10 = vpack.c.bf16 %v280_v0, %v279_v63 }
   0xf   :  { %v263_v11 = vld [vmem:[%s1817_s4 + $0x70] sm:$0xff]  ;;  %v264_v12 = vld [vmem:[%s1817_s4 + $0x78] sm:$0xff]  ;;  %v81_v14 = vmul.f32 %v1285_v41, %v37_v3  ;;  %v185_v15 = vadd.f32 %v153_v5, %v121_v1  ;;  %v123_v16 = vadd.f32 %v1309_v53, %v79_v2  ;;  %v84_v17 = vmul.f32 %v1268_v33, %v40_v8  ;;  %v158_v23 = vld [vmem:[%s1821_s1 + $0x28] sm:$0xff] }
  0x10   :  { %v218_v56 = vmax.f32 %v186_v52, 0.0  ;;  %v156_v13 = vld [vmem:[%s1821_s1 + $0x18] sm:$0xff]  ;;  %v83_v18 = vmul.f32 %v1285_v41, %v39_v9  ;;  %v1119_v19 = vpack.c.bf16 %v264_v12, %v263_v11  ;;  %v155_v21 = vld [vmem:[%s1821_s1 + $0x10] sm:$0xff]  ;;  %v126_v22 = vadd.f32 %v1270_v34, %v82_v7  ;;  %v42_v24 = vld [vmem:[%s1818_s0 + $0x48] sm:$0xff] }
  0x11   :  { %1104 = vmatpush3.bf16.msra.mxu0 %v1103_v32  ;;  %v188_v20 = vadd.f32 %v156_v13, %v124_v6  ;;  %v125_v25 = vadd.f32 %v1309_v53, %v81_v14  ;;  %v217_v26 = vmax.f32 %v185_v15, 0.0  ;;  %v187_v27 = vadd.f32 %v155_v21, %v123_v16  ;;  %v157_v28 = vld [vmem:[%s1821_s1 + $0x20] sm:$0xff]  ;;  %v160_v36 = vld [vmem:[%s1821_s1 + $0x38] sm:$0xff]  ;;  %v159_v37 = vld [vmem:[%s1821_s1 + $0x30] sm:$0xff] }
  0x12   :  { %1106 = vmatprep.subr.bf16.mxu0 %v1105_v35  ;;  %352 = vmatprep.mubr.f32.mxu0 %v218_v56  ;;  %v128_v29 = vadd.f32 %v1270_v34, %v84_v17  ;;  %v127_v30 = vadd.f32 %v1309_v53, %v83_v18  ;;  %v41_v31 = vld [vmem:[%s1818_s0 + $0x40] sm:$0xff]  ;;  %v190_v35 = vadd.f32 %v158_v23, %v126_v22  ;;  %v44_v39 = vld [vmem:[%s1818_s0 + $0x58] sm:$0xff]  ;;  %v59_v47 = vld [vmem:[%s1818_s0 + $0xd0] sm:$0xff] }
  0x13   :  { %v220_v32 = vmax.f32 %v188_v20, 0.0  ;;  %v86_v38 = vmul.f32 %v1268_v33, %v42_v24  ;;  %v189_v40 = vadd.f32 %v157_v28, %v125_v25  ;;  %v85_v42 = vmul.f32 %v1285_v41, %v41_v31  ;;  %v62_v51 = vld [vmem:[%s1818_s0 + $0xe8] sm:$0xff]  ;;  %v61_v52 = vld [vmem:[%s1818_s0 + $0xe0] sm:$0xff]  ;;  %v64_v60 = vld [vmem:[%s1818_s0 + $0xf8] sm:$0xff] }
  0x14   :  { %v192_v44 = vadd.f32 %v160_v36, %v128_v29  ;;  %v191_v45 = vadd.f32 %v159_v37, %v127_v30  ;;  %v222_v48 = vmax.f32 %v190_v35, 0.0  ;;  %v88_v50 = vmul.f32 %v1268_v33, %v44_v39  ;;  %v162_v54 = vld [vmem:[%s1821_s1 + $0x48] sm:$0xff]  ;;  %v63_v61 = vld [vmem:[%s1818_s0 + $0xf0] sm:$0xff]  ;;  %v161_v0 = vld [vmem:[%s1821_s1 + $0x40] sm:$0xff] }
  0x15   :  { %1108 = vmatpush3.bf16.msra.mxu0 %v1107_v43  ;;  %v219_v43 = vmax.f32 %v187_v27, 0.0  ;;  %v130_v49 = vadd.f32 %v1270_v34, %v86_v38  ;;  %v221_v56 = vmax.f32 %v189_v40, 0.0  ;;  %v129_v57 = vadd.f32 %v1309_v53, %v85_v42  ;;  %v45_v1 = vld [vmem:[%s1818_s0 + $0x60] sm:$0xff]  ;;  %v179_v2 = vld [vmem:[%s1821_s1 + $0xd0] sm:$0xff]  ;;  %v182_v9 = vld [vmem:[%s1821_s1 + $0xe8] sm:$0xff] }
  0x16   :  { %1110 = vmatprep.subr.bf16.mxu0 %v1109_v46  ;;  %v43_v46 = vld [vmem:[%s1818_s0 + $0x50] sm:$0xff]  ;;  %v224_v62 = vmax.f32 %v192_v44, 0.0  ;;  %v223_v63 = vmax.f32 %v191_v45, 0.0  ;;  %v106_v3 = vmul.f32 %v1268_v33, %v62_v51  ;;  %v132_v6 = vadd.f32 %v1270_v34, %v88_v50  ;;  %v164_v11 = vld [vmem:[%s1821_s1 + $0x58] sm:$0xff]  ;;  %v166_v35 = vld [vmem:[%s1821_s1 + $0x68] sm:$0xff] }
  0x17   :  { %v87_v58 = vmul.f32 %v1285_v41, %v43_v46  ;;  %v194_v5 = vadd.f32 %v162_v54, %v130_v49  ;;  %v48_v12 = vld [vmem:[%s1818_s0 + $0x78] sm:$0xff]  ;;  %v108_v15 = vmul.f32 %v1268_v33, %v64_v60  ;;  %v107_v16 = vmul.f32 %v1285_v41, %v63_v61  ;;  %v183_v22 = vld [vmem:[%s1821_s1 + $0xf0] sm:$0xff]  ;;  %v50_v36 = vld [vmem:[%s1818_s0 + $0x88] sm:$0xff] }
  0x18   :  { %v150_v13 = vadd.f32 %v1270_v34, %v106_v3  ;;  %v193_v17 = vadd.f32 %v161_v0, %v129_v57  ;;  %v184_v21 = vld [vmem:[%s1821_s1 + $0xf8] sm:$0xff]  ;;  %v196_v28 = vadd.f32 %v164_v11, %v132_v6  ;;  %v163_v29 = vld [vmem:[%s1821_s1 + $0x50] sm:$0xff]  ;;  %v92_v31 = vmul.f32 %v1268_v33, %v48_v12  ;;  %v165_v46 = vld [vmem:[%s1821_s1 + $0x60] sm:$0xff] }
  0x19   :  { %1112 = vmatpush3.bf16.msra.mxu0 %v1111_v55  ;;  %v46_v55 = vld [vmem:[%s1818_s0 + $0x68] sm:$0xff]  ;;  %v131_v18 = vadd.f32 %v1309_v53, %v87_v58  ;;  %v152_v25 = vadd.f32 %v1270_v34, %v108_v15  ;;  %v226_v27 = vmax.f32 %v194_v5, 0.0  ;;  %v49_v49 = vld [vmem:[%s1818_s0 + $0x80] sm:$0xff]  ;;  %v168_v50 = vld [vmem:[%s1821_s1 + $0x78] sm:$0xff] }
  0x1a   :  { %1114 = vmatprep.subr.bf16.mxu0 %v1113_v59  ;;  %v103_v59 = vmul.f32 %v1285_v41, %v59_v47  ;;  %v90_v7 = vmul.f32 %v1268_v33, %v46_v55  ;;  %v1459_v23 = vadd.f32 %v182_v9, %v150_v13  ;;  %v225_v39 = vmax.f32 %v193_v17, 0.0  ;;  %v52_v51 = vld [vmem:[%s1818_s0 + $0x98] sm:$0xff]  ;;  %v54_v0 = vld [vmem:[%s1818_s0 + $0xa8] sm:$0xff] }
  0x1b   :  { %v1479_v37 = vadd.f32 %v184_v21, %v152_v25  ;;  %v195_v40 = vadd.f32 %v163_v29, %v131_v18  ;;  %v228_v44 = vmax.f32 %v196_v28, 0.0  ;;  %v136_v47 = vadd.f32 %v1270_v34, %v92_v31  ;;  %v172_v11 = vld [vmem:[%s1821_s1 + $0x98] sm:$0xff]  ;;  %v55_v25 = vld [vmem:[%s1818_s0 + $0xb0] sm:$0xff] }
  0x1c   :  { %v147_v8 = vadd.f32 %v1309_v53, %v103_v59  ;;  %v134_v30 = vadd.f32 %v1270_v34, %v90_v7  ;;  %v167_v59 = vld [vmem:[%s1821_s1 + $0x70] sm:$0xff]  ;;  %v96_v61 = vmul.f32 %v1268_v33, %v52_v51  ;;  %v169_v7 = vld [vmem:[%s1821_s1 + $0x80] sm:$0xff]  ;;  %v98_v9 = vmul.f32 %v1268_v33, %v54_v0  ;;  %v56_v12 = vld [vmem:[%s1818_s0 + $0xb8] sm:$0xff] }
  0x1d   :  { %1116 = vmatpush3.bf16.msra.mxu0 %v1115_v4  ;;  %v105_v4 = vmul.f32 %v1285_v41, %v61_v52  ;;  %v227_v52 = vmax.f32 %v195_v40, 0.0  ;;  %v200_v58 = vadd.f32 %v168_v50, %v136_v47  ;;  %v99_v31 = vmul.f32 %v1285_v41, %v55_v25  ;;  %v175_v51 = vld [vmem:[%s1821_s1 + $0xb0] sm:$0xff] }
  0x1e   :  { %1118 = vmatprep.subr.bf16.mxu0 %v1117_v10  ;;  %v181_v10 = vld [vmem:[%s1821_s1 + $0xe0] sm:$0xff]  ;;  %v1451_v20 = vadd.f32 %v179_v2, %v147_v8  ;;  %v198_v45 = vadd.f32 %v166_v35, %v134_v30  ;;  %v140_v8 = vadd.f32 %v1270_v34, %v96_v61  ;;  %v142_v21 = vadd.f32 %v1270_v34, %v98_v9 }
  0x1f   :  { %v149_v14 = vadd.f32 %v1309_v53, %v105_v4  ;;  %v232_v5 = vmax.f32 %v200_v58, 0.0  ;;  %v143_v47 = vadd.f32 %v1309_v53, %v99_v31 }
  0x20   :  { %v230_v57 = vmax.f32 %v198_v45, 0.0  ;;  %v204_v18 = vadd.f32 %v172_v11, %v140_v8 }
  0x21   :  { %1120 = vmatpush3.bf16.msra.mxu0 %v1119_v19  ;;  %v89_v19 = vmul.f32 %v1285_v41, %v45_v1  ;;  %v1461_v24 = vadd.f32 %v181_v10, %v149_v14  ;;  %v53_v10 = vld [vmem:[%s1818_s0 + $0xa0] sm:$0xff] }
  0x23   :  { %v133_v42 = vadd.f32 %v1309_v53, %v89_v19  ;;  %v171_v19 = vld [vmem:[%s1821_s1 + $0x90] sm:$0xff] }
  0x24   :  { %353 = vmatmul.mubr.f32.vlgmr.msra.gmra.mrb[0].mxu0 %v217_v26  ;;  %v151_v26 = vadd.f32 %v1309_v53, %v107_v16  ;;  %v97_v16 = vmul.f32 %v1285_v41, %v53_v10 }
  0x25   :  { %357 = vmatprep.mubr.f32.mxu0 %v220_v32  ;;  %v47_v32 = vld [vmem:[%s1818_s0 + $0x70] sm:$0xff]  ;;  %v197_v54 = vadd.f32 %v165_v46, %v133_v42  ;;  %v57_v42 = vld [vmem:[%s1818_s0 + $0xc0] sm:$0xff] }
  0x26   :  { %v1481_v38 = vadd.f32 %v183_v22, %v151_v26  ;;  %v100_v22 = vmul.f32 %v1268_v33, %v56_v12  ;;  %v174_v26 = vld [vmem:[%s1821_s1 + $0xa8] sm:$0xff]  ;;  %v141_v30 = vadd.f32 %v1309_v53, %v97_v16 }
  0x27   :  { %v229_v1 = vmax.f32 %v197_v54, 0.0  ;;  %v206_v35 = vadd.f32 %v174_v26, %v142_v21 }
  0x28   :  { %358 = vmatmul.mubr.f32.gmra.mrb[2].mxu0 %v219_v43  ;;  %v91_v43 = vmul.f32 %v1285_v41, %v47_v32  ;;  %v236_v32 = vmax.f32 %v204_v18, 0.0 }
  0x29   :  { %362 = vmatprep.mubr.f32.mxu0 %v222_v48  ;;  %v94_v48 = vmul.f32 %v1268_v33, %v50_v36  ;;  %v173_v36 = vld [vmem:[%s1821_s1 + $0xa0] sm:$0xff] }
  0x2a   :  { %v135_v55 = vadd.f32 %v1309_v53, %v91_v43  ;;  %v176_v43 = vld [vmem:[%s1821_s1 + $0xb8] sm:$0xff]  ;;  %v205_v46 = vadd.f32 %v173_v36, %v141_v30 }
  0x2b   :  { %v138_v60 = vadd.f32 %v1270_v34, %v94_v48  ;;  %v101_v48 = vmul.f32 %v1285_v41, %v57_v42 }
  0x2c   :  { %363 = vmatmul.mubr.f32.gmra.mrb[4].mxu0 %v221_v56  ;;  %v93_v56 = vmul.f32 %v1285_v41, %v49_v49  ;;  %v199_v2 = vadd.f32 %v167_v59, %v135_v55  ;;  %v238_v49 = vmax.f32 %v206_v35, 0.0  ;;  %v178_v55 = vld [vmem:[%s1821_s1 + $0xc8] sm:$0xff] }
  0x2d   :  { %367 = vmatprep.mubr.f32.mxu0 %v224_v62  ;;  %v51_v62 = vld [vmem:[%s1818_s0 + $0x90] sm:$0xff] }
  0x2e   :  { %v137_v3 = vadd.f32 %v1309_v53, %v93_v56  ;;  %v95_v4 = vmul.f32 %v1285_v41, %v51_v62  ;;  %v231_v13 = vmax.f32 %v199_v2, 0.0  ;;  %v237_v56 = vmax.f32 %v205_v46, 0.0 }
  0x2f   :  { %v145_v41 = vadd.f32 %v1309_v53, %v101_v48 }
  0x30   :  { %368 = vmatmul.mubr.f32.gmra.mrb[6].mxu0 %v223_v63  ;;  %v170_v63 = vld [vmem:[%s1821_s1 + $0x88] sm:$0xff]  ;;  %v201_v14 = vadd.f32 %v169_v7, %v137_v3  ;;  %v139_v15 = vadd.f32 %v1309_v53, %v95_v4  ;;  %v243_v3 = vmax.f32 %v1451_v20, 0.0  ;;  %v245_v4 = vmax.f32 %v1461_v24, 0.0  ;;  %v451_v7 = vld [vmem:[%s1822_s6] sm:$0xff] }
  0x31   :  { %372 = vmatprep.mubr.f32.mxu0 %v226_v27  ;;  %v202_v6 = vadd.f32 %v170_v63, %v138_v60  ;;  %v58_v27 = vld [vmem:[%s1818_s0 + $0xc8] sm:$0xff]  ;;  %v177_v60 = vld [vmem:[%s1821_s1 + $0xc0] sm:$0xff]  ;;  %1041 = vmatprep.mubr.f32.mxu1 %v451_v7 }
  0x32   :  { %v233_v28 = vmax.f32 %v201_v14, 0.0  ;;  %v203_v29 = vadd.f32 %v171_v19, %v139_v15  ;;  %v102_v40 = vmul.f32 %v1268_v33, %v58_v27  ;;  %v209_v63 = vadd.f32 %v177_v60, %v145_v41  ;;  %v1592_v24 = vld [vmem:[%s1823_s5] ss:$0 sm:$0xff] }
  0x33   :  { %v234_v17 = vmax.f32 %v202_v6, 0.0  ;;  %v247_v6 = vmax.f32 %v1481_v38, 0.0 }
  0x34   :  { %373 = vmatmul.mubr.f32.gmra.mrb[8].mxu0 %v225_v39  ;;  %v144_v39 = vadd.f32 %v1270_v34, %v100_v22  ;;  %v235_v45 = vmax.f32 %v203_v29, 0.0  ;;  %v241_v53 = vmax.f32 %v209_v63, 0.0 }
  0x35   :  { %377 = vmatprep.mubr.f32.mxu0 %v228_v44  ;;  %v60_v44 = vld [vmem:[%s1818_s0 + $0xd8] sm:$0xff] }
  0x36   :  { %v208_v50 = vadd.f32 %v176_v43, %v144_v39  ;;  %v104_v54 = vmul.f32 %v1268_v33, %v60_v44  ;;  %v180_v33 = vld [vmem:[%s1821_s1 + $0xd8] sm:$0xff] }
  0x38   :  { %378 = vmatmul.mubr.f32.gmra.mrb[10].mxu0 %v227_v52  ;;  %v146_v52 = vadd.f32 %v1270_v34, %v102_v40  ;;  %v240_v58 = vmax.f32 %v208_v50, 0.0  ;;  %v148_v61 = vadd.f32 %v1270_v34, %v104_v54  ;;  %v246_v34 = vmax.f32 %v1459_v23, 0.0 }
  0x39   :  { %382 = vmatprep.mubr.f32.mxu0 %v230_v57  ;;  %v207_v57 = vadd.f32 %v175_v51, %v143_v47 }
  0x3a   :  { %v210_v59 = vadd.f32 %v178_v55, %v146_v52 }
  0x3b   :  { %v239_v62 = vmax.f32 %v207_v57, 0.0 }
  0x3c   :  { %383 = vmatmul.mubr.f32.gmra.mrb[12].mxu0 %v229_v1  ;;  %v242_v0 = vmax.f32 %v210_v59, 0.0  ;;  %v212_v1 = vadd.f32 %v180_v33, %v148_v61 }
  0x3d   :  { %387 = vmatprep.mubr.f32.mxu0 %v232_v5  ;;  %v248_v5 = vmax.f32 %v1479_v37, 0.0 }
  0x3e   :  { %v244_v2 = vmax.f32 %v212_v1, 0.0 }
  0x40   :  { %388 = vmatmul.mubr.f32.gmra.mrb[14].mxu0 %v231_v13 }
  0x41   :  { %392 = vmatprep.mubr.f32.mxu0 %v234_v17 }
  0x44   :  { %393 = vmatmul.mubr.f32.gmra.mrb[16].mxu0 %v233_v28 }
  0x45   :  { %397 = vmatprep.mubr.f32.mxu0 %v236_v32 }
  0x48   :  { %398 = vmatmul.mubr.f32.gmra.mrb[18].mxu0 %v235_v45 }
  0x49   :  { %402 = vmatprep.mubr.f32.mxu0 %v238_v49 }
  0x4c   :  { %403 = vmatmul.mubr.f32.gmra.mrb[20].mxu0 %v237_v56 }
  0x4d   :  { %407 = vmatprep.mubr.f32.mxu0 %v240_v58 }
  0x50   :  { %408 = vmatmul.mubr.f32.gmra.mrb[22].mxu0 %v239_v62 }
  0x51   :  { %412 = vmatprep.mubr.f32.mxu0 %v242_v0 }
  0x54   :  { %413 = vmatmul.mubr.f32.gmra.mrb[24].mxu0 %v241_v53 }
  0x55   :  { %417 = vmatprep.mubr.f32.mxu0 %v244_v2 }
  0x58   :  { %418 = vmatmul.mubr.f32.gmra.mrb[26].mxu0 %v243_v3 }
  0x59   :  { %422 = vmatprep.mubr.f32.mxu0 %v246_v34 }
  0x5c   :  { %423 = vmatmul.mubr.f32.gmra.mrb[28].mxu0 %v245_v4 }
  0x5d   :  { %427 = vmatprep.mubr.f32.mxu0 %v248_v5 }
  0x60   :  { %428 = vmatmul.mubr.f32.gmra.mrb[30].mxu0 %v247_v6 }
  0xf7   :  { %v913_v20 = vpop.f32.mrb[0].mxu0 }
  0xf8   :  { %v914_v8 = vpop.f32.mrb[1].mxu0 }
  0xf9   :  { %v915_v9 = vadd.f32 %v914_v8, %v913_v20 }
  0xfb   :  { %v916_v23 = vpop.f32.mrb[2].mxu0  ;;  %v355_v38 = vadd.f32 %v915_v9, %v1592_v24 }
  0xfc   :  { %v917_v37 = vpop.f32.mrb[3].mxu0 }
  0xfd   :  { %v918_v10 = vadd.f32 %v917_v37, %v916_v23 }
  0xff   :  { %v360_v11 = vadd.f32 %v918_v10, %v1592_v24  ;;  %v919_v12 = vpop.f32.mrb[4].mxu0 }
 0x100   :  { %v920_v13 = vpop.f32.mrb[5].mxu0 }
 0x101   :  { %v921_v14 = vadd.f32 %v920_v13, %v919_v12  ;;  %v1121_v15 = vpack.c.bf16 %v360_v11, %v355_v38  ;;  %v452_v13 = vld [vmem:[%s1822_s6 + $0x8] sm:$0xff] }
 0x103   :  { %v922_v16 = vpop.f32.mrb[6].mxu0  ;;  %1122 = vmatprep.subr.bf16.mxu1 %v1121_v15  ;;  %v365_v19 = vadd.f32 %v921_v14, %v1592_v24  ;;  %v453_v14 = vld [vmem:[%s1822_s6 + $0x10] sm:$0xff] }
 0x104   :  { %v923_v17 = vpop.f32.mrb[7].mxu0  ;;  %1124 = vmatpush3.bf16.msra.mxu1 %v1121_v15  ;;  %v454_v15 = vld [vmem:[%s1822_s6 + $0x18] sm:$0xff] }
 0x105   :  { %v924_v18 = vadd.f32 %v923_v17, %v922_v16  ;;  %v456_v16 = vld [vmem:[%s1822_s6 + $0x28] sm:$0xff]  ;;  %v457_v17 = vld [vmem:[%s1822_s6 + $0x30] sm:$0xff] }
 0x107   :  { %v370_v21 = vadd.f32 %v924_v18, %v1592_v24  ;;  %v925_v22 = vpop.f32.mrb[8].mxu0  ;;  %v458_v18 = vld [vmem:[%s1822_s6 + $0x38] sm:$0xff] }
 0x108   :  { %v926_v25 = vpop.f32.mrb[9].mxu0 }
 0x109   :  { %v927_v26 = vadd.f32 %v926_v25, %v925_v22  ;;  %v1125_v27 = vpack.c.bf16 %v370_v21, %v365_v19  ;;  %v459_v19 = vld [vmem:[%s1822_s6 + $0x40] sm:$0xff]  ;;  %v460_v21 = vld [vmem:[%s1822_s6 + $0x48] sm:$0xff]  ;;  %v461_v22 = vld [vmem:[%s1822_s6 + $0x50] sm:$0xff] }
 0x10a   :  { %v462_v25 = vld [vmem:[%s1822_s6 + $0x58] sm:$0xff] }
 0x10b   :  { %v928_v28 = vpop.f32.mrb[10].mxu0  ;;  %1126 = vmatprep.subr.bf16.mxu1 %v1125_v27  ;;  %v375_v31 = vadd.f32 %v927_v26, %v1592_v24  ;;  %v463_v26 = vld [vmem:[%s1822_s6 + $0x60] sm:$0xff] }
 0x10c   :  { %v929_v29 = vpop.f32.mrb[11].mxu0  ;;  %1128 = vmatpush3.bf16.msra.mxu1 %v1125_v27  ;;  %v464_v27 = vld [vmem:[%s1822_s6 + $0x68] sm:$0xff] }
 0x10d   :  { %v930_v30 = vadd.f32 %v929_v29, %v928_v28  ;;  %v465_v28 = vld [vmem:[%s1822_s6 + $0x70] sm:$0xff]  ;;  %v466_v29 = vld [vmem:[%s1822_s6 + $0x78] sm:$0xff] }
 0x10f   :  { %v380_v32 = vadd.f32 %v930_v30, %v1592_v24  ;;  %v931_v35 = vpop.f32.mrb[12].mxu0  ;;  %v467_v30 = vld [vmem:[%s1822_s6 + $0x80] sm:$0xff] }
 0x110   :  { %v932_v36 = vpop.f32.mrb[13].mxu0 }
 0x111   :  { %v933_v39 = vadd.f32 %v932_v36, %v931_v35  ;;  %v1129_v40 = vpack.c.bf16 %v380_v32, %v375_v31  ;;  %v468_v31 = vld [vmem:[%s1822_s6 + $0x88] sm:$0xff]  ;;  %v469_v32 = vld [vmem:[%s1822_s6 + $0x90] sm:$0xff]  ;;  %v470_v35 = vld [vmem:[%s1822_s6 + $0x98] sm:$0xff] }
 0x112   :  { %v471_v36 = vld [vmem:[%s1822_s6 + $0xa0] sm:$0xff] }
 0x113   :  { %v934_v42 = vpop.f32.mrb[14].mxu0  ;;  %1130 = vmatprep.subr.bf16.mxu1 %v1129_v40  ;;  %v385_v45 = vadd.f32 %v933_v39, %v1592_v24  ;;  %v472_v39 = vld [vmem:[%s1822_s6 + $0xa8] sm:$0xff] }
 0x114   :  { %v935_v43 = vpop.f32.mrb[15].mxu0  ;;  %1132 = vmatpush3.bf16.msra.mxu1 %v1129_v40  ;;  %v473_v40 = vld [vmem:[%s1822_s6 + $0xb0] sm:$0xff] }
 0x115   :  { %v936_v44 = vadd.f32 %v935_v43, %v934_v42  ;;  %v474_v42 = vld [vmem:[%s1822_s6 + $0xb8] sm:$0xff]  ;;  %v475_v43 = vld [vmem:[%s1822_s6 + $0xc0] sm:$0xff] }
 0x117   :  { %v390_v46 = vadd.f32 %v936_v44, %v1592_v24  ;;  %v937_v47 = vpop.f32.mrb[16].mxu0  ;;  %v476_v44 = vld [vmem:[%s1822_s6 + $0xc8] sm:$0xff] }
 0x118   :  { %v938_v48 = vpop.f32.mrb[17].mxu0 }
 0x119   :  { %v939_v49 = vadd.f32 %v938_v48, %v937_v47  ;;  %v1133_v50 = vpack.c.bf16 %v390_v46, %v385_v45  ;;  %v477_v45 = vld [vmem:[%s1822_s6 + $0xd0] sm:$0xff]  ;;  %v478_v46 = vld [vmem:[%s1822_s6 + $0xd8] sm:$0xff]  ;;  %v479_v47 = vld [vmem:[%s1822_s6 + $0xe0] sm:$0xff] }
 0x11a   :  { %v480_v48 = vld [vmem:[%s1822_s6 + $0xe8] sm:$0xff] }
 0x11b   :  { %v940_v51 = vpop.f32.mrb[18].mxu0  ;;  %1134 = vmatprep.subr.bf16.mxu1 %v1133_v50  ;;  %v395_v55 = vadd.f32 %v939_v49, %v1592_v24  ;;  %v481_v49 = vld [vmem:[%s1822_s6 + $0xf0] sm:$0xff] }
 0x11c   :  { %v941_v52 = vpop.f32.mrb[19].mxu0  ;;  %1136 = vmatpush3.bf16.msra.mxu1 %v1133_v50  ;;  %v482_v50 = vld [vmem:[%s1822_s6 + $0xf8] sm:$0xff] }
 0x11d   :  { %v942_v54 = vadd.f32 %v941_v52, %v940_v51  ;;  %v1154_v51 = vmov 0.0  }
 0x11e   :  { %449 = vst [vmem:[%s1824_s8] sm:$0x1] %v1154_v51  ;;  %450 = vst [vmem:[%s1825_s9] sm:$0x1] %v1154_v51 }
 0x11f   :  { %v400_v56 = vadd.f32 %v942_v54, %v1592_v24  ;;  %v943_v57 = vpop.f32.mrb[20].mxu0 }
 0x120   :  { %v944_v41 = vpop.f32.mrb[21].mxu0 }
 0x121   :  { %v945_v58 = vadd.f32 %v944_v41, %v943_v57  ;;  %v1137_v59 = vpack.c.bf16 %v400_v56, %v395_v55 }
 0x123   :  { %v946_v60 = vpop.f32.mrb[22].mxu0  ;;  %1138 = vmatprep.subr.bf16.mxu1 %v1137_v59  ;;  %v405_v62 = vadd.f32 %v945_v58, %v1592_v24 }
 0x124   :  { %v947_v61 = vpop.f32.mrb[23].mxu0  ;;  %1140 = vmatpush3.bf16.msra.mxu1 %v1137_v59 }
 0x125   :  { %v948_v33 = vadd.f32 %v947_v61, %v946_v60 }
 0x127   :  { %v410_v63 = vadd.f32 %v948_v33, %v1592_v24  ;;  %v949_v0 = vpop.f32.mrb[24].mxu0 }
 0x128   :  { %v950_v1 = vpop.f32.mrb[25].mxu0 }
 0x129   :  { %v951_v53 = vadd.f32 %v950_v1, %v949_v0  ;;  %v1141_v2 = vpack.c.bf16 %v410_v63, %v405_v62 }
 0x12b   :  { %v952_v3 = vpop.f32.mrb[26].mxu0  ;;  %1142 = vmatprep.subr.bf16.mxu1 %v1141_v2  ;;  %v415_v5 = vadd.f32 %v951_v53, %v1592_v24 }
 0x12c   :  { %v953_v34 = vpop.f32.mrb[27].mxu0  ;;  %1144 = vmatpush3.bf16.msra.mxu1 %v1141_v2 }
 0x12d   :  { %v954_v4 = vadd.f32 %v953_v34, %v952_v3 }
 0x12f   :  { %v420_v6 = vadd.f32 %v954_v4, %v1592_v24  ;;  %v955_v7 = vpop.f32.mrb[28].mxu0 }
 0x130   :  { %v956_v20 = vpop.f32.mrb[29].mxu0 }
 0x131   :  { %v957_v8 = vadd.f32 %v956_v20, %v955_v7  ;;  %v1145_v9 = vpack.c.bf16 %v420_v6, %v415_v5 }
 0x133   :  { %v958_v23 = vpop.f32.mrb[30].mxu0  ;;  %1146 = vmatprep.subr.bf16.mxu1 %v1145_v9  ;;  %v425_v38 = vadd.f32 %v957_v8, %v1592_v24 }
 0x134   :  { %v959_v37 = vpop.f32.mrb[31].mxu0  ;;  %1148 = vmatpush3.bf16.msra.mxu1 %v1145_v9 }
 0x135   :  { %v960_v10 = vadd.f32 %v959_v37, %v958_v23 }
 0x137   :  { %v430_v11 = vadd.f32 %v960_v10, %v1592_v24  ;;  %v455_v24 = vld [vmem:[%s1822_s6 + $0x20] sm:$0xff] }
 0x139   :  { %v1149_v12 = vpack.c.bf16 %v430_v11, %v425_v38 }
 0x13b   :  { %1150 = vmatprep.subr.bf16.mxu1 %v1149_v12 }
 0x13c   :  { %1152 = vmatpush3.bf16.msra.mxu1 %v1149_v12 }
 0x13f   :  { %1042 = vmatmul.mubr.f32.vlgmr.msra.gmra.mrb[0].mxu1 %v452_v13 }
 0x140   :  { %1044 = vmatprep.mubr.f32.mxu1 %v453_v14 }
 0x143   :  { %1045 = vmatmul.mubr.f32.gmra.mrb[2].mxu1 %v454_v15 }
 0x144   :  { %1047 = vmatprep.mubr.f32.mxu1 %v455_v24 }
 0x147   :  { %1048 = vmatmul.mubr.f32.gmra.mrb[4].mxu1 %v456_v16 }
 0x148   :  { %1050 = vmatprep.mubr.f32.mxu1 %v457_v17 }
 0x14b   :  { %1051 = vmatmul.mubr.f32.gmra.mrb[6].mxu1 %v458_v18 }
 0x14c   :  { %1053 = vmatprep.mubr.f32.mxu1 %v459_v19 }
 0x14f   :  { %1054 = vmatmul.mubr.f32.gmra.mrb[8].mxu1 %v460_v21 }
 0x150   :  { %1056 = vmatprep.mubr.f32.mxu1 %v461_v22 }
 0x153   :  { %1057 = vmatmul.mubr.f32.gmra.mrb[10].mxu1 %v462_v25 }
 0x154   :  { %1059 = vmatprep.mubr.f32.mxu1 %v463_v26 }
 0x157   :  { %1060 = vmatmul.mubr.f32.gmra.mrb[12].mxu1 %v464_v27 }
 0x158   :  { %1062 = vmatprep.mubr.f32.mxu1 %v465_v28 }
 0x15b   :  { %1063 = vmatmul.mubr.f32.gmra.mrb[14].mxu1 %v466_v29 }
 0x15c   :  { %1065 = vmatprep.mubr.f32.mxu1 %v467_v30 }
 0x15f   :  { %1066 = vmatmul.mubr.f32.gmra.mrb[16].mxu1 %v468_v31 }
 0x160   :  { %1068 = vmatprep.mubr.f32.mxu1 %v469_v32 }
 0x163   :  { %1069 = vmatmul.mubr.f32.gmra.mrb[18].mxu1 %v470_v35 }
 0x164   :  { %1071 = vmatprep.mubr.f32.mxu1 %v471_v36 }
 0x167   :  { %1072 = vmatmul.mubr.f32.gmra.mrb[20].mxu1 %v472_v39 }
 0x168   :  { %1074 = vmatprep.mubr.f32.mxu1 %v473_v40 }
 0x16b   :  { %1075 = vmatmul.mubr.f32.gmra.mrb[22].mxu1 %v474_v42 }
 0x16c   :  { %1077 = vmatprep.mubr.f32.mxu1 %v475_v43 }
 0x16f   :  { %1078 = vmatmul.mubr.f32.gmra.mrb[24].mxu1 %v476_v44 }
 0x170   :  { %1080 = vmatprep.mubr.f32.mxu1 %v477_v45 }
 0x173   :  { %1081 = vmatmul.mubr.f32.gmra.mrb[26].mxu1 %v478_v46 }
 0x174   :  { %1083 = vmatprep.mubr.f32.mxu1 %v479_v47 }
 0x177   :  { %1084 = vmatmul.mubr.f32.gmra.mrb[28].mxu1 %v480_v48 }
 0x178   :  { %1086 = vmatprep.mubr.f32.mxu1 %v481_v49 }
 0x17b   :  { %1087 = vmatmul.mubr.f32.gmra.mrb[30].mxu1 %v482_v50 }
 0x212   :  { %v1043_v52 = vpop.f32.mrb[0].mxu1 }
 0x213   :  { %725 = vst [vmem:[%s1826_s7 + $0x8] sm:$0xff] %v1043_v52  ;;  %v798_v54 = vmul.f32 %v1043_v52, %v1043_v52  ;;  %v565_v55 = vpop.f32.mrb[1].mxu1 }
 0x214   :  { %724 = vst [vmem:[%s1826_s7] sm:$0xff] %v565_v55  ;;  %v757_v56 = vadd.f32 %v1043_v52, %v565_v55  ;;  %v797_v57 = vmul.f32 %v565_v55, %v565_v55 }
 0x216   :  { %v829_v41 = vadd.f32 %v798_v54, %v797_v57  ;;  %v1046_v58 = vpop.f32.mrb[2].mxu1 }
 0x217   :  { %727 = vst [vmem:[%s1826_s7 + $0x18] sm:$0xff] %v1046_v58  ;;  %v575_v59 = vpop.f32.mrb[3].mxu1  ;;  %v800_v33 = vmul.f32 %v1046_v58, %v1046_v58 }
 0x218   :  { %726 = vst [vmem:[%s1826_s7 + $0x10] sm:$0xff] %v575_v59  ;;  %v758_v60 = vadd.f32 %v757_v56, %v575_v59  ;;  %v799_v61 = vmul.f32 %v575_v59, %v575_v59 }
 0x21a   :  { %v830_v62 = vadd.f32 %v829_v41, %v799_v61  ;;  %v1049_v63 = vpop.f32.mrb[4].mxu1  ;;  %v759_v0 = vadd.f32 %v1046_v58, %v758_v60 }
 0x21b   :  { %729 = vst [vmem:[%s1826_s7 + $0x28] sm:$0xff] %v1049_v63  ;;  %v585_v1 = vpop.f32.mrb[5].mxu1  ;;  %v802_v34 = vmul.f32 %v1049_v63, %v1049_v63 }
 0x21c   :  { %728 = vst [vmem:[%s1826_s7 + $0x20] sm:$0xff] %v585_v1  ;;  %v760_v53 = vadd.f32 %v759_v0, %v585_v1  ;;  %v801_v2 = vmul.f32 %v585_v1, %v585_v1  ;;  %v831_v3 = vadd.f32 %v830_v62, %v800_v33 }
 0x21e   :  { %v832_v4 = vadd.f32 %v831_v3, %v801_v2  ;;  %v1052_v5 = vpop.f32.mrb[6].mxu1  ;;  %v761_v6 = vadd.f32 %v1049_v63, %v760_v53 }
 0x21f   :  { %731 = vst [vmem:[%s1826_s7 + $0x38] sm:$0xff] %v1052_v5  ;;  %v595_v7 = vpop.f32.mrb[7].mxu1  ;;  %v804_v23 = vmul.f32 %v1052_v5, %v1052_v5 }
 0x220   :  { %730 = vst [vmem:[%s1826_s7 + $0x30] sm:$0xff] %v595_v7  ;;  %v762_v20 = vadd.f32 %v761_v6, %v595_v7  ;;  %v803_v8 = vmul.f32 %v595_v7, %v595_v7  ;;  %v833_v9 = vadd.f32 %v832_v4, %v802_v34 }
 0x222   :  { %v834_v37 = vadd.f32 %v833_v9, %v803_v8  ;;  %v1055_v10 = vpop.f32.mrb[8].mxu1  ;;  %v763_v38 = vadd.f32 %v1052_v5, %v762_v20 }
 0x223   :  { %733 = vst [vmem:[%s1826_s7 + $0x48] sm:$0xff] %v1055_v10  ;;  %v605_v11 = vpop.f32.mrb[9].mxu1  ;;  %v806_v15 = vmul.f32 %v1055_v10, %v1055_v10 }
 0x224   :  { %732 = vst [vmem:[%s1826_s7 + $0x40] sm:$0xff] %v605_v11  ;;  %v764_v12 = vadd.f32 %v763_v38, %v605_v11  ;;  %v805_v13 = vmul.f32 %v605_v11, %v605_v11  ;;  %v835_v14 = vadd.f32 %v834_v37, %v804_v23 }
 0x226   :  { %v836_v24 = vadd.f32 %v835_v14, %v805_v13  ;;  %v1058_v16 = vpop.f32.mrb[10].mxu1  ;;  %v765_v17 = vadd.f32 %v1055_v10, %v764_v12 }
 0x227   :  { %735 = vst [vmem:[%s1826_s7 + $0x58] sm:$0xff] %v1058_v16  ;;  %v615_v18 = vpop.f32.mrb[11].mxu1  ;;  %v808_v25 = vmul.f32 %v1058_v16, %v1058_v16 }
 0x228   :  { %734 = vst [vmem:[%s1826_s7 + $0x50] sm:$0xff] %v615_v18  ;;  %v766_v19 = vadd.f32 %v765_v17, %v615_v18  ;;  %v807_v21 = vmul.f32 %v615_v18, %v615_v18  ;;  %v837_v22 = vadd.f32 %v836_v24, %v806_v15 }
 0x22a   :  { %v838_v26 = vadd.f32 %v837_v22, %v807_v21  ;;  %v1061_v27 = vpop.f32.mrb[12].mxu1  ;;  %v767_v28 = vadd.f32 %v1058_v16, %v766_v19 }
 0x22b   :  { %737 = vst [vmem:[%s1826_s7 + $0x68] sm:$0xff] %v1061_v27  ;;  %v625_v29 = vpop.f32.mrb[13].mxu1  ;;  %v810_v35 = vmul.f32 %v1061_v27, %v1061_v27 }
 0x22c   :  { %736 = vst [vmem:[%s1826_s7 + $0x60] sm:$0xff] %v625_v29  ;;  %v768_v30 = vadd.f32 %v767_v28, %v625_v29  ;;  %v809_v31 = vmul.f32 %v625_v29, %v625_v29  ;;  %v839_v32 = vadd.f32 %v838_v26, %v808_v25 }
 0x22e   :  { %v840_v36 = vadd.f32 %v839_v32, %v809_v31  ;;  %v1064_v39 = vpop.f32.mrb[14].mxu1  ;;  %v769_v40 = vadd.f32 %v1061_v27, %v768_v30 }
 0x22f   :  { %739 = vst [vmem:[%s1826_s7 + $0x78] sm:$0xff] %v1064_v39  ;;  %v635_v42 = vpop.f32.mrb[15].mxu1  ;;  %v812_v46 = vmul.f32 %v1064_v39, %v1064_v39 }
 0x230   :  { %738 = vst [vmem:[%s1826_s7 + $0x70] sm:$0xff] %v635_v42  ;;  %v770_v43 = vadd.f32 %v769_v40, %v635_v42  ;;  %v811_v44 = vmul.f32 %v635_v42, %v635_v42  ;;  %v841_v45 = vadd.f32 %v840_v36, %v810_v35 }
 0x232   :  { %v842_v47 = vadd.f32 %v841_v45, %v811_v44  ;;  %v1067_v48 = vpop.f32.mrb[16].mxu1  ;;  %v771_v49 = vadd.f32 %v1064_v39, %v770_v43 }
 0x233   :  { %741 = vst [vmem:[%s1826_s7 + $0x88] sm:$0xff] %v1067_v48  ;;  %v645_v50 = vpop.f32.mrb[17].mxu1  ;;  %v814_v55 = vmul.f32 %v1067_v48, %v1067_v48 }
 0x234   :  { %740 = vst [vmem:[%s1826_s7 + $0x80] sm:$0xff] %v645_v50  ;;  %v772_v51 = vadd.f32 %v771_v49, %v645_v50  ;;  %v813_v52 = vmul.f32 %v645_v50, %v645_v50  ;;  %v843_v54 = vadd.f32 %v842_v47, %v812_v46 }
 0x236   :  { %v844_v56 = vadd.f32 %v843_v54, %v813_v52  ;;  %v1070_v57 = vpop.f32.mrb[18].mxu1  ;;  %v773_v41 = vadd.f32 %v1067_v48, %v772_v51 }
 0x237   :  { %743 = vst [vmem:[%s1826_s7 + $0x98] sm:$0xff] %v1070_v57  ;;  %v655_v58 = vpop.f32.mrb[19].mxu1  ;;  %v816_v33 = vmul.f32 %v1070_v57, %v1070_v57 }
 0x238   :  { %742 = vst [vmem:[%s1826_s7 + $0x90] sm:$0xff] %v655_v58  ;;  %v774_v59 = vadd.f32 %v773_v41, %v655_v58  ;;  %v815_v60 = vmul.f32 %v655_v58, %v655_v58  ;;  %v845_v61 = vadd.f32 %v844_v56, %v814_v55 }
 0x23a   :  { %v846_v62 = vadd.f32 %v845_v61, %v815_v60  ;;  %v1073_v63 = vpop.f32.mrb[20].mxu1  ;;  %v775_v0 = vadd.f32 %v1070_v57, %v774_v59  ;;  %v756_v59 = vld [vmem:[%s1824_s8] sm:$0x1] }
 0x23b   :  { %745 = vst [vmem:[%s1826_s7 + $0xa8] sm:$0xff] %v1073_v63  ;;  %v665_v1 = vpop.f32.mrb[21].mxu1  ;;  %v818_v34 = vmul.f32 %v1073_v63, %v1073_v63 }
 0x23c   :  { %744 = vst [vmem:[%s1826_s7 + $0xa0] sm:$0xff] %v665_v1  ;;  %v776_v53 = vadd.f32 %v775_v0, %v665_v1  ;;  %v817_v2 = vmul.f32 %v665_v1, %v665_v1  ;;  %v847_v3 = vadd.f32 %v846_v62, %v816_v33  ;;  %v796_v33 = vld [vmem:[%s1825_s9] sm:$0x1] }
 0x23e   :  { %v848_v4 = vadd.f32 %v847_v3, %v817_v2  ;;  %v1076_v5 = vpop.f32.mrb[22].mxu1  ;;  %v777_v6 = vadd.f32 %v1073_v63, %v776_v53 }
 0x23f   :  { %747 = vst [vmem:[%s1826_s7 + $0xb8] sm:$0xff] %v1076_v5  ;;  %v675_v7 = vpop.f32.mrb[23].mxu1  ;;  %v820_v23 = vmul.f32 %v1076_v5, %v1076_v5 }
 0x240   :  { %746 = vst [vmem:[%s1826_s7 + $0xb0] sm:$0xff] %v675_v7  ;;  %v778_v20 = vadd.f32 %v777_v6, %v675_v7  ;;  %v819_v8 = vmul.f32 %v675_v7, %v675_v7  ;;  %v849_v9 = vadd.f32 %v848_v4, %v818_v34 }
 0x242   :  { %v850_v37 = vadd.f32 %v849_v9, %v819_v8  ;;  %v1079_v10 = vpop.f32.mrb[24].mxu1  ;;  %v779_v38 = vadd.f32 %v1076_v5, %v778_v20 }
 0x243   :  { %749 = vst [vmem:[%s1826_s7 + $0xc8] sm:$0xff] %v1079_v10  ;;  %v685_v11 = vpop.f32.mrb[25].mxu1  ;;  %v822_v15 = vmul.f32 %v1079_v10, %v1079_v10 }
 0x244   :  { %748 = vst [vmem:[%s1826_s7 + $0xc0] sm:$0xff] %v685_v11  ;;  %v780_v12 = vadd.f32 %v779_v38, %v685_v11  ;;  %v821_v13 = vmul.f32 %v685_v11, %v685_v11  ;;  %v851_v14 = vadd.f32 %v850_v37, %v820_v23 }
 0x246   :  { %v852_v24 = vadd.f32 %v851_v14, %v821_v13  ;;  %v1082_v16 = vpop.f32.mrb[26].mxu1  ;;  %v781_v17 = vadd.f32 %v1079_v10, %v780_v12 }
 0x247   :  { %751 = vst [vmem:[%s1826_s7 + $0xd8] sm:$0xff] %v1082_v16  ;;  %v695_v18 = vpop.f32.mrb[27].mxu1  ;;  %v824_v25 = vmul.f32 %v1082_v16, %v1082_v16 }
 0x248   :  { %750 = vst [vmem:[%s1826_s7 + $0xd0] sm:$0xff] %v695_v18  ;;  %v782_v19 = vadd.f32 %v781_v17, %v695_v18  ;;  %v823_v21 = vmul.f32 %v695_v18, %v695_v18  ;;  %v853_v22 = vadd.f32 %v852_v24, %v822_v15 }
 0x24a   :  { %v854_v26 = vadd.f32 %v853_v22, %v823_v21  ;;  %v1085_v27 = vpop.f32.mrb[28].mxu1  ;;  %v783_v28 = vadd.f32 %v1082_v16, %v782_v19 }
 0x24b   :  { %753 = vst [vmem:[%s1826_s7 + $0xe8] sm:$0xff] %v1085_v27  ;;  %v705_v29 = vpop.f32.mrb[29].mxu1  ;;  %v826_v35 = vmul.f32 %v1085_v27, %v1085_v27 }
 0x24c   :  { %752 = vst [vmem:[%s1826_s7 + $0xe0] sm:$0xff] %v705_v29  ;;  %v784_v30 = vadd.f32 %v783_v28, %v705_v29  ;;  %v825_v31 = vmul.f32 %v705_v29, %v705_v29  ;;  %v855_v32 = vadd.f32 %v854_v26, %v824_v25 }
 0x24e   :  { %v856_v36 = vadd.f32 %v855_v32, %v825_v31  ;;  %v1088_v39 = vpop.f32.mrb[30].mxu1  ;;  %v785_v40 = vadd.f32 %v1085_v27, %v784_v30 }
 0x24f   :  { %755 = vst [vmem:[%s1826_s7 + $0xf8] sm:$0xff] %v1088_v39  ;;  %v715_v42 = vpop.f32.mrb[31].mxu1  ;;  %v828_v46 = vmul.f32 %v1088_v39, %v1088_v39 }
 0x250   :  { %754 = vst [vmem:[%s1826_s7 + $0xf0] sm:$0xff] %v715_v42  ;;  %v786_v43 = vadd.f32 %v785_v40, %v715_v42  ;;  %v827_v44 = vmul.f32 %v715_v42, %v715_v42  ;;  %v857_v45 = vadd.f32 %v856_v36, %v826_v35 }
 0x252   :  { %v787_v47 = vadd.f32 %v1088_v39, %v786_v43  ;;  %v858_v48 = vadd.f32 %v857_v45, %v827_v44 }
 0x254   :  { %v788_v49 = vrot.slane %v787_v47, 4  ;;  %v859_v50 = vadd.f32 %v858_v48, %v828_v46 }
 0x256   :  { %v789_v51 = vadd.f32 %v788_v49, %v787_v47  ;;  %v860_v52 = vrot.slane %v859_v50, 4 }
 0x258   :  { %v790_v54 = vrot.slane %v789_v51, 2  ;;  %v861_v55 = vadd.f32 %v860_v52, %v859_v50 }
 0x25a   :  { %v791_v56 = vadd.f32 %v790_v54, %v789_v51  ;;  %v862_v57 = vrot.slane %v861_v55, 2 }
 0x25c   :  { %v792_v41 = vrot.slane %v791_v56, 1  ;;  %v863_v58 = vadd.f32 %v862_v57, %v861_v55 }
 0x25e   :  { %v793_v60 = vadd.f32 %v792_v41, %v791_v56  ;;  %v864_v61 = vrot.slane %v863_v58, 1 }
 0x260   :  { %v794_v62 = vadd.f32 %v793_v60, %v756_v59  ;;  %v865_v63 = vadd.f32 %v864_v61, %v863_v58 }
 0x262   :  { %795 = vst [vmem:[%s1824_s8] sm:$0x1] %v794_v62  ;;  %v866_v0 = vadd.f32 %v865_v63, %v796_v33 }
 0x264   :  { %867 = vst [vmem:[%s1825_s9] sm:$0x1] %v866_v0 }

// kernel: _lambda_.4
= control target key start
LH: loop header
LB: loop body
LE: loop exit
PB: predicated region body
PF: predicated region fallthrough
CT: control target
= control target key end

     0   :  { %v988_v3 = vmov 0.0   ;;  %s1551_s1 = inlined_call_operand.vmem [shape: f32[128,256], index: 1, kind: input, shape index: {}]   ;;  %s1552_s0 = inlined_call_operand.vmem [shape: f32[256,128], index: 0, kind: input, shape index: {}]   ;;  %s1553_s2 = inlined_call_operand.vmem [shape: f32[1,256], index: 2, kind: input, shape index: {}]   ;;  %s1554_s3 = inlined_call_operand.vmem [shape: f32[128,256], index: 3, kind: input, shape index: {}]   ;;  %s1555_s5 = inlined_call_operand.vmem [shape: f32[1,256], index: 5, kind: output, shape index: {1}]   ;;  %s1556_s6 = inlined_call_operand.vmem [shape: f32[1,256], index: 6, kind: output, shape index: {2}]   ;;  %s1557_s4 = inlined_call_operand.vmem [shape: f32[128,256], index: 4, kind: output, shape index: {0}]  }
   0x1   :  { %v57_v0 = vld [vmem:[%s1551_s1 + $0x8] sm:$0xff]  ;;  %v59_v1 = vld [vmem:[%s1551_s1 + $0x18] sm:$0xff]  ;;  %v56_v2 = vld [vmem:[%s1551_s1] sm:$0xff]  ;;  %164 = vmatprep.mubr.f32.mxu0 %v988_v3 }
   0x2   :  { %v890_v4 = vpack.c.bf16 %v59_v1, %v57_v0  ;;  %v58_v5 = vld [vmem:[%s1551_s1 + $0x10] sm:$0xff]  ;;  %v61_v6 = vld [vmem:[%s1551_s1 + $0x28] sm:$0xff]  ;;  %v63_v7 = vld [vmem:[%s1551_s1 + $0x38] sm:$0xff] }
   0x3   :  { %v892_v8 = vpack.c.bf16 %v58_v5, %v56_v2  ;;  %v894_v9 = vpack.c.bf16 %v63_v7, %v61_v6  ;;  %v60_v10 = vld [vmem:[%s1551_s1 + $0x20] sm:$0xff]  ;;  %v62_v11 = vld [vmem:[%s1551_s1 + $0x30] sm:$0xff]  ;;  %v65_v12 = vld [vmem:[%s1551_s1 + $0x48] sm:$0xff] }
   0x4   :  { %891 = vmatprep.subr.bf16.mxu0 %v890_v4  ;;  %v67_v13 = vld [vmem:[%s1551_s1 + $0x58] sm:$0xff]  ;;  %v896_v14 = vpack.c.bf16 %v62_v11, %v60_v10  ;;  %v64_v16 = vld [vmem:[%s1551_s1 + $0x40] sm:$0xff]  ;;  %v66_v17 = vld [vmem:[%s1551_s1 + $0x50] sm:$0xff] }
   0x5   :  { %893 = vmatpush1.bf16.msra.mxu0 %v892_v8  ;;  %v898_v15 = vpack.c.bf16 %v67_v13, %v65_v12  ;;  %v69_v18 = vld [vmem:[%s1551_s1 + $0x68] sm:$0xff]  ;;  %v71_v19 = vld [vmem:[%s1551_s1 + $0x78] sm:$0xff]  ;;  %v900_v20 = vpack.c.bf16 %v66_v17, %v64_v16  ;;  %v68_v22 = vld [vmem:[%s1551_s1 + $0x60] sm:$0xff] }
   0x6   :  { %895 = vmatprep.subr.bf16.mxu0 %v894_v9  ;;  %v902_v21 = vpack.c.bf16 %v71_v19, %v69_v18  ;;  %v70_v23 = vld [vmem:[%s1551_s1 + $0x70] sm:$0xff]  ;;  %v73_v24 = vld [vmem:[%s1551_s1 + $0x88] sm:$0xff]  ;;  %v75_v25 = vld [vmem:[%s1551_s1 + $0x98] sm:$0xff]  ;;  %v90_v18 = vlaneseq }
   0x7   :  { %v904_v26 = vpack.c.bf16 %v70_v23, %v68_v22  ;;  %v906_v27 = vpack.c.bf16 %v75_v25, %v73_v24  ;;  %v72_v28 = vld [vmem:[%s1551_s1 + $0x80] sm:$0xff]  ;;  %v74_v29 = vld [vmem:[%s1551_s1 + $0x90] sm:$0xff]  ;;  %v77_v30 = vld [vmem:[%s1551_s1 + $0xa8] sm:$0xff] }
   0x8   :  { %v79_v31 = vld [vmem:[%s1551_s1 + $0xb8] sm:$0xff]  ;;  %v908_v32 = vpack.c.bf16 %v74_v29, %v72_v28  ;;  %v76_v34 = vld [vmem:[%s1551_s1 + $0xa0] sm:$0xff]  ;;  %v78_v35 = vld [vmem:[%s1551_s1 + $0xb0] sm:$0xff]  ;;  %v1250_v19 = vshrl.u32 %v90_v18, 7  ;;  %vm1422_vm0 = vcmp.lt.s32.totalorder %v90_v18, 256 }
   0x9   :  { %897 = vmatpush1.bf16.msra.mxu0 %v896_v14  ;;  %v910_v33 = vpack.c.bf16 %v79_v31, %v77_v30  ;;  %v81_v36 = vld [vmem:[%s1551_s1 + $0xc8] sm:$0xff]  ;;  %v83_v37 = vld [vmem:[%s1551_s1 + $0xd8] sm:$0xff]  ;;  %v912_v38 = vpack.c.bf16 %v78_v35, %v76_v34  ;;  %v80_v40 = vld [vmem:[%s1551_s1 + $0xc0] sm:$0xff]  ;;  %425 = vst.msk [vmem:[%s1555_s5] sm:$0x3] %vm1422_vm0, %v988_v3 }
   0xa   :  { %899 = vmatprep.subr.bf16.mxu0 %v898_v15  ;;  %v914_v39 = vpack.c.bf16 %v83_v37, %v81_v36  ;;  %v82_v41 = vld [vmem:[%s1551_s1 + $0xd0] sm:$0xff]  ;;  %v85_v42 = vld [vmem:[%s1551_s1 + $0xe8] sm:$0xff]  ;;  %v87_v43 = vld [vmem:[%s1551_s1 + $0xf8] sm:$0xff]  ;;  %v96_v22 = vsub.s32 1, %v1250_v19  ;;  %426 = vst.msk [vmem:[%s1556_s6] sm:$0x3] %vm1422_vm0, %v988_v3 }
   0xb   :  { %v916_v44 = vpack.c.bf16 %v82_v41, %v80_v40  ;;  %v918_v45 = vpack.c.bf16 %v87_v43, %v85_v42  ;;  %v84_v46 = vld [vmem:[%s1551_s1 + $0xe0] sm:$0xff]  ;;  %v86_v47 = vld [vmem:[%s1551_s1 + $0xf0] sm:$0xff]  ;;  %v25_v50 = vld [vmem:[%s1552_s0 + $0x8] sm:$0xff] }
   0xc   :  { %v920_v48 = vpack.c.bf16 %v86_v47, %v84_v46  ;;  %v24_v49 = vld [vmem:[%s1552_s0] sm:$0xff]  ;;  %v26_v51 = vld [vmem:[%s1552_s0 + $0x10] sm:$0xff]  ;;  %v27_v52 = vld [vmem:[%s1552_s0 + $0x18] sm:$0xff] }
   0xd   :  { %901 = vmatpush1.bf16.msra.mxu0 %v900_v20  ;;  %v28_v53 = vld [vmem:[%s1552_s0 + $0x20] sm:$0xff]  ;;  %v29_v54 = vld [vmem:[%s1552_s0 + $0x28] sm:$0xff]  ;;  %v30_v55 = vld [vmem:[%s1552_s0 + $0x30] sm:$0xff]  ;;  %v92_v20 = vsub.s32 0, %v1250_v19 }
   0xe   :  { %903 = vmatprep.subr.bf16.mxu0 %v902_v21  ;;  %v31_v56 = vld [vmem:[%s1552_s0 + $0x38] sm:$0xff]  ;;  %v32_v57 = vld [vmem:[%s1552_s0 + $0x40] sm:$0xff]  ;;  %v33_v58 = vld [vmem:[%s1552_s0 + $0x48] sm:$0xff] }
   0xf   :  { %v34_v59 = vld [vmem:[%s1552_s0 + $0x50] sm:$0xff]  ;;  %v35_v60 = vld [vmem:[%s1552_s0 + $0x58] sm:$0xff]  ;;  %v36_v61 = vld [vmem:[%s1552_s0 + $0x60] sm:$0xff] }
  0x10   :  { %v37_v62 = vld [vmem:[%s1552_s0 + $0x68] sm:$0xff]  ;;  %v38_v63 = vld [vmem:[%s1552_s0 + $0x70] sm:$0xff]  ;;  %v39_v0 = vld [vmem:[%s1552_s0 + $0x78] sm:$0xff] }
  0x11   :  { %905 = vmatpush1.bf16.msra.mxu0 %v904_v26  ;;  %v40_v1 = vld [vmem:[%s1552_s0 + $0x80] sm:$0xff]  ;;  %v41_v2 = vld [vmem:[%s1552_s0 + $0x88] sm:$0xff]  ;;  %v42_v4 = vld [vmem:[%s1552_s0 + $0x90] sm:$0xff] }
  0x12   :  { %907 = vmatprep.subr.bf16.mxu0 %v906_v27  ;;  %v43_v5 = vld [vmem:[%s1552_s0 + $0x98] sm:$0xff]  ;;  %v44_v6 = vld [vmem:[%s1552_s0 + $0xa0] sm:$0xff]  ;;  %v45_v7 = vld [vmem:[%s1552_s0 + $0xa8] sm:$0xff] }
  0x13   :  { %v46_v8 = vld [vmem:[%s1552_s0 + $0xb0] sm:$0xff]  ;;  %v47_v9 = vld [vmem:[%s1552_s0 + $0xb8] sm:$0xff]  ;;  %v48_v10 = vld [vmem:[%s1552_s0 + $0xc0] sm:$0xff] }
  0x14   :  { %v49_v11 = vld [vmem:[%s1552_s0 + $0xc8] sm:$0xff]  ;;  %v50_v12 = vld [vmem:[%s1552_s0 + $0xd0] sm:$0xff]  ;;  %v51_v13 = vld [vmem:[%s1552_s0 + $0xd8] sm:$0xff] }
  0x15   :  { %909 = vmatpush1.bf16.msra.mxu0 %v908_v32  ;;  %v52_v14 = vld [vmem:[%s1552_s0 + $0xe0] sm:$0xff]  ;;  %v53_v15 = vld [vmem:[%s1552_s0 + $0xe8] sm:$0xff]  ;;  %v54_v16 = vld [vmem:[%s1552_s0 + $0xf0] sm:$0xff] }
  0x16   :  { %911 = vmatprep.subr.bf16.mxu0 %v910_v33  ;;  %v55_v17 = vld [vmem:[%s1552_s0 + $0xf8] sm:$0xff]  ;;  %v88_v21 = vld [vmem:[%s1553_s2] sm:$0x3]  ;;  %v428_v28 = vld [vmem:[%s1554_s3 + $0x8] sm:$0xff] }
  0x17   :  { %v1257_v24 = vrot.slane %v88_v21, %v92_v20  ;;  %v1259_v26 = vrot.slane %v88_v21, %v96_v22  ;;  %587 = vmatprep.mubr.f32.mxu1 %v428_v28 }
  0x19   :  { %913 = vmatpush1.bf16.msra.mxu0 %v912_v38 }
  0x1a   :  { %915 = vmatprep.subr.bf16.mxu0 %v914_v39 }
  0x1d   :  { %917 = vmatpush1.bf16.msra.mxu0 %v916_v44 }
  0x1e   :  { %919 = vmatprep.subr.bf16.mxu0 %v918_v45 }
  0x21   :  { %921 = vmatpush1.bf16.msra.mxu0 %v920_v48 }
  0x24   :  { %165 = vmatmul.mubr.f32.vlgmr.msra.gmra.mrb[0].mxu0 %v24_v49 }
  0x25   :  { %170 = vmatprep.mubr.f32.mxu0 %v988_v3 }
  0x28   :  { %171 = vmatmul.mubr.f32.gmra.mrb[2].mxu0 %v25_v50 }
  0x29   :  { %176 = vmatprep.mubr.f32.mxu0 %v988_v3 }
  0x2c   :  { %177 = vmatmul.mubr.f32.gmra.mrb[4].mxu0 %v26_v51 }
  0x2d   :  { %182 = vmatprep.mubr.f32.mxu0 %v988_v3 }
  0x30   :  { %183 = vmatmul.mubr.f32.gmra.mrb[6].mxu0 %v27_v52 }
  0x31   :  { %188 = vmatprep.mubr.f32.mxu0 %v988_v3 }
  0x34   :  { %189 = vmatmul.mubr.f32.gmra.mrb[8].mxu0 %v28_v53 }
  0x35   :  { %194 = vmatprep.mubr.f32.mxu0 %v988_v3 }
  0x38   :  { %195 = vmatmul.mubr.f32.gmra.mrb[10].mxu0 %v29_v54 }
  0x39   :  { %200 = vmatprep.mubr.f32.mxu0 %v988_v3 }
  0x3c   :  { %201 = vmatmul.mubr.f32.gmra.mrb[12].mxu0 %v30_v55 }
  0x3d   :  { %206 = vmatprep.mubr.f32.mxu0 %v988_v3 }
  0x40   :  { %207 = vmatmul.mubr.f32.gmra.mrb[14].mxu0 %v31_v56 }
  0x41   :  { %212 = vmatprep.mubr.f32.mxu0 %v988_v3 }
  0x44   :  { %213 = vmatmul.mubr.f32.gmra.mrb[16].mxu0 %v32_v57 }
  0x45   :  { %218 = vmatprep.mubr.f32.mxu0 %v988_v3 }
  0x48   :  { %219 = vmatmul.mubr.f32.gmra.mrb[18].mxu0 %v33_v58 }
  0x49   :  { %224 = vmatprep.mubr.f32.mxu0 %v988_v3 }
  0x4c   :  { %225 = vmatmul.mubr.f32.gmra.mrb[20].mxu0 %v34_v59 }
  0x4d   :  { %230 = vmatprep.mubr.f32.mxu0 %v988_v3 }
  0x50   :  { %231 = vmatmul.mubr.f32.gmra.mrb[22].mxu0 %v35_v60 }
  0x51   :  { %236 = vmatprep.mubr.f32.mxu0 %v988_v3 }
  0x54   :  { %237 = vmatmul.mubr.f32.gmra.mrb[24].mxu0 %v36_v61 }
  0x55   :  { %242 = vmatprep.mubr.f32.mxu0 %v988_v3 }
  0x58   :  { %243 = vmatmul.mubr.f32.gmra.mrb[26].mxu0 %v37_v62 }
  0x59   :  { %248 = vmatprep.mubr.f32.mxu0 %v988_v3 }
  0x5c   :  { %249 = vmatmul.mubr.f32.gmra.mrb[28].mxu0 %v38_v63 }
  0x5d   :  { %254 = vmatprep.mubr.f32.mxu0 %v988_v3 }
  0x60   :  { %255 = vmatmul.mubr.f32.gmra.mrb[30].mxu0 %v39_v0 }
  0x61   :  { %260 = vmatprep.mubr.f32.mxu0 %v988_v3 }
  0x64   :  { %261 = vmatmul.mubr.f32.gmra.mrb[32].mxu0 %v40_v1 }
  0x65   :  { %266 = vmatprep.mubr.f32.mxu0 %v988_v3 }
  0x68   :  { %267 = vmatmul.mubr.f32.gmra.mrb[34].mxu0 %v41_v2 }
  0x69   :  { %272 = vmatprep.mubr.f32.mxu0 %v988_v3 }
  0x6c   :  { %273 = vmatmul.mubr.f32.gmra.mrb[36].mxu0 %v42_v4 }
  0x6d   :  { %278 = vmatprep.mubr.f32.mxu0 %v988_v3 }
  0x70   :  { %279 = vmatmul.mubr.f32.gmra.mrb[38].mxu0 %v43_v5 }
  0x71   :  { %284 = vmatprep.mubr.f32.mxu0 %v988_v3 }
  0x74   :  { %285 = vmatmul.mubr.f32.gmra.mrb[40].mxu0 %v44_v6 }
  0x75   :  { %290 = vmatprep.mubr.f32.mxu0 %v988_v3 }
  0x78   :  { %291 = vmatmul.mubr.f32.gmra.mrb[42].mxu0 %v45_v7 }
  0x79   :  { %296 = vmatprep.mubr.f32.mxu0 %v988_v3 }
  0x7c   :  { %297 = vmatmul.mubr.f32.gmra.mrb[44].mxu0 %v46_v8 }
  0x7d   :  { %302 = vmatprep.mubr.f32.mxu0 %v988_v3 }
  0x80   :  { %303 = vmatmul.mubr.f32.gmra.mrb[46].mxu0 %v47_v9 }
  0x81   :  { %308 = vmatprep.mubr.f32.mxu0 %v988_v3 }
  0x84   :  { %309 = vmatmul.mubr.f32.gmra.mrb[48].mxu0 %v48_v10 }
  0x85   :  { %314 = vmatprep.mubr.f32.mxu0 %v988_v3 }
  0x88   :  { %315 = vmatmul.mubr.f32.gmra.mrb[50].mxu0 %v49_v11 }
  0x89   :  { %320 = vmatprep.mubr.f32.mxu0 %v988_v3 }
  0x8c   :  { %321 = vmatmul.mubr.f32.gmra.mrb[52].mxu0 %v50_v12 }
  0x8d   :  { %326 = vmatprep.mubr.f32.mxu0 %v988_v3 }
  0x90   :  { %327 = vmatmul.mubr.f32.gmra.mrb[54].mxu0 %v51_v13 }
  0x91   :  { %332 = vmatprep.mubr.f32.mxu0 %v988_v3 }
  0x94   :  { %333 = vmatmul.mubr.f32.gmra.mrb[56].mxu0 %v52_v14 }
  0x95   :  { %338 = vmatprep.mubr.f32.mxu0 %v988_v3 }
  0x98   :  { %339 = vmatmul.mubr.f32.gmra.mrb[58].mxu0 %v53_v15 }
  0x99   :  { %344 = vmatprep.mubr.f32.mxu0 %v988_v3 }
  0x9c   :  { %345 = vmatmul.mubr.f32.gmra.mrb[60].mxu0 %v54_v16 }
  0x9d   :  { %350 = vmatprep.mubr.f32.mxu0 %v988_v3 }
  0xa0   :  { %351 = vmatmul.mubr.f32.gmra.mrb[62].mxu0 %v55_v17 }
  0xf7   :  { %v166_v23 = vpop.f32.mrb[0].mxu0 }
  0xf8   :  { %v168_v25 = vpop.f32.mrb[1].mxu0  ;;  %v167_v29 = vadd.f32 %v166_v23, %v1257_v24 }
  0xf9   :  { %v169_v32 = vadd.f32 %v168_v25, %v1259_v26 }
  0xfb   :  { %v172_v27 = vpop.f32.mrb[2].mxu0 }
  0xfc   :  { %v173_v30 = vadd.f32 %v172_v27, %v1257_v24  ;;  %v174_v31 = vpop.f32.mrb[3].mxu0 }
  0xfd   :  { %v175_v33 = vadd.f32 %v174_v31, %v1259_v26 }
  0xfe   :  { %v924_v34 = vpack.c.bf16 %v173_v30, %v167_v29 }
  0xff   :  { %v178_v35 = vpop.f32.mrb[4].mxu0  ;;  %v922_v36 = vpack.c.bf16 %v175_v33, %v169_v32 }
 0x100   :  { %v180_v37 = vpop.f32.mrb[5].mxu0  ;;  %v179_v39 = vadd.f32 %v178_v35, %v1257_v24 }
 0x101   :  { %923 = vmatprep.subr.bf16.mxu1 %v922_v36  ;;  %v181_v42 = vadd.f32 %v180_v37, %v1259_v26 }
 0x102   :  { %925 = vmatpush1.bf16.msra.mxu1 %v924_v34 }
 0x103   :  { %v184_v38 = vpop.f32.mrb[6].mxu0 }
 0x104   :  { %v185_v40 = vadd.f32 %v184_v38, %v1257_v24  ;;  %v186_v41 = vpop.f32.mrb[7].mxu0 }
 0x105   :  { %v187_v43 = vadd.f32 %v186_v41, %v1259_v26 }
 0x106   :  { %v928_v44 = vpack.c.bf16 %v185_v40, %v179_v39 }
 0x107   :  { %v926_v45 = vpack.c.bf16 %v187_v43, %v181_v42  ;;  %v190_v46 = vpop.f32.mrb[8].mxu0 }
 0x108   :  { %v192_v47 = vpop.f32.mrb[9].mxu0  ;;  %v191_v49 = vadd.f32 %v190_v46, %v1257_v24 }
 0x109   :  { %927 = vmatprep.subr.bf16.mxu1 %v926_v45  ;;  %v193_v52 = vadd.f32 %v192_v47, %v1259_v26 }
 0x10a   :  { %929 = vmatpush1.bf16.msra.mxu1 %v928_v44 }
 0x10b   :  { %v196_v48 = vpop.f32.mrb[10].mxu0 }
 0x10c   :  { %v197_v50 = vadd.f32 %v196_v48, %v1257_v24  ;;  %v198_v51 = vpop.f32.mrb[11].mxu0 }
 0x10d   :  { %v199_v53 = vadd.f32 %v198_v51, %v1259_v26 }
 0x10e   :  { %v932_v54 = vpack.c.bf16 %v197_v50, %v191_v49 }
 0x10f   :  { %v930_v55 = vpack.c.bf16 %v199_v53, %v193_v52  ;;  %v202_v56 = vpop.f32.mrb[12].mxu0 }
 0x110   :  { %v204_v57 = vpop.f32.mrb[13].mxu0  ;;  %v203_v59 = vadd.f32 %v202_v56, %v1257_v24 }
 0x111   :  { %931 = vmatprep.subr.bf16.mxu1 %v930_v55  ;;  %v205_v62 = vadd.f32 %v204_v57, %v1259_v26 }
 0x112   :  { %933 = vmatpush1.bf16.msra.mxu1 %v932_v54 }
 0x113   :  { %v208_v58 = vpop.f32.mrb[14].mxu0 }
 0x114   :  { %v209_v60 = vadd.f32 %v208_v58, %v1257_v24  ;;  %v210_v61 = vpop.f32.mrb[15].mxu0 }
 0x115   :  { %v211_v63 = vadd.f32 %v210_v61, %v1259_v26 }
 0x116   :  { %v936_v0 = vpack.c.bf16 %v209_v60, %v203_v59 }
 0x117   :  { %v934_v1 = vpack.c.bf16 %v211_v63, %v205_v62  ;;  %v214_v2 = vpop.f32.mrb[16].mxu0 }
 0x118   :  { %v216_v4 = vpop.f32.mrb[17].mxu0  ;;  %v215_v6 = vadd.f32 %v214_v2, %v1257_v24 }
 0x119   :  { %935 = vmatprep.subr.bf16.mxu1 %v934_v1  ;;  %v217_v9 = vadd.f32 %v216_v4, %v1259_v26 }
 0x11a   :  { %937 = vmatpush1.bf16.msra.mxu1 %v936_v0 }
 0x11b   :  { %v220_v5 = vpop.f32.mrb[18].mxu0 }
 0x11c   :  { %v221_v7 = vadd.f32 %v220_v5, %v1257_v24  ;;  %v222_v8 = vpop.f32.mrb[19].mxu0 }
 0x11d   :  { %v223_v10 = vadd.f32 %v222_v8, %v1259_v26 }
 0x11e   :  { %v940_v11 = vpack.c.bf16 %v221_v7, %v215_v6 }
 0x11f   :  { %v938_v12 = vpack.c.bf16 %v223_v10, %v217_v9  ;;  %v226_v13 = vpop.f32.mrb[20].mxu0 }
 0x120   :  { %v228_v14 = vpop.f32.mrb[21].mxu0  ;;  %v227_v16 = vadd.f32 %v226_v13, %v1257_v24 }
 0x121   :  { %939 = vmatprep.subr.bf16.mxu1 %v938_v12  ;;  %v229_v21 = vadd.f32 %v228_v14, %v1259_v26 }
 0x122   :  { %941 = vmatpush1.bf16.msra.mxu1 %v940_v11 }
 0x123   :  { %v232_v15 = vpop.f32.mrb[22].mxu0 }
 0x124   :  { %v233_v17 = vadd.f32 %v232_v15, %v1257_v24  ;;  %v234_v20 = vpop.f32.mrb[23].mxu0 }
 0x125   :  { %v235_v22 = vadd.f32 %v234_v20, %v1259_v26 }
 0x126   :  { %v944_v23 = vpack.c.bf16 %v233_v17, %v227_v16 }
 0x127   :  { %v942_v25 = vpack.c.bf16 %v235_v22, %v229_v21  ;;  %v238_v27 = vpop.f32.mrb[24].mxu0 }
 0x128   :  { %v240_v28 = vpop.f32.mrb[25].mxu0  ;;  %v239_v30 = vadd.f32 %v238_v27, %v1257_v24 }
 0x129   :  { %943 = vmatprep.subr.bf16.mxu1 %v942_v25  ;;  %v241_v33 = vadd.f32 %v240_v28, %v1259_v26 }
 0x12a   :  { %945 = vmatpush1.bf16.msra.mxu1 %v944_v23 }
 0x12b   :  { %v244_v29 = vpop.f32.mrb[26].mxu0 }
 0x12c   :  { %v245_v31 = vadd.f32 %v244_v29, %v1257_v24  ;;  %v246_v32 = vpop.f32.mrb[27].mxu0 }
 0x12d   :  { %v247_v34 = vadd.f32 %v246_v32, %v1259_v26 }
 0x12e   :  { %v948_v35 = vpack.c.bf16 %v245_v31, %v239_v30 }
 0x12f   :  { %v946_v36 = vpack.c.bf16 %v247_v34, %v241_v33  ;;  %v250_v37 = vpop.f32.mrb[28].mxu0 }
 0x130   :  { %v252_v38 = vpop.f32.mrb[29].mxu0  ;;  %v251_v40 = vadd.f32 %v250_v37, %v1257_v24 }
 0x131   :  { %947 = vmatprep.subr.bf16.mxu1 %v946_v36  ;;  %v253_v43 = vadd.f32 %v252_v38, %v1259_v26 }
 0x132   :  { %949 = vmatpush1.bf16.msra.mxu1 %v948_v35 }
 0x133   :  { %v256_v39 = vpop.f32.mrb[30].mxu0 }
 0x134   :  { %v257_v41 = vadd.f32 %v256_v39, %v1257_v24  ;;  %v258_v42 = vpop.f32.mrb[31].mxu0 }
 0x135   :  { %v259_v44 = vadd.f32 %v258_v42, %v1259_v26 }
 0x136   :  { %v952_v45 = vpack.c.bf16 %v257_v41, %v251_v40 }
 0x137   :  { %v950_v46 = vpack.c.bf16 %v259_v44, %v253_v43  ;;  %v262_v47 = vpop.f32.mrb[32].mxu0 }
 0x138   :  { %v264_v48 = vpop.f32.mrb[33].mxu0  ;;  %v263_v50 = vadd.f32 %v262_v47, %v1257_v24 }
 0x139   :  { %951 = vmatprep.subr.bf16.mxu1 %v950_v46  ;;  %v265_v53 = vadd.f32 %v264_v48, %v1259_v26 }
 0x13a   :  { %953 = vmatpush1.bf16.msra.mxu1 %v952_v45 }
 0x13b   :  { %v268_v49 = vpop.f32.mrb[34].mxu0 }
 0x13c   :  { %v269_v51 = vadd.f32 %v268_v49, %v1257_v24  ;;  %v270_v52 = vpop.f32.mrb[35].mxu0 }
 0x13d   :  { %v271_v54 = vadd.f32 %v270_v52, %v1259_v26 }
 0x13e   :  { %v956_v55 = vpack.c.bf16 %v269_v51, %v263_v50 }
 0x13f   :  { %v954_v56 = vpack.c.bf16 %v271_v54, %v265_v53  ;;  %v274_v57 = vpop.f32.mrb[36].mxu0 }
 0x140   :  { %v276_v58 = vpop.f32.mrb[37].mxu0  ;;  %v275_v60 = vadd.f32 %v274_v57, %v1257_v24 }
 0x141   :  { %955 = vmatprep.subr.bf16.mxu1 %v954_v56  ;;  %v277_v63 = vadd.f32 %v276_v58, %v1259_v26 }
 0x142   :  { %957 = vmatpush1.bf16.msra.mxu1 %v956_v55 }
 0x143   :  { %v280_v59 = vpop.f32.mrb[38].mxu0 }
 0x144   :  { %v281_v61 = vadd.f32 %v280_v59, %v1257_v24  ;;  %v282_v62 = vpop.f32.mrb[39].mxu0 }
 0x145   :  { %v283_v0 = vadd.f32 %v282_v62, %v1259_v26 }
 0x146   :  { %v960_v1 = vpack.c.bf16 %v281_v61, %v275_v60 }
 0x147   :  { %v958_v2 = vpack.c.bf16 %v283_v0, %v277_v63  ;;  %v286_v4 = vpop.f32.mrb[40].mxu0 }
 0x148   :  { %v288_v5 = vpop.f32.mrb[41].mxu0  ;;  %v287_v7 = vadd.f32 %v286_v4, %v1257_v24 }
 0x149   :  { %959 = vmatprep.subr.bf16.mxu1 %v958_v2  ;;  %v289_v10 = vadd.f32 %v288_v5, %v1259_v26  ;;  %v427_v5 = vld [vmem:[%s1554_s3] sm:$0xff] }
 0x14a   :  { %961 = vmatpush1.bf16.msra.mxu1 %v960_v1 }
 0x14b   :  { %v292_v6 = vpop.f32.mrb[42].mxu0 }
 0x14c   :  { %v293_v8 = vadd.f32 %v292_v6, %v1257_v24  ;;  %v294_v9 = vpop.f32.mrb[43].mxu0  ;;  %v430_v6 = vld [vmem:[%s1554_s3 + $0x18] sm:$0xff] }
 0x14d   :  { %v295_v11 = vadd.f32 %v294_v9, %v1259_v26  ;;  %v433_v9 = vld [vmem:[%s1554_s3 + $0x30] sm:$0xff] }
 0x14e   :  { %v964_v12 = vpack.c.bf16 %v293_v8, %v287_v7  ;;  %v431_v7 = vld [vmem:[%s1554_s3 + $0x20] sm:$0xff]  ;;  %v434_v8 = vld [vmem:[%s1554_s3 + $0x38] sm:$0xff] }
 0x14f   :  { %v962_v13 = vpack.c.bf16 %v295_v11, %v289_v10  ;;  %v298_v14 = vpop.f32.mrb[44].mxu0  ;;  %v436_v10 = vld [vmem:[%s1554_s3 + $0x48] sm:$0xff]  ;;  %v435_v11 = vld [vmem:[%s1554_s3 + $0x40] sm:$0xff] }
 0x150   :  { %v300_v15 = vpop.f32.mrb[45].mxu0  ;;  %v299_v17 = vadd.f32 %v298_v14, %v1257_v24  ;;  %v440_v14 = vld [vmem:[%s1554_s3 + $0x68] sm:$0xff] }
 0x151   :  { %963 = vmatprep.subr.bf16.mxu1 %v962_v13  ;;  %v301_v22 = vadd.f32 %v300_v15, %v1259_v26  ;;  %v437_v13 = vld [vmem:[%s1554_s3 + $0x50] sm:$0xff]  ;;  %v439_v15 = vld [vmem:[%s1554_s3 + $0x60] sm:$0xff] }
 0x152   :  { %965 = vmatpush1.bf16.msra.mxu1 %v964_v12  ;;  %v438_v12 = vld [vmem:[%s1554_s3 + $0x58] sm:$0xff] }
 0x153   :  { %v304_v16 = vpop.f32.mrb[46].mxu0 }
 0x154   :  { %v305_v20 = vadd.f32 %v304_v16, %v1257_v24  ;;  %v306_v21 = vpop.f32.mrb[47].mxu0  ;;  %v442_v16 = vld [vmem:[%s1554_s3 + $0x78] sm:$0xff] }
 0x155   :  { %v307_v23 = vadd.f32 %v306_v21, %v1259_v26  ;;  %v443_v21 = vld [vmem:[%s1554_s3 + $0x80] sm:$0xff] }
 0x156   :  { %v968_v25 = vpack.c.bf16 %v305_v20, %v299_v17  ;;  %v441_v17 = vld [vmem:[%s1554_s3 + $0x70] sm:$0xff]  ;;  %v444_v20 = vld [vmem:[%s1554_s3 + $0x88] sm:$0xff] }
 0x157   :  { %v966_v27 = vpack.c.bf16 %v307_v23, %v301_v22  ;;  %v310_v28 = vpop.f32.mrb[48].mxu0  ;;  %v446_v22 = vld [vmem:[%s1554_s3 + $0x98] sm:$0xff]  ;;  %v445_v23 = vld [vmem:[%s1554_s3 + $0x90] sm:$0xff] }
 0x158   :  { %v312_v29 = vpop.f32.mrb[49].mxu0  ;;  %v311_v31 = vadd.f32 %v310_v28, %v1257_v24  ;;  %v450_v28 = vld [vmem:[%s1554_s3 + $0xb8] sm:$0xff] }
 0x159   :  { %967 = vmatprep.subr.bf16.mxu1 %v966_v27  ;;  %v313_v34 = vadd.f32 %v312_v29, %v1259_v26  ;;  %v447_v27 = vld [vmem:[%s1554_s3 + $0xa0] sm:$0xff]  ;;  %v449_v29 = vld [vmem:[%s1554_s3 + $0xb0] sm:$0xff] }
 0x15a   :  { %969 = vmatpush1.bf16.msra.mxu1 %v968_v25  ;;  %v448_v25 = vld [vmem:[%s1554_s3 + $0xa8] sm:$0xff] }
 0x15b   :  { %v316_v30 = vpop.f32.mrb[50].mxu0 }
 0x15c   :  { %v317_v32 = vadd.f32 %v316_v30, %v1257_v24  ;;  %v318_v33 = vpop.f32.mrb[51].mxu0  ;;  %v452_v30 = vld [vmem:[%s1554_s3 + $0xc8] sm:$0xff] }
 0x15d   :  { %v319_v35 = vadd.f32 %v318_v33, %v1259_v26  ;;  %v453_v33 = vld [vmem:[%s1554_s3 + $0xd0] sm:$0xff] }
 0x15e   :  { %v972_v36 = vpack.c.bf16 %v317_v32, %v311_v31  ;;  %v451_v31 = vld [vmem:[%s1554_s3 + $0xc0] sm:$0xff]  ;;  %v454_v32 = vld [vmem:[%s1554_s3 + $0xd8] sm:$0xff] }
 0x15f   :  { %v970_v37 = vpack.c.bf16 %v319_v35, %v313_v34  ;;  %v322_v38 = vpop.f32.mrb[52].mxu0  ;;  %v456_v34 = vld [vmem:[%s1554_s3 + $0xe8] sm:$0xff]  ;;  %v455_v35 = vld [vmem:[%s1554_s3 + $0xe0] sm:$0xff] }
 0x160   :  { %v324_v39 = vpop.f32.mrb[53].mxu0  ;;  %v323_v41 = vadd.f32 %v322_v38, %v1257_v24 }
 0x161   :  { %971 = vmatprep.subr.bf16.mxu1 %v970_v37  ;;  %v325_v44 = vadd.f32 %v324_v39, %v1259_v26  ;;  %v457_v37 = vld [vmem:[%s1554_s3 + $0xf0] sm:$0xff] }
 0x162   :  { %973 = vmatpush1.bf16.msra.mxu1 %v972_v36  ;;  %v458_v36 = vld [vmem:[%s1554_s3 + $0xf8] sm:$0xff] }
 0x163   :  { %v328_v40 = vpop.f32.mrb[54].mxu0 }
 0x164   :  { %v329_v42 = vadd.f32 %v328_v40, %v1257_v24  ;;  %v330_v43 = vpop.f32.mrb[55].mxu0 }
 0x165   :  { %v331_v45 = vadd.f32 %v330_v43, %v1259_v26 }
 0x166   :  { %v976_v46 = vpack.c.bf16 %v329_v42, %v323_v41 }
 0x167   :  { %v974_v47 = vpack.c.bf16 %v331_v45, %v325_v44  ;;  %v334_v48 = vpop.f32.mrb[56].mxu0 }
 0x168   :  { %v336_v49 = vpop.f32.mrb[57].mxu0  ;;  %v335_v51 = vadd.f32 %v334_v48, %v1257_v24 }
 0x169   :  { %975 = vmatprep.subr.bf16.mxu1 %v974_v47  ;;  %v337_v54 = vadd.f32 %v336_v49, %v1259_v26 }
 0x16a   :  { %977 = vmatpush1.bf16.msra.mxu1 %v976_v46 }
 0x16b   :  { %v340_v50 = vpop.f32.mrb[58].mxu0 }
 0x16c   :  { %v341_v52 = vadd.f32 %v340_v50, %v1257_v24  ;;  %v342_v53 = vpop.f32.mrb[59].mxu0 }
 0x16d   :  { %v343_v55 = vadd.f32 %v342_v53, %v1259_v26 }
 0x16e   :  { %v980_v56 = vpack.c.bf16 %v341_v52, %v335_v51 }
 0x16f   :  { %v978_v57 = vpack.c.bf16 %v343_v55, %v337_v54  ;;  %v346_v58 = vpop.f32.mrb[60].mxu0 }
 0x170   :  { %v348_v59 = vpop.f32.mrb[61].mxu0  ;;  %v347_v61 = vadd.f32 %v346_v58, %v1257_v24 }
 0x171   :  { %979 = vmatprep.subr.bf16.mxu1 %v978_v57  ;;  %v349_v0 = vadd.f32 %v348_v59, %v1259_v26 }
 0x172   :  { %981 = vmatpush1.bf16.msra.mxu1 %v980_v56 }
 0x173   :  { %v352_v60 = vpop.f32.mrb[62].mxu0 }
 0x174   :  { %v353_v62 = vadd.f32 %v352_v60, %v1257_v24  ;;  %v354_v63 = vpop.f32.mrb[63].mxu0  ;;  %v429_v24 = vld [vmem:[%s1554_s3 + $0x10] sm:$0xff] }
 0x175   :  { %v355_v1 = vadd.f32 %v354_v63, %v1259_v26  ;;  %v432_v26 = vld [vmem:[%s1554_s3 + $0x28] sm:$0xff] }
 0x176   :  { %v984_v2 = vpack.c.bf16 %v353_v62, %v347_v61 }
 0x177   :  { %v982_v4 = vpack.c.bf16 %v355_v1, %v349_v0 }
 0x179   :  { %983 = vmatprep.subr.bf16.mxu1 %v982_v4 }
 0x17a   :  { %985 = vmatpush1.bf16.msra.mxu1 %v984_v2 }
 0x17d   :  { %588 = vmatmul.mubr.f32.vlgmr.msra.gmra.mrb[0].mxu1 %v427_v5 }
 0x17e   :  { %593 = vmatprep.mubr.f32.mxu1 %v430_v6 }
 0x181   :  { %594 = vmatmul.mubr.f32.gmra.mrb[2].mxu1 %v429_v24 }
 0x182   :  { %599 = vmatprep.mubr.f32.mxu1 %v432_v26 }
 0x185   :  { %600 = vmatmul.mubr.f32.gmra.mrb[4].mxu1 %v431_v7 }
 0x186   :  { %605 = vmatprep.mubr.f32.mxu1 %v434_v8 }
 0x189   :  { %606 = vmatmul.mubr.f32.gmra.mrb[6].mxu1 %v433_v9 }
 0x18a   :  { %611 = vmatprep.mubr.f32.mxu1 %v436_v10 }
 0x18d   :  { %612 = vmatmul.mubr.f32.gmra.mrb[8].mxu1 %v435_v11 }
 0x18e   :  { %617 = vmatprep.mubr.f32.mxu1 %v438_v12 }
 0x191   :  { %618 = vmatmul.mubr.f32.gmra.mrb[10].mxu1 %v437_v13 }
 0x192   :  { %623 = vmatprep.mubr.f32.mxu1 %v440_v14 }
 0x195   :  { %624 = vmatmul.mubr.f32.gmra.mrb[12].mxu1 %v439_v15 }
 0x196   :  { %629 = vmatprep.mubr.f32.mxu1 %v442_v16 }
 0x199   :  { %630 = vmatmul.mubr.f32.gmra.mrb[14].mxu1 %v441_v17 }
 0x19a   :  { %635 = vmatprep.mubr.f32.mxu1 %v444_v20 }
 0x19d   :  { %636 = vmatmul.mubr.f32.gmra.mrb[16].mxu1 %v443_v21 }
 0x19e   :  { %641 = vmatprep.mubr.f32.mxu1 %v446_v22 }
 0x1a1   :  { %642 = vmatmul.mubr.f32.gmra.mrb[18].mxu1 %v445_v23 }
 0x1a2   :  { %647 = vmatprep.mubr.f32.mxu1 %v448_v25 }
 0x1a5   :  { %648 = vmatmul.mubr.f32.gmra.mrb[20].mxu1 %v447_v27 }
 0x1a6   :  { %653 = vmatprep.mubr.f32.mxu1 %v450_v28 }
 0x1a9   :  { %654 = vmatmul.mubr.f32.gmra.mrb[22].mxu1 %v449_v29 }
 0x1aa   :  { %659 = vmatprep.mubr.f32.mxu1 %v452_v30 }
 0x1ad   :  { %660 = vmatmul.mubr.f32.gmra.mrb[24].mxu1 %v451_v31 }
 0x1ae   :  { %665 = vmatprep.mubr.f32.mxu1 %v454_v32 }
 0x1b1   :  { %666 = vmatmul.mubr.f32.gmra.mrb[26].mxu1 %v453_v33 }
 0x1b2   :  { %671 = vmatprep.mubr.f32.mxu1 %v456_v34 }
 0x1b5   :  { %672 = vmatmul.mubr.f32.gmra.mrb[28].mxu1 %v455_v35 }
 0x1b6   :  { %677 = vmatprep.mubr.f32.mxu1 %v458_v36 }
 0x1b9   :  { %678 = vmatmul.mubr.f32.gmra.mrb[30].mxu1 %v457_v37 }
 0x250   :  { %v589_v39 = vpop.f32.mrb[0].mxu1 }
 0x251   :  { %684 = vst [vmem:[%s1557_s4] sm:$0xff] %v589_v39  ;;  %v591_v18 = vpop.f32.mrb[1].mxu1  ;;  %v784_v41 = vmul.f32 %v589_v39, %v589_v39 }
 0x252   :  { %685 = vst [vmem:[%s1557_s4 + $0x8] sm:$0xff] %v591_v18  ;;  %v785_v3 = vmul.f32 %v591_v18, %v591_v18 }
 0x254   :  { %v595_v40 = vpop.f32.mrb[2].mxu1 }
 0x255   :  { %686 = vst [vmem:[%s1557_s4 + $0x10] sm:$0xff] %v595_v40  ;;  %v717_v42 = vadd.f32 %v595_v40, %v589_v39  ;;  %v786_v43 = vmul.f32 %v595_v40, %v595_v40  ;;  %v597_v44 = vpop.f32.mrb[3].mxu1 }
 0x256   :  { %687 = vst [vmem:[%s1557_s4 + $0x18] sm:$0xff] %v597_v44  ;;  %v738_v45 = vadd.f32 %v597_v44, %v591_v18  ;;  %v787_v46 = vmul.f32 %v597_v44, %v597_v44 }
 0x257   :  { %v816_v47 = vadd.f32 %v786_v43, %v784_v41 }
 0x258   :  { %v837_v48 = vadd.f32 %v787_v46, %v785_v3  ;;  %v601_v49 = vpop.f32.mrb[4].mxu1 }
 0x259   :  { %688 = vst [vmem:[%s1557_s4 + $0x20] sm:$0xff] %v601_v49  ;;  %v718_v50 = vadd.f32 %v717_v42, %v601_v49  ;;  %v788_v51 = vmul.f32 %v601_v49, %v601_v49  ;;  %v603_v52 = vpop.f32.mrb[5].mxu1 }
 0x25a   :  { %689 = vst [vmem:[%s1557_s4 + $0x28] sm:$0xff] %v603_v52  ;;  %v739_v53 = vadd.f32 %v738_v45, %v603_v52  ;;  %v789_v54 = vmul.f32 %v603_v52, %v603_v52 }
 0x25b   :  { %v817_v55 = vadd.f32 %v816_v47, %v788_v51 }
 0x25c   :  { %v838_v56 = vadd.f32 %v837_v48, %v789_v54  ;;  %v607_v57 = vpop.f32.mrb[6].mxu1 }
 0x25d   :  { %690 = vst [vmem:[%s1557_s4 + $0x30] sm:$0xff] %v607_v57  ;;  %v719_v58 = vadd.f32 %v718_v50, %v607_v57  ;;  %v790_v59 = vmul.f32 %v607_v57, %v607_v57  ;;  %v609_v60 = vpop.f32.mrb[7].mxu1 }
 0x25e   :  { %691 = vst [vmem:[%s1557_s4 + $0x38] sm:$0xff] %v609_v60  ;;  %v740_v61 = vadd.f32 %v739_v53, %v609_v60  ;;  %v791_v62 = vmul.f32 %v609_v60, %v609_v60 }
 0x25f   :  { %v818_v63 = vadd.f32 %v817_v55, %v790_v59 }
 0x260   :  { %v839_v0 = vadd.f32 %v838_v56, %v791_v62  ;;  %v613_v1 = vpop.f32.mrb[8].mxu1 }
 0x261   :  { %692 = vst [vmem:[%s1557_s4 + $0x40] sm:$0xff] %v613_v1  ;;  %v720_v2 = vadd.f32 %v719_v58, %v613_v1  ;;  %v792_v4 = vmul.f32 %v613_v1, %v613_v1  ;;  %v615_v5 = vpop.f32.mrb[9].mxu1 }
 0x262   :  { %693 = vst [vmem:[%s1557_s4 + $0x48] sm:$0xff] %v615_v5  ;;  %v741_v6 = vadd.f32 %v740_v61, %v615_v5  ;;  %v793_v24 = vmul.f32 %v615_v5, %v615_v5 }
 0x263   :  { %v819_v26 = vadd.f32 %v818_v63, %v792_v4 }
 0x264   :  { %v840_v7 = vadd.f32 %v839_v0, %v793_v24  ;;  %v619_v8 = vpop.f32.mrb[10].mxu1 }
 0x265   :  { %694 = vst [vmem:[%s1557_s4 + $0x50] sm:$0xff] %v619_v8  ;;  %v721_v9 = vadd.f32 %v720_v2, %v619_v8  ;;  %v794_v10 = vmul.f32 %v619_v8, %v619_v8  ;;  %v621_v11 = vpop.f32.mrb[11].mxu1 }
 0x266   :  { %695 = vst [vmem:[%s1557_s4 + $0x58] sm:$0xff] %v621_v11  ;;  %v742_v12 = vadd.f32 %v741_v6, %v621_v11  ;;  %v795_v13 = vmul.f32 %v621_v11, %v621_v11 }
 0x267   :  { %v820_v14 = vadd.f32 %v819_v26, %v794_v10 }
 0x268   :  { %v841_v15 = vadd.f32 %v840_v7, %v795_v13  ;;  %v625_v16 = vpop.f32.mrb[12].mxu1 }
 0x269   :  { %696 = vst [vmem:[%s1557_s4 + $0x60] sm:$0xff] %v625_v16  ;;  %v722_v17 = vadd.f32 %v721_v9, %v625_v16  ;;  %v796_v20 = vmul.f32 %v625_v16, %v625_v16  ;;  %v627_v21 = vpop.f32.mrb[13].mxu1 }
 0x26a   :  { %697 = vst [vmem:[%s1557_s4 + $0x68] sm:$0xff] %v627_v21  ;;  %v743_v22 = vadd.f32 %v742_v12, %v627_v21  ;;  %v797_v23 = vmul.f32 %v627_v21, %v627_v21 }
 0x26b   :  { %v821_v25 = vadd.f32 %v820_v14, %v796_v20 }
 0x26c   :  { %v842_v27 = vadd.f32 %v841_v15, %v797_v23  ;;  %v631_v28 = vpop.f32.mrb[14].mxu1 }
 0x26d   :  { %698 = vst [vmem:[%s1557_s4 + $0x70] sm:$0xff] %v631_v28  ;;  %v723_v29 = vadd.f32 %v722_v17, %v631_v28  ;;  %v798_v30 = vmul.f32 %v631_v28, %v631_v28  ;;  %v633_v31 = vpop.f32.mrb[15].mxu1 }
 0x26e   :  { %699 = vst [vmem:[%s1557_s4 + $0x78] sm:$0xff] %v633_v31  ;;  %v744_v32 = vadd.f32 %v743_v22, %v633_v31  ;;  %v799_v33 = vmul.f32 %v633_v31, %v633_v31 }
 0x26f   :  { %v822_v34 = vadd.f32 %v821_v25, %v798_v30 }
 0x270   :  { %v843_v35 = vadd.f32 %v842_v27, %v799_v33  ;;  %v637_v36 = vpop.f32.mrb[16].mxu1 }
 0x271   :  { %700 = vst [vmem:[%s1557_s4 + $0x80] sm:$0xff] %v637_v36  ;;  %v724_v37 = vadd.f32 %v723_v29, %v637_v36  ;;  %v800_v39 = vmul.f32 %v637_v36, %v637_v36  ;;  %v639_v18 = vpop.f32.mrb[17].mxu1 }
 0x272   :  { %701 = vst [vmem:[%s1557_s4 + $0x88] sm:$0xff] %v639_v18  ;;  %v745_v40 = vadd.f32 %v744_v32, %v639_v18  ;;  %v801_v41 = vmul.f32 %v639_v18, %v639_v18 }
 0x273   :  { %v823_v42 = vadd.f32 %v822_v34, %v800_v39 }
 0x274   :  { %v844_v43 = vadd.f32 %v843_v35, %v801_v41  ;;  %v643_v44 = vpop.f32.mrb[18].mxu1 }
 0x275   :  { %702 = vst [vmem:[%s1557_s4 + $0x90] sm:$0xff] %v643_v44  ;;  %v725_v3 = vadd.f32 %v724_v37, %v643_v44  ;;  %v802_v45 = vmul.f32 %v643_v44, %v643_v44  ;;  %v645_v46 = vpop.f32.mrb[19].mxu1 }
 0x276   :  { %703 = vst [vmem:[%s1557_s4 + $0x98] sm:$0xff] %v645_v46  ;;  %v746_v47 = vadd.f32 %v745_v40, %v645_v46  ;;  %v803_v48 = vmul.f32 %v645_v46, %v645_v46 }
 0x277   :  { %v824_v49 = vadd.f32 %v823_v42, %v802_v45 }
 0x278   :  { %v845_v50 = vadd.f32 %v844_v43, %v803_v48  ;;  %v649_v51 = vpop.f32.mrb[20].mxu1  ;;  %v989_v43 = vmov 1966171168  }
 0x279   :  { %704 = vst [vmem:[%s1557_s4 + $0xa0] sm:$0xff] %v649_v51  ;;  %v726_v52 = vadd.f32 %v725_v3, %v649_v51  ;;  %v804_v53 = vmul.f32 %v649_v51, %v649_v51  ;;  %v651_v54 = vpop.f32.mrb[21].mxu1  ;;  %v763_v44 = vunpack.c.l.s4 %v989_v43 }
 0x27a   :  { %705 = vst [vmem:[%s1557_s4 + $0xa8] sm:$0xff] %v651_v54  ;;  %v747_v55 = vadd.f32 %v746_v47, %v651_v54  ;;  %v805_v56 = vmul.f32 %v651_v54, %v651_v54 }
 0x27b   :  { %v825_v57 = vadd.f32 %v824_v49, %v804_v53 }
 0x27c   :  { %v846_v58 = vadd.f32 %v845_v50, %v805_v56  ;;  %v655_v59 = vpop.f32.mrb[22].mxu1 }
 0x27d   :  { %706 = vst [vmem:[%s1557_s4 + $0xb0] sm:$0xff] %v655_v59  ;;  %v727_v60 = vadd.f32 %v726_v52, %v655_v59  ;;  %v806_v61 = vmul.f32 %v655_v59, %v655_v59  ;;  %v657_v62 = vpop.f32.mrb[23].mxu1  ;;  %v764_v52 = vunpack.c.0.s8 %v763_v44 }
 0x27e   :  { %707 = vst [vmem:[%s1557_s4 + $0xb8] sm:$0xff] %v657_v62  ;;  %v748_v63 = vadd.f32 %v747_v55, %v657_v62  ;;  %v807_v0 = vmul.f32 %v657_v62, %v657_v62 }
 0x27f   :  { %v826_v1 = vadd.f32 %v825_v57, %v806_v61  ;;  %v767_v61 = vsub.s32 %v764_v52, %v1250_v19 }
 0x280   :  { %v847_v2 = vadd.f32 %v846_v58, %v807_v0  ;;  %v661_v4 = vpop.f32.mrb[24].mxu1 }
 0x281   :  { %708 = vst [vmem:[%s1557_s4 + $0xc0] sm:$0xff] %v661_v4  ;;  %v728_v5 = vadd.f32 %v727_v60, %v661_v4  ;;  %v808_v6 = vmul.f32 %v661_v4, %v661_v4  ;;  %v663_v24 = vpop.f32.mrb[25].mxu1 }
 0x282   :  { %709 = vst [vmem:[%s1557_s4 + $0xc8] sm:$0xff] %v663_v24  ;;  %v749_v26 = vadd.f32 %v748_v63, %v663_v24  ;;  %v809_v7 = vmul.f32 %v663_v24, %v663_v24 }
 0x283   :  { %v827_v8 = vadd.f32 %v826_v1, %v808_v6 }
 0x284   :  { %v848_v9 = vadd.f32 %v847_v2, %v809_v7  ;;  %v667_v10 = vpop.f32.mrb[26].mxu1 }
 0x285   :  { %710 = vst [vmem:[%s1557_s4 + $0xd0] sm:$0xff] %v667_v10  ;;  %v729_v11 = vadd.f32 %v728_v5, %v667_v10  ;;  %v810_v12 = vmul.f32 %v667_v10, %v667_v10  ;;  %v669_v13 = vpop.f32.mrb[27].mxu1  ;;  %v716_v5 = vld [vmem:[%s1555_s5] sm:$0x3] }
 0x286   :  { %711 = vst [vmem:[%s1557_s4 + $0xd8] sm:$0xff] %v669_v13  ;;  %v750_v14 = vadd.f32 %v749_v26, %v669_v13  ;;  %v811_v15 = vmul.f32 %v669_v13, %v669_v13  ;;  %v783_v26 = vld [vmem:[%s1556_s6] sm:$0x3] }
 0x287   :  { %v828_v16 = vadd.f32 %v827_v8, %v810_v12 }
 0x288   :  { %v849_v17 = vadd.f32 %v848_v9, %v811_v15  ;;  %v673_v20 = vpop.f32.mrb[28].mxu1 }
 0x289   :  { %712 = vst [vmem:[%s1557_s4 + $0xe0] sm:$0xff] %v673_v20  ;;  %v730_v21 = vadd.f32 %v729_v11, %v673_v20  ;;  %v812_v22 = vmul.f32 %v673_v20, %v673_v20  ;;  %v675_v23 = vpop.f32.mrb[29].mxu1 }
 0x28a   :  { %713 = vst [vmem:[%s1557_s4 + $0xe8] sm:$0xff] %v675_v23  ;;  %v751_v25 = vadd.f32 %v750_v14, %v675_v23  ;;  %v813_v27 = vmul.f32 %v675_v23, %v675_v23 }
 0x28b   :  { %v829_v28 = vadd.f32 %v828_v16, %v812_v22 }
 0x28c   :  { %v850_v29 = vadd.f32 %v849_v17, %v813_v27  ;;  %v679_v30 = vpop.f32.mrb[30].mxu1 }
 0x28d   :  { %714 = vst [vmem:[%s1557_s4 + $0xf0] sm:$0xff] %v679_v30  ;;  %v731_v31 = vadd.f32 %v730_v21, %v679_v30  ;;  %v814_v32 = vmul.f32 %v679_v30, %v679_v30  ;;  %v681_v33 = vpop.f32.mrb[31].mxu1 }
 0x28e   :  { %715 = vst [vmem:[%s1557_s4 + $0xf8] sm:$0xff] %v681_v33  ;;  %v752_v34 = vadd.f32 %v751_v25, %v681_v33  ;;  %v815_v35 = vmul.f32 %v681_v33, %v681_v33 }
 0x28f   :  { %v732_v36 = vrot.slane %v731_v31, 4  ;;  %v830_v37 = vadd.f32 %v829_v28, %v814_v32 }
 0x290   :  { %v753_v39 = vrot.slane %v752_v34, 4  ;;  %v851_v18 = vadd.f32 %v850_v29, %v815_v35 }
 0x291   :  { %v733_v40 = vadd.f32 %v732_v36, %v731_v31  ;;  %v831_v41 = vrot.slane %v830_v37, 4 }
 0x292   :  { %v754_v42 = vadd.f32 %v753_v39, %v752_v34  ;;  %v852_v3 = vrot.slane %v851_v18, 4 }
 0x293   :  { %v734_v45 = vrot.slane %v733_v40, 2  ;;  %v832_v46 = vadd.f32 %v831_v41, %v830_v37 }
 0x294   :  { %v755_v47 = vrot.slane %v754_v42, 2  ;;  %v853_v48 = vadd.f32 %v852_v3, %v851_v18 }
 0x295   :  { %v735_v49 = vadd.f32 %v734_v45, %v733_v40  ;;  %v833_v50 = vrot.slane %v832_v46, 2 }
 0x296   :  { %v756_v51 = vadd.f32 %v755_v47, %v754_v42  ;;  %v854_v53 = vrot.slane %v853_v48, 2 }
 0x297   :  { %v736_v54 = vrot.slane %v735_v49, 1  ;;  %v834_v55 = vadd.f32 %v833_v50, %v832_v46 }
 0x298   :  { %v757_v56 = vrot.slane %v756_v51, 1  ;;  %v855_v57 = vadd.f32 %v854_v53, %v853_v48 }
 0x299   :  { %v737_v58 = vadd.f32 %v736_v54, %v735_v49  ;;  %v835_v59 = vrot.slane %v834_v55, 1 }
 0x29a   :  { %v758_v60 = vadd.f32 %v757_v56, %v756_v51  ;;  %v856_v62 = vrot.slane %v855_v57, 1 }
 0x29b   :  { %v836_v63 = vadd.f32 %v835_v59, %v834_v55 }
 0x29c   :  { %v761_v0 = vcombine.low %v737_v58, %v758_v60  ;;  %v857_v1 = vadd.f32 %v856_v62, %v855_v57 }
 0x29e   :  { %v768_v2 = vrot.slane %v761_v0, %v767_v61  ;;  %v860_v4 = vcombine.low %v836_v63, %v857_v1 }
 0x2a0   :  { %v775_v6 = vrot.slane %v768_v2, %v767_v61  ;;  %v867_v24 = vrot.slane %v860_v4, %v767_v61 }
 0x2a2   :  { %v777_v7 = vadd.f32 %v775_v6, %v716_v5  ;;  %v874_v8 = vrot.slane %v867_v24, %v767_v61 }
 0x2a4   :  { %782 = vst.msk [vmem:[%s1555_s5] sm:$0x3] %vm1422_vm0, %v777_v7  ;;  %v876_v19 = vadd.f32 %v874_v8, %v783_v26 }
 0x2a6   :  { %877 = vst.msk [vmem:[%s1556_s6] sm:$0x3] %vm1422_vm0, %v876_v19 }

// kernel: _lambda_.5
= control target key start
LH: loop header
LB: loop body
LE: loop exit
PB: predicated region body
PF: predicated region fallthrough
CT: control target
= control target key end

     0   :  { %v2110_v25 = vlaneseq  ;;  %s2100_s3 = inlined_call_operand.vmem [shape: f32[256,256], index: 3, kind: input, shape index: {}]   ;;  %s2101_s0 = inlined_call_operand.vmem [shape: f32[128,256], index: 0, kind: input, shape index: {}]   ;;  %s2102_s1 = inlined_call_operand.vmem [shape: f32[1,256], index: 1, kind: input, shape index: {}]   ;;  %s2103_s2 = inlined_call_operand.vmem [shape: f32[1,256], index: 2, kind: input, shape index: {}]   ;;  %s2104_s9 = inlined_call_operand.vmem [shape: f32[128,256], index: 9, kind: output, shape index: {3}]   ;;  %s2105_s4 = inlined_call_operand.vmem [shape: f32[1,256], index: 4, kind: input, shape index: {}]   ;;  %s2106_s5 = inlined_call_operand.vmem [shape: f32[128,128], index: 5, kind: input, shape index: {}]   ;;  %s2107_s7 = inlined_call_operand.vmem [shape: f32[1,256], index: 7, kind: output, shape index: {1}]   ;;  %s2108_s8 = inlined_call_operand.vmem [shape: f32[1,256], index: 8, kind: output, shape index: {2}]   ;;  %s2109_s6 = inlined_call_operand.vmem [shape: f32[128,256], index: 6, kind: output, shape index: {0}]  }
   0x1   :  { %v216_v0 = vld [vmem:[%s2100_s3 + $0x8] sm:$0xff]  ;;  %v218_v1 = vld [vmem:[%s2100_s3 + $0x18] sm:$0xff]  ;;  %v215_v2 = vld [vmem:[%s2100_s3] sm:$0xff] }
   0x2   :  { %v909_v3 = vpack.c.bf16 %v218_v1, %v216_v0  ;;  %v217_v4 = vld [vmem:[%s2100_s3 + $0x10] sm:$0xff]  ;;  %v220_v5 = vld [vmem:[%s2100_s3 + $0x28] sm:$0xff]  ;;  %v222_v6 = vld [vmem:[%s2100_s3 + $0x38] sm:$0xff]  ;;  %v1146_v36 = vshrl.u32 %v2110_v25, 7 }
   0x3   :  { %v911_v7 = vpack.c.bf16 %v217_v4, %v215_v2  ;;  %v913_v8 = vpack.c.bf16 %v222_v6, %v220_v5  ;;  %v219_v9 = vld [vmem:[%s2100_s3 + $0x20] sm:$0xff]  ;;  %v221_v10 = vld [vmem:[%s2100_s3 + $0x30] sm:$0xff]  ;;  %v224_v11 = vld [vmem:[%s2100_s3 + $0x48] sm:$0xff] }
   0x4   :  { %910 = vmatprep.subr.bf16.mxu0 %v909_v3  ;;  %v226_v12 = vld [vmem:[%s2100_s3 + $0x58] sm:$0xff]  ;;  %v915_v13 = vpack.c.bf16 %v221_v10, %v219_v9  ;;  %v223_v15 = vld [vmem:[%s2100_s3 + $0x40] sm:$0xff]  ;;  %v225_v16 = vld [vmem:[%s2100_s3 + $0x50] sm:$0xff]  ;;  %v1239_v57 = vsub.s32 0, %v1146_v36  ;;  %v1242_v58 = vsub.s32 1, %v1146_v36 }
   0x5   :  { %912 = vmatpush1.bf16.msra.mxu0 %v911_v7  ;;  %v917_v14 = vpack.c.bf16 %v226_v12, %v224_v11  ;;  %v228_v17 = vld [vmem:[%s2100_s3 + $0x68] sm:$0xff]  ;;  %v230_v18 = vld [vmem:[%s2100_s3 + $0x78] sm:$0xff]  ;;  %v919_v19 = vpack.c.bf16 %v225_v16, %v223_v15  ;;  %v227_v21 = vld [vmem:[%s2100_s3 + $0x60] sm:$0xff] }
   0x6   :  { %914 = vmatprep.subr.bf16.mxu0 %v913_v8  ;;  %v921_v20 = vpack.c.bf16 %v230_v18, %v228_v17  ;;  %v229_v22 = vld [vmem:[%s2100_s3 + $0x70] sm:$0xff]  ;;  %v232_v23 = vld [vmem:[%s2100_s3 + $0x88] sm:$0xff]  ;;  %v234_v24 = vld [vmem:[%s2100_s3 + $0x98] sm:$0xff] }
   0x7   :  { %v923_v26 = vpack.c.bf16 %v229_v22, %v227_v21  ;;  %v231_v27 = vld [vmem:[%s2100_s3 + $0x80] sm:$0xff]  ;;  %v925_v28 = vpack.c.bf16 %v234_v24, %v232_v23  ;;  %v233_v29 = vld [vmem:[%s2100_s3 + $0x90] sm:$0xff]  ;;  %v236_v30 = vld [vmem:[%s2100_s3 + $0xa8] sm:$0xff] }
   0x8   :  { %v238_v31 = vld [vmem:[%s2100_s3 + $0xb8] sm:$0xff]  ;;  %v1128_v32 = vld [vmem:[%s2100_s3 + $0xa0] sm:$0xff]  ;;  %v1133_v33 = vld [vmem:[%s2100_s3 + $0xb0] sm:$0xff]  ;;  %v927_v45 = vpack.c.bf16 %v233_v29, %v231_v27 }
   0x9   :  { %916 = vmatpush1.bf16.msra.mxu0 %v915_v13  ;;  %v1138_v34 = vld [vmem:[%s2100_s3 + $0xc8] sm:$0xff]  ;;  %v1143_v35 = vld [vmem:[%s2100_s3 + $0xd8] sm:$0xff]  ;;  %v1151_v37 = vld [vmem:[%s2100_s3 + $0xc0] sm:$0xff]  ;;  %v929_v50 = vpack.c.bf16 %v238_v31, %v236_v30  ;;  %v931_v59 = vpack.c.bf16 %v1133_v33, %v1128_v32 }
   0xa   :  { %918 = vmatprep.subr.bf16.mxu0 %v917_v14  ;;  %v1156_v38 = vld [vmem:[%s2100_s3 + $0xd0] sm:$0xff]  ;;  %v1161_v39 = vld [vmem:[%s2100_s3 + $0xe8] sm:$0xff]  ;;  %v1166_v40 = vld [vmem:[%s2100_s3 + $0xf8] sm:$0xff]  ;;  %v933_v60 = vpack.c.bf16 %v1143_v35, %v1138_v34 }
   0xb   :  { %v1171_v41 = vld [vmem:[%s2100_s3 + $0xe0] sm:$0xff]  ;;  %v1176_v42 = vld [vmem:[%s2100_s3 + $0xf0] sm:$0xff]  ;;  %v1181_v43 = vld [vmem:[%s2100_s3 + $0x108] sm:$0xff]  ;;  %v935_v0 = vpack.c.bf16 %v1156_v38, %v1151_v37  ;;  %v937_v1 = vpack.c.bf16 %v1166_v40, %v1161_v39 }
   0xc   :  { %v1186_v44 = vld [vmem:[%s2100_s3 + $0x118] sm:$0xff]  ;;  %v1191_v46 = vld [vmem:[%s2100_s3 + $0x100] sm:$0xff]  ;;  %v1196_v47 = vld [vmem:[%s2100_s3 + $0x110] sm:$0xff]  ;;  %v939_v2 = vpack.c.bf16 %v1176_v42, %v1171_v41 }
   0xd   :  { %920 = vmatpush1.bf16.msra.mxu0 %v919_v19  ;;  %v1201_v48 = vld [vmem:[%s2100_s3 + $0x128] sm:$0xff]  ;;  %v1206_v49 = vld [vmem:[%s2100_s3 + $0x138] sm:$0xff]  ;;  %v1211_v51 = vld [vmem:[%s2100_s3 + $0x120] sm:$0xff]  ;;  %v941_v3 = vpack.c.bf16 %v1186_v44, %v1181_v43  ;;  %v943_v7 = vpack.c.bf16 %v1196_v47, %v1191_v46 }
   0xe   :  { %922 = vmatprep.subr.bf16.mxu0 %v921_v20  ;;  %v1216_v52 = vld [vmem:[%s2100_s3 + $0x130] sm:$0xff]  ;;  %v1221_v53 = vld [vmem:[%s2100_s3 + $0x148] sm:$0xff]  ;;  %v1226_v54 = vld [vmem:[%s2100_s3 + $0x158] sm:$0xff]  ;;  %v945_v8 = vpack.c.bf16 %v1206_v49, %v1201_v48 }
   0xf   :  { %v1231_v55 = vld [vmem:[%s2100_s3 + $0x140] sm:$0xff]  ;;  %v1236_v56 = vld [vmem:[%s2100_s3 + $0x150] sm:$0xff]  ;;  %v1251_v61 = vld [vmem:[%s2100_s3 + $0x168] sm:$0xff]  ;;  %v947_v9 = vpack.c.bf16 %v1216_v52, %v1211_v51  ;;  %v949_v10 = vpack.c.bf16 %v1226_v54, %v1221_v53 }
  0x10   :  { %v1256_v62 = vld [vmem:[%s2100_s3 + $0x178] sm:$0xff]  ;;  %v1261_v63 = vld [vmem:[%s2100_s3 + $0x160] sm:$0xff]  ;;  %v1274_v4 = vld [vmem:[%s2100_s3 + $0x170] sm:$0xff]  ;;  %v951_v13 = vpack.c.bf16 %v1236_v56, %v1231_v55 }
  0x11   :  { %924 = vmatpush1.bf16.msra.mxu0 %v923_v26  ;;  %v1279_v5 = vld [vmem:[%s2100_s3 + $0x188] sm:$0xff]  ;;  %v1284_v6 = vld [vmem:[%s2100_s3 + $0x198] sm:$0xff]  ;;  %v63_v12 = vld [vmem:[%s2102_s1] sm:$0x3]  ;;  %v953_v14 = vpack.c.bf16 %v1256_v62, %v1251_v61  ;;  %v955_v20 = vpack.c.bf16 %v1274_v4, %v1261_v63 }
  0x12   :  { %926 = vmatprep.subr.bf16.mxu0 %v925_v28  ;;  %v32_v11 = vld [vmem:[%s2101_s0 + $0x8] sm:$0xff]  ;;  %v1305_v15 = vrot.slane %v63_v12, %v1239_v57  ;;  %v1308_v16 = vrot.slane %v63_v12, %v1242_v58  ;;  %v107_v17 = vld [vmem:[%s2103_s2] sm:$0x3]  ;;  %v34_v19 = vld [vmem:[%s2101_s0 + $0x18] sm:$0xff]  ;;  %v957_v21 = vpack.c.bf16 %v1284_v6, %v1279_v5 }
  0x13   :  { %v31_v18 = vld [vmem:[%s2101_s0] sm:$0xff]  ;;  %v1324_v22 = vrot.slane %v107_v17, %v1239_v57  ;;  %v1327_v23 = vrot.slane %v107_v17, %v1242_v58  ;;  %v33_v24 = vld [vmem:[%s2101_s0 + $0x10] sm:$0xff]  ;;  %v36_v26 = vld [vmem:[%s2101_s0 + $0x28] sm:$0xff] }
  0x14   :  { %v35_v27 = vld [vmem:[%s2101_s0 + $0x20] sm:$0xff]  ;;  %v76_v28 = vmul.f32 %v1308_v16, %v32_v11  ;;  %v75_v29 = vmul.f32 %v1305_v15, %v31_v18  ;;  %v78_v30 = vmul.f32 %v1308_v16, %v34_v19  ;;  %v77_v31 = vmul.f32 %v1305_v15, %v33_v24  ;;  %v38_v32 = vld [vmem:[%s2101_s0 + $0x38] sm:$0xff]  ;;  %v37_v33 = vld [vmem:[%s2101_s0 + $0x30] sm:$0xff] }
  0x15   :  { %928 = vmatpush1.bf16.msra.mxu0 %v927_v45  ;;  %v80_v34 = vmul.f32 %v1308_v16, %v36_v26  ;;  %v79_v35 = vmul.f32 %v1305_v15, %v35_v27  ;;  %v82_v37 = vmul.f32 %v1308_v16, %v38_v32  ;;  %v81_v38 = vmul.f32 %v1305_v15, %v37_v33  ;;  %v42_v11 = vld [vmem:[%s2101_s0 + $0x58] sm:$0xff]  ;;  %v41_v24 = vld [vmem:[%s2101_s0 + $0x50] sm:$0xff]  ;;  %v44_v26 = vld [vmem:[%s2101_s0 + $0x68] sm:$0xff] }
  0x16   :  { %930 = vmatprep.subr.bf16.mxu0 %v929_v50  ;;  %v120_v39 = vadd.f32 %v1327_v23, %v76_v28  ;;  %v1354_v40 = vadd.f32 %v1324_v22, %v75_v29  ;;  %v1357_v45 = vadd.f32 %v1327_v23, %v78_v30  ;;  %v1360_v50 = vadd.f32 %v1324_v22, %v77_v31  ;;  %v43_v27 = vld [vmem:[%s2101_s0 + $0x60] sm:$0xff]  ;;  %v46_v32 = vld [vmem:[%s2101_s0 + $0x78] sm:$0xff]  ;;  %v45_v33 = vld [vmem:[%s2101_s0 + $0x70] sm:$0xff] }
  0x17   :  { %v1372_v12 = vadd.f32 %v1327_v23, %v80_v34  ;;  %v1375_v17 = vadd.f32 %v1324_v22, %v79_v35  ;;  %v1378_v18 = vadd.f32 %v1327_v23, %v82_v37  ;;  %v1381_v19 = vadd.f32 %v1324_v22, %v81_v38  ;;  %v47_v41 = vld [vmem:[%s2101_s0 + $0x80] sm:$0xff]  ;;  %v50_v42 = vld [vmem:[%s2101_s0 + $0x98] sm:$0xff]  ;;  %v52_v43 = vld [vmem:[%s2101_s0 + $0xa8] sm:$0xff] }
  0x18   :  { %v152_v28 = vmax.f32 %v120_v39, 0.0  ;;  %v151_v29 = vmax.f32 %v1354_v40, 0.0  ;;  %v154_v30 = vmax.f32 %v1357_v45, 0.0  ;;  %v2115_v31 = vmax.f32 %v1360_v50, 0.0  ;;  %v51_v44 = vld [vmem:[%s2101_s0 + $0xa0] sm:$0xff]  ;;  %v265_v56 = vld [vmem:[%s2100_s3 + $0x190] sm:$0xff] }
  0x19   :  { %932 = vmatpush1.bf16.msra.mxu0 %v931_v59  ;;  %v40_v59 = vld [vmem:[%s2101_s0 + $0x48] sm:$0xff]  ;;  %v2114_v34 = vmax.f32 %v1372_v12, 0.0  ;;  %v2111_v35 = vmax.f32 %v1378_v18, 0.0  ;;  %v2112_v37 = vmax.f32 %v1381_v19, 0.0  ;;  %v86_v39 = vmul.f32 %v1308_v16, %v42_v11  ;;  %v263_v55 = vld [vmem:[%s2100_s3 + $0x180] sm:$0xff]  ;;  %v274_v6 = vld [vmem:[%s2100_s3 + $0x1d8] sm:$0xff] }
  0x1a   :  { %934 = vmatprep.subr.bf16.mxu0 %v933_v60  ;;  %v39_v60 = vld [vmem:[%s2101_s0 + $0x40] sm:$0xff]  ;;  %184 = vst [vmem:[%s2104_s9 + $0x8] sm:$0xff] %v152_v28  ;;  %355 = vmatprep.mubr.f32.mxu0 %v152_v28  ;;  %183 = vst [vmem:[%s2104_s9] sm:$0xff] %v151_v29  ;;  %v85_v28 = vmul.f32 %v1305_v15, %v41_v24  ;;  %v90_v11 = vmul.f32 %v1308_v16, %v46_v32  ;;  %v268_v62 = vld [vmem:[%s2100_s3 + $0x1a8] sm:$0xff] }
  0x1b   :  { %186 = vst [vmem:[%s2104_s9 + $0x18] sm:$0xff] %v154_v30  ;;  %185 = vst [vmem:[%s2104_s9 + $0x10] sm:$0xff] %v2115_v31  ;;  %v83_v38 = vmul.f32 %v1305_v15, %v39_v60  ;;  %v87_v60 = vmul.f32 %v1305_v15, %v43_v27  ;;  %v89_v24 = vmul.f32 %v1305_v15, %v45_v33  ;;  %v48_v27 = vld [vmem:[%s2101_s0 + $0x88] sm:$0xff]  ;;  %v267_v4 = vld [vmem:[%s2100_s3 + $0x1a0] sm:$0xff] }
  0x1c   :  { %188 = vst [vmem:[%s2104_s9 + $0x28] sm:$0xff] %v2114_v34  ;;  %190 = vst [vmem:[%s2104_s9 + $0x38] sm:$0xff] %v2111_v35  ;;  %v1485_v33 = vadd.f32 %v1327_v23, %v90_v11  ;;  %v53_v11 = vld [vmem:[%s2101_s0 + $0xb0] sm:$0xff]  ;;  %v92_v46 = vmul.f32 %v1308_v16, %v48_v27  ;;  %v91_v47 = vmul.f32 %v1305_v15, %v47_v41  ;;  %v272_v5 = vld [vmem:[%s2100_s3 + $0x1c8] sm:$0xff] }
  0x1d   :  { %936 = vmatpush1.bf16.msra.mxu0 %v935_v0  ;;  %v2113_v0 = vmax.f32 %v1375_v17, 0.0  ;;  %189 = vst [vmem:[%s2104_s9 + $0x30] sm:$0xff] %v2112_v37  ;;  %v1458_v35 = vadd.f32 %v1324_v22, %v83_v38  ;;  %v1461_v37 = vadd.f32 %v1327_v23, %v86_v39  ;;  %v1482_v32 = vadd.f32 %v1324_v22, %v87_v60  ;;  %v49_v38 = vld [vmem:[%s2101_s0 + $0x90] sm:$0xff]  ;;  %v54_v60 = vld [vmem:[%s2101_s0 + $0xb8] sm:$0xff] }
  0x1e   :  { %938 = vmatprep.subr.bf16.mxu0 %v937_v1  ;;  %v84_v1 = vmul.f32 %v1308_v16, %v40_v59  ;;  %v88_v59 = vmul.f32 %v1308_v16, %v44_v26  ;;  %v1464_v26 = vadd.f32 %v1324_v22, %v85_v28  ;;  %v2117_v34 = vmax.f32 %v1485_v33, 0.0 }
  0x1f   :  { %187 = vst [vmem:[%s2104_s9 + $0x20] sm:$0xff] %v2113_v0  ;;  %v2116_v39 = vmax.f32 %v1458_v35, 0.0  ;;  %v2122_v28 = vmax.f32 %v1461_v37, 0.0  ;;  %v2119_v0 = vmax.f32 %v1482_v32, 0.0  ;;  %v96_v48 = vmul.f32 %v1308_v16, %v52_v43  ;;  %v56_v43 = vld [vmem:[%s2101_s0 + $0xc8] sm:$0xff] }
  0x20   :  { %v1455_v25 = vadd.f32 %v1327_v23, %v84_v1  ;;  %v1488_v1 = vadd.f32 %v1324_v22, %v89_v24  ;;  %198 = vst [vmem:[%s2104_s9 + $0x78] sm:$0xff] %v2117_v34  ;;  %v95_v49 = vmul.f32 %v1305_v15, %v51_v44  ;;  %v97_v27 = vmul.f32 %v1305_v15, %v53_v11  ;;  %v55_v44 = vld [vmem:[%s2101_s0 + $0xc0] sm:$0xff] }
  0x21   :  { %940 = vmatpush1.bf16.msra.mxu0 %v939_v2  ;;  %v1479_v2 = vadd.f32 %v1327_v23, %v88_v59  ;;  %v2121_v59 = vmax.f32 %v1464_v26, 0.0  ;;  %191 = vst [vmem:[%s2104_s9 + $0x40] sm:$0xff] %v2116_v39  ;;  %194 = vst [vmem:[%s2104_s9 + $0x58] sm:$0xff] %v2122_v28  ;;  %v93_v39 = vmul.f32 %v1305_v15, %v49_v38  ;;  %v2132_v40 = vmax.f32 %v1458_v35, 0.0 }
  0x22   :  { %942 = vmatprep.subr.bf16.mxu0 %v941_v3  ;;  %v160_v3 = vmax.f32 %v1455_v25, 0.0  ;;  %v2118_v31 = vmax.f32 %v1488_v1, 0.0  ;;  %195 = vst [vmem:[%s2104_s9 + $0x60] sm:$0xff] %v2119_v0  ;;  %v1568_v41 = vadd.f32 %v1327_v23, %v92_v46  ;;  %v1589_v11 = vadd.f32 %v1327_v23, %v96_v48  ;;  %v59_v48 = vld [vmem:[%s2101_s0 + $0xe0] sm:$0xff] }
  0x23   :  { %v2120_v24 = vmax.f32 %v1479_v2, 0.0  ;;  %193 = vst [vmem:[%s2104_s9 + $0x50] sm:$0xff] %v2121_v59  ;;  %v1577_v34 = vadd.f32 %v1324_v22, %v93_v39  ;;  %v1592_v46 = vadd.f32 %v1324_v22, %v95_v49  ;;  %v61_v59 = vld [vmem:[%s2101_s0 + $0xf0] sm:$0xff]  ;;  %v100_v53 = vmul.f32 %v1308_v16, %v56_v43 }
  0x24   :  { %192 = vst [vmem:[%s2104_s9 + $0x48] sm:$0xff] %v160_v3  ;;  %197 = vst [vmem:[%s2104_s9 + $0x70] sm:$0xff] %v2118_v31  ;;  %v60_v31 = vld [vmem:[%s2101_s0 + $0xe8] sm:$0xff]  ;;  %v168_v49 = vmax.f32 %v1568_v41, 0.0  ;;  %v172_v51 = vmax.f32 %v1589_v11, 0.0  ;;  %v99_v54 = vmul.f32 %v1305_v15, %v55_v44  ;;  %v103_v44 = vmul.f32 %v1305_v15, %v59_v48 }
  0x25   :  { %944 = vmatpush1.bf16.msra.mxu0 %v943_v7  ;;  %v94_v7 = vmul.f32 %v1308_v16, %v50_v42  ;;  %196 = vst [vmem:[%s2104_s9 + $0x68] sm:$0xff] %v2120_v24  ;;  %v1571_v42 = vadd.f32 %v1324_v22, %v91_v47  ;;  %v1598_v47 = vadd.f32 %v1324_v22, %v97_v27  ;;  %v169_v0 = vmax.f32 %v1577_v34, 0.0  ;;  %v62_v24 = vld [vmem:[%s2101_s0 + $0xf8] sm:$0xff] }
  0x26   :  { %946 = vmatprep.subr.bf16.mxu0 %v945_v8  ;;  %v98_v8 = vmul.f32 %v1308_v16, %v54_v60  ;;  %v58_v60 = vld [vmem:[%s2101_s0 + $0xd8] sm:$0xff]  ;;  %v2125_v52 = vmax.f32 %v1592_v46, 0.0  ;;  %200 = vst [vmem:[%s2104_s9 + $0x88] sm:$0xff] %v168_v49  ;;  %204 = vst [vmem:[%s2104_s9 + $0xa8] sm:$0xff] %v172_v51  ;;  %v104_v43 = vmul.f32 %v1308_v16, %v60_v31  ;;  %v2133_v45 = vmax.f32 %v1461_v37, 0.0 }
  0x27   :  { %v1574_v38 = vadd.f32 %v1327_v23, %v94_v7  ;;  %v57_v7 = vld [vmem:[%s2101_s0 + $0xd0] sm:$0xff]  ;;  %v2126_v28 = vmax.f32 %v1598_v47, 0.0  ;;  %201 = vst [vmem:[%s2104_s9 + $0x90] sm:$0xff] %v169_v0  ;;  %v2138_v25 = vmax.f32 %v1488_v1, 0.0  ;;  %v2142_v35 = vmax.f32 %v1598_v47, 0.0 }
  0x28   :  { %v1595_v39 = vadd.f32 %v1327_v23, %v98_v8  ;;  %v2123_v8 = vmax.f32 %v1571_v42, 0.0  ;;  %203 = vst [vmem:[%s2104_s9 + $0xa0] sm:$0xff] %v2125_v52  ;;  %v1684_v52 = vadd.f32 %v1324_v22, %v99_v54  ;;  %v1007_v34 = vmov 0.0  }
  0x29   :  { %948 = vmatpush1.bf16.msra.mxu0 %v947_v9  ;;  %v170_v27 = vmax.f32 %v1574_v38, 0.0  ;;  %205 = vst [vmem:[%s2104_s9 + $0xb0] sm:$0xff] %v2126_v28  ;;  %602 = vmatprep.mubr.f32.mxu1 %v1007_v34 }
  0x2a   :  { %950 = vmatprep.subr.bf16.mxu0 %v949_v10  ;;  %v2124_v9 = vmax.f32 %v1595_v39, 0.0  ;;  %199 = vst [vmem:[%s2104_s9 + $0x80] sm:$0xff] %v2123_v8  ;;  %v102_v10 = vmul.f32 %v1308_v16, %v58_v60  ;;  %v101_v8 = vmul.f32 %v1305_v15, %v57_v7  ;;  %v106_v60 = vmul.f32 %v1308_v16, %v62_v24 }
  0x2b   :  { %202 = vst [vmem:[%s2104_s9 + $0x98] sm:$0xff] %v170_v27  ;;  %v105_v7 = vmul.f32 %v1305_v15, %v61_v59  ;;  %v1705_v15 = vadd.f32 %v1324_v22, %v103_v44  ;;  %v175_v24 = vmax.f32 %v1684_v52, 0.0  ;;  %v271_v44 = vld [vmem:[%s2100_s3 + $0x1c0] sm:$0xff] }
  0x2c   :  { %206 = vst [vmem:[%s2104_s9 + $0xb8] sm:$0xff] %v2124_v9  ;;  %v1681_v9 = vadd.f32 %v1327_v23, %v100_v53  ;;  %v1687_v28 = vadd.f32 %v1327_v23, %v102_v10  ;;  %v1690_v31 = vadd.f32 %v1324_v22, %v101_v8  ;;  %v1708_v16 = vadd.f32 %v1327_v23, %v106_v60  ;;  %v273_v60 = vld [vmem:[%s2100_s3 + $0x1d0] sm:$0xff] }
  0x2d   :  { %952 = vmatpush1.bf16.msra.mxu0 %v951_v13  ;;  %v1702_v13 = vadd.f32 %v1327_v23, %v104_v43  ;;  %v1711_v61 = vadd.f32 %v1324_v22, %v105_v7  ;;  %v179_v22 = vmax.f32 %v1705_v15, 0.0  ;;  %v959_v10 = vpack.c.bf16 %v265_v56, %v263_v55  ;;  %207 = vst [vmem:[%s2104_s9 + $0xc0] sm:$0xff] %v175_v24  ;;  %v276_v7 = vld [vmem:[%s2100_s3 + $0x1e8] sm:$0xff]  ;;  %v278_v55 = vld [vmem:[%s2100_s3 + $0x1f8] sm:$0xff] }
  0x2e   :  { %954 = vmatprep.subr.bf16.mxu0 %v953_v14  ;;  %v270_v14 = vld [vmem:[%s2100_s3 + $0x1b8] sm:$0xff]  ;;  %v176_v59 = vmax.f32 %v1681_v9, 0.0  ;;  %v178_v48 = vmax.f32 %v1687_v28, 0.0  ;;  %v177_v23 = vmax.f32 %v1690_v31, 0.0  ;;  %v182_v53 = vmax.f32 %v1708_v16, 0.0 }
  0x2f   :  { %v180_v8 = vmax.f32 %v1702_v13, 0.0  ;;  %v181_v54 = vmax.f32 %v1711_v61, 0.0  ;;  %v961_v63 = vpack.c.bf16 %v270_v14, %v268_v62  ;;  %211 = vst [vmem:[%s2104_s9 + $0xe0] sm:$0xff] %v179_v22  ;;  %v965_v43 = vpack.c.bf16 %v274_v6, %v272_v5  ;;  %v275_v14 = vld [vmem:[%s2100_s3 + $0x1e0] sm:$0xff] }
  0x30   :  { %208 = vst [vmem:[%s2104_s9 + $0xc8] sm:$0xff] %v176_v59  ;;  %210 = vst [vmem:[%s2104_s9 + $0xd8] sm:$0xff] %v178_v48  ;;  %v967_v56 = vpack.c.bf16 %v273_v60, %v271_v44  ;;  %v969_v62 = vpack.c.bf16 %v278_v55, %v276_v7  ;;  %v2129_v5 = vmax.f32 %v1375_v17, 0.0  ;;  %v2130_v6 = vmax.f32 %v1378_v18, 0.0 }
  0x31   :  { %956 = vmatpush1.bf16.msra.mxu0 %v955_v20  ;;  %209 = vst [vmem:[%s2104_s9 + $0xd0] sm:$0xff] %v177_v23  ;;  %v269_v20 = vld [vmem:[%s2100_s3 + $0x1b0] sm:$0xff]  ;;  %212 = vst [vmem:[%s2104_s9 + $0xe8] sm:$0xff] %v180_v8  ;;  %v2136_v17 = vmax.f32 %v1482_v32, 0.0  ;;  %v2137_v18 = vmax.f32 %v1485_v33, 0.0 }
  0x32   :  { %958 = vmatprep.subr.bf16.mxu0 %v957_v21  ;;  %214 = vst [vmem:[%s2104_s9 + $0xf8] sm:$0xff] %v182_v53  ;;  %213 = vst [vmem:[%s2104_s9 + $0xf0] sm:$0xff] %v181_v54  ;;  %v963_v21 = vpack.c.bf16 %v269_v20, %v267_v4  ;;  %v2127_v4 = vmax.f32 %v1360_v50, 0.0  ;;  %v2128_v20 = vmax.f32 %v1372_v12, 0.0  ;;  %v2134_v50 = vmax.f32 %v1464_v26, 0.0 }
  0x33   :  { %v2135_v12 = vmax.f32 %v1479_v2, 0.0 }
  0x35   :  { %960 = vmatpush1.bf16.msra.mxu0 %v959_v10  ;;  %v277_v10 = vld [vmem:[%s2100_s3 + $0x1f0] sm:$0xff] }
  0x36   :  { %962 = vmatprep.subr.bf16.mxu0 %v961_v63  ;;  %v971_v63 = vpack.c.bf16 %v277_v10, %v275_v14 }
  0x39   :  { %964 = vmatpush1.bf16.msra.mxu0 %v963_v21  ;;  %v2131_v21 = vmax.f32 %v1381_v19, 0.0  ;;  %v2139_v19 = vmax.f32 %v1571_v42, 0.0 }
  0x3a   :  { %966 = vmatprep.subr.bf16.mxu0 %v965_v43 }
  0x3d   :  { %968 = vmatpush1.bf16.msra.mxu0 %v967_v56 }
  0x3e   :  { %970 = vmatprep.subr.bf16.mxu0 %v969_v62 }
  0x41   :  { %972 = vmatpush1.bf16.msra.mxu0 %v971_v63 }
  0x44   :  { %356 = vmatmul.mubr.f32.vlgmr.msra.gmra.mrb[0].mxu0 %v151_v29  ;;  %v2140_v29 = vmax.f32 %v1592_v46, 0.0 }
  0x45   :  { %361 = vmatprep.mubr.f32.mxu0 %v154_v30  ;;  %v2141_v30 = vmax.f32 %v1595_v39, 0.0 }
  0x48   :  { %362 = vmatmul.mubr.f32.gmra.mrb[2].mxu0 %v2127_v4 }
  0x49   :  { %367 = vmatprep.mubr.f32.mxu0 %v2128_v20 }
  0x4c   :  { %368 = vmatmul.mubr.f32.gmra.mrb[4].mxu0 %v2129_v5 }
  0x4d   :  { %373 = vmatprep.mubr.f32.mxu0 %v2130_v6 }
  0x50   :  { %374 = vmatmul.mubr.f32.gmra.mrb[6].mxu0 %v2131_v21 }
  0x51   :  { %379 = vmatprep.mubr.f32.mxu0 %v160_v3 }
  0x54   :  { %380 = vmatmul.mubr.f32.gmra.mrb[8].mxu0 %v2132_v40 }
  0x55   :  { %385 = vmatprep.mubr.f32.mxu0 %v2133_v45 }
  0x58   :  { %386 = vmatmul.mubr.f32.gmra.mrb[10].mxu0 %v2134_v50 }
  0x59   :  { %391 = vmatprep.mubr.f32.mxu0 %v2135_v12 }
  0x5c   :  { %392 = vmatmul.mubr.f32.gmra.mrb[12].mxu0 %v2136_v17 }
  0x5d   :  { %397 = vmatprep.mubr.f32.mxu0 %v2137_v18 }
  0x60   :  { %398 = vmatmul.mubr.f32.gmra.mrb[14].mxu0 %v2138_v25 }
  0x61   :  { %403 = vmatprep.mubr.f32.mxu0 %v168_v49 }
  0x64   :  { %404 = vmatmul.mubr.f32.gmra.mrb[16].mxu0 %v2139_v19 }
  0x65   :  { %409 = vmatprep.mubr.f32.mxu0 %v170_v27 }
  0x68   :  { %410 = vmatmul.mubr.f32.gmra.mrb[18].mxu0 %v169_v0  ;;  %v279_v0 = vld [vmem:[%s2105_s4] sm:$0x3] }
  0x69   :  { %415 = vmatprep.mubr.f32.mxu0 %v172_v51  ;;  %v1870_v37 = vrot.slane %v279_v0, %v1239_v57  ;;  %v1874_v33 = vrot.slane %v279_v0, %v1242_v58 }
  0x6c   :  { %416 = vmatmul.mubr.f32.gmra.mrb[20].mxu0 %v2140_v29 }
  0x6d   :  { %421 = vmatprep.mubr.f32.mxu0 %v2141_v30 }
  0x70   :  { %422 = vmatmul.mubr.f32.gmra.mrb[22].mxu0 %v2142_v35 }
  0x71   :  { %427 = vmatprep.mubr.f32.mxu0 %v176_v59 }
  0x74   :  { %428 = vmatmul.mubr.f32.gmra.mrb[24].mxu0 %v175_v24 }
  0x75   :  { %433 = vmatprep.mubr.f32.mxu0 %v178_v48 }
  0x78   :  { %434 = vmatmul.mubr.f32.gmra.mrb[26].mxu0 %v177_v23 }
  0x79   :  { %439 = vmatprep.mubr.f32.mxu0 %v180_v8 }
  0x7c   :  { %440 = vmatmul.mubr.f32.gmra.mrb[28].mxu0 %v179_v22 }
  0x7d   :  { %445 = vmatprep.mubr.f32.mxu0 %v182_v53 }
  0x80   :  { %446 = vmatmul.mubr.f32.gmra.mrb[30].mxu0 %v181_v54 }
 0x117   :  { %v357_v26 = vpop.f32.mrb[0].mxu0 }
 0x118   :  { %v358_v2 = vadd.f32 %v357_v26, %v1870_v37  ;;  %v359_v32 = vpop.f32.mrb[1].mxu0 }
 0x119   :  { %v360_v41 = vadd.f32 %v359_v32, %v1874_v33 }
 0x11b   :  { %v363_v1 = vpop.f32.mrb[2].mxu0 }
 0x11c   :  { %v364_v3 = vadd.f32 %v363_v1, %v1870_v37  ;;  %v365_v28 = vpop.f32.mrb[3].mxu0 }
 0x11d   :  { %v366_v42 = vadd.f32 %v365_v28, %v1874_v33 }
 0x11e   :  { %v975_v38 = vpack.c.bf16 %v364_v3, %v358_v2 }
 0x11f   :  { %v369_v11 = vpop.f32.mrb[4].mxu0  ;;  %v973_v46 = vpack.c.bf16 %v366_v42, %v360_v41 }
 0x120   :  { %v370_v57 = vadd.f32 %v369_v11, %v1870_v37  ;;  %v371_v39 = vpop.f32.mrb[5].mxu0 }
 0x121   :  { %974 = vmatprep.subr.bf16.mxu1 %v973_v46  ;;  %v372_v27 = vadd.f32 %v371_v39, %v1874_v33 }
 0x122   :  { %976 = vmatpush1.bf16.msra.mxu1 %v975_v38 }
 0x123   :  { %v375_v47 = vpop.f32.mrb[6].mxu0 }
 0x124   :  { %v376_v58 = vadd.f32 %v375_v47, %v1870_v37  ;;  %v377_v49 = vpop.f32.mrb[7].mxu0 }
 0x125   :  { %v378_v51 = vadd.f32 %v377_v49, %v1874_v33 }
 0x126   :  { %v979_v52 = vpack.c.bf16 %v376_v58, %v370_v57 }
 0x127   :  { %v977_v9 = vpack.c.bf16 %v378_v51, %v372_v27  ;;  %v381_v31 = vpop.f32.mrb[8].mxu0 }
 0x128   :  { %v382_v13 = vadd.f32 %v381_v31, %v1870_v37  ;;  %v383_v15 = vpop.f32.mrb[9].mxu0  ;;  %v490_v31 = vld [vmem:[%s2106_s5] sm:$0xff] }
 0x129   :  { %978 = vmatprep.subr.bf16.mxu1 %v977_v9  ;;  %v384_v24 = vadd.f32 %v383_v15, %v1874_v33  ;;  %v494_v15 = vld [vmem:[%s2106_s5 + $0x20] sm:$0xff] }
 0x12a   :  { %980 = vmatpush1.bf16.msra.mxu1 %v979_v52 }
 0x12b   :  { %v387_v16 = vpop.f32.mrb[10].mxu0 }
 0x12c   :  { %v388_v61 = vadd.f32 %v387_v16, %v1870_v37  ;;  %v389_v59 = vpop.f32.mrb[11].mxu0  ;;  %v495_v16 = vld [vmem:[%s2106_s5 + $0x28] sm:$0xff] }
 0x12d   :  { %v390_v48 = vadd.f32 %v389_v59, %v1874_v33  ;;  %v497_v59 = vld [vmem:[%s2106_s5 + $0x38] sm:$0xff] }
 0x12e   :  { %v983_v23 = vpack.c.bf16 %v388_v61, %v382_v13  ;;  %v493_v13 = vld [vmem:[%s2106_s5 + $0x18] sm:$0xff]  ;;  %v496_v61 = vld [vmem:[%s2106_s5 + $0x30] sm:$0xff] }
 0x12f   :  { %v981_v8 = vpack.c.bf16 %v390_v48, %v384_v24  ;;  %v393_v22 = vpop.f32.mrb[12].mxu0  ;;  %v498_v24 = vld [vmem:[%s2106_s5 + $0x40] sm:$0xff]  ;;  %v499_v48 = vld [vmem:[%s2106_s5 + $0x48] sm:$0xff] }
 0x130   :  { %v394_v53 = vadd.f32 %v393_v22, %v1870_v37  ;;  %v395_v54 = vpop.f32.mrb[13].mxu0  ;;  %v502_v22 = vld [vmem:[%s2106_s5 + $0x60] sm:$0xff] }
 0x131   :  { %982 = vmatprep.subr.bf16.mxu1 %v981_v8  ;;  %v396_v7 = vadd.f32 %v395_v54, %v1874_v33  ;;  %v501_v8 = vld [vmem:[%s2106_s5 + $0x58] sm:$0xff]  ;;  %v504_v54 = vld [vmem:[%s2106_s5 + $0x70] sm:$0xff] }
 0x132   :  { %984 = vmatpush1.bf16.msra.mxu1 %v983_v23  ;;  %v500_v23 = vld [vmem:[%s2106_s5 + $0x50] sm:$0xff] }
 0x133   :  { %v399_v43 = vpop.f32.mrb[14].mxu0 }
 0x134   :  { %v400_v44 = vadd.f32 %v399_v43, %v1870_v37  ;;  %v401_v60 = vpop.f32.mrb[15].mxu0  ;;  %v505_v43 = vld [vmem:[%s2106_s5 + $0x78] sm:$0xff] }
 0x135   :  { %v402_v55 = vadd.f32 %v401_v60, %v1874_v33 }
 0x136   :  { %v987_v56 = vpack.c.bf16 %v400_v44, %v394_v53  ;;  %v503_v53 = vld [vmem:[%s2106_s5 + $0x68] sm:$0xff]  ;;  %v2143_v44 = vlaneseq }
 0x137   :  { %v985_v62 = vpack.c.bf16 %v402_v55, %v396_v7  ;;  %v405_v14 = vpop.f32.mrb[16].mxu0 }
 0x138   :  { %v406_v10 = vadd.f32 %v405_v14, %v1870_v37  ;;  %v407_v63 = vpop.f32.mrb[17].mxu0  ;;  %vm1971_vm0 = vcmp.lt.s32.totalorder %v2143_v44, 256 }
 0x139   :  { %986 = vmatprep.subr.bf16.mxu1 %v985_v62  ;;  %v408_v6 = vadd.f32 %v407_v63, %v1874_v33  ;;  %488 = vst.msk [vmem:[%s2107_s7] sm:$0x3] %vm1971_vm0, %v1007_v34  ;;  %489 = vst.msk [vmem:[%s2108_s8] sm:$0x3] %vm1971_vm0, %v1007_v34 }
 0x13a   :  { %988 = vmatpush1.bf16.msra.mxu1 %v987_v56 }
 0x13b   :  { %v411_v4 = vpop.f32.mrb[18].mxu0 }
 0x13c   :  { %v412_v20 = vadd.f32 %v411_v4, %v1870_v37  ;;  %v413_v5 = vpop.f32.mrb[19].mxu0 }
 0x13d   :  { %v414_v21 = vadd.f32 %v413_v5, %v1874_v33 }
 0x13e   :  { %v991_v40 = vpack.c.bf16 %v412_v20, %v406_v10 }
 0x13f   :  { %v989_v45 = vpack.c.bf16 %v414_v21, %v408_v6  ;;  %v417_v50 = vpop.f32.mrb[20].mxu0 }
 0x140   :  { %v418_v12 = vadd.f32 %v417_v50, %v1870_v37  ;;  %v419_v17 = vpop.f32.mrb[21].mxu0 }
 0x141   :  { %990 = vmatprep.subr.bf16.mxu1 %v989_v45  ;;  %v420_v29 = vadd.f32 %v419_v17, %v1874_v33 }
 0x142   :  { %992 = vmatpush1.bf16.msra.mxu1 %v991_v40 }
 0x143   :  { %v423_v18 = vpop.f32.mrb[22].mxu0 }
 0x144   :  { %v424_v25 = vadd.f32 %v423_v18, %v1870_v37  ;;  %v425_v19 = vpop.f32.mrb[23].mxu0 }
 0x145   :  { %v426_v30 = vadd.f32 %v425_v19, %v1874_v33 }
 0x146   :  { %v995_v35 = vpack.c.bf16 %v424_v25, %v418_v12 }
 0x147   :  { %v993_v0 = vpack.c.bf16 %v426_v30, %v420_v29  ;;  %v429_v26 = vpop.f32.mrb[24].mxu0 }
 0x148   :  { %v430_v2 = vadd.f32 %v429_v26, %v1870_v37  ;;  %v431_v32 = vpop.f32.mrb[25].mxu0 }
 0x149   :  { %994 = vmatprep.subr.bf16.mxu1 %v993_v0  ;;  %v432_v41 = vadd.f32 %v431_v32, %v1874_v33 }
 0x14a   :  { %996 = vmatpush1.bf16.msra.mxu1 %v995_v35 }
 0x14b   :  { %v435_v1 = vpop.f32.mrb[26].mxu0 }
 0x14c   :  { %v436_v3 = vadd.f32 %v435_v1, %v1870_v37  ;;  %v437_v28 = vpop.f32.mrb[27].mxu0 }
 0x14d   :  { %v438_v42 = vadd.f32 %v437_v28, %v1874_v33 }
 0x14e   :  { %v999_v38 = vpack.c.bf16 %v436_v3, %v430_v2 }
 0x14f   :  { %v997_v11 = vpack.c.bf16 %v438_v42, %v432_v41  ;;  %v441_v46 = vpop.f32.mrb[28].mxu0 }
 0x150   :  { %v442_v57 = vadd.f32 %v441_v46, %v1870_v37  ;;  %v443_v39 = vpop.f32.mrb[29].mxu0 }
 0x151   :  { %998 = vmatprep.subr.bf16.mxu1 %v997_v11  ;;  %v444_v27 = vadd.f32 %v443_v39, %v1874_v33 }
 0x152   :  { %1000 = vmatpush1.bf16.msra.mxu1 %v999_v38 }
 0x153   :  { %v447_v47 = vpop.f32.mrb[30].mxu0 }
 0x154   :  { %v448_v58 = vadd.f32 %v447_v47, %v1870_v37  ;;  %v449_v49 = vpop.f32.mrb[31].mxu0  ;;  %v491_v37 = vld [vmem:[%s2106_s5 + $0x8] sm:$0xff] }
 0x155   :  { %v450_v51 = vadd.f32 %v449_v49, %v1874_v33  ;;  %v492_v33 = vld [vmem:[%s2106_s5 + $0x10] sm:$0xff] }
 0x156   :  { %v1003_v52 = vpack.c.bf16 %v448_v58, %v442_v57 }
 0x157   :  { %v1001_v9 = vpack.c.bf16 %v450_v51, %v444_v27 }
 0x159   :  { %1002 = vmatprep.subr.bf16.mxu1 %v1001_v9 }
 0x15a   :  { %1004 = vmatpush1.bf16.msra.mxu1 %v1003_v52 }
 0x15d   :  { %603 = vmatmul.mubr.f32.vlgmr.msra.gmra.mrb[0].mxu1 %v490_v31 }
 0x15e   :  { %608 = vmatprep.mubr.f32.mxu1 %v1007_v34 }
 0x161   :  { %609 = vmatmul.mubr.f32.gmra.mrb[2].mxu1 %v491_v37 }
 0x162   :  { %614 = vmatprep.mubr.f32.mxu1 %v1007_v34 }
 0x165   :  { %615 = vmatmul.mubr.f32.gmra.mrb[4].mxu1 %v492_v33 }
 0x166   :  { %620 = vmatprep.mubr.f32.mxu1 %v1007_v34 }
 0x169   :  { %621 = vmatmul.mubr.f32.gmra.mrb[6].mxu1 %v493_v13 }
 0x16a   :  { %626 = vmatprep.mubr.f32.mxu1 %v1007_v34 }
 0x16d   :  { %627 = vmatmul.mubr.f32.gmra.mrb[8].mxu1 %v494_v15 }
 0x16e   :  { %632 = vmatprep.mubr.f32.mxu1 %v1007_v34 }
 0x171   :  { %633 = vmatmul.mubr.f32.gmra.mrb[10].mxu1 %v495_v16 }
 0x172   :  { %638 = vmatprep.mubr.f32.mxu1 %v1007_v34 }
 0x175   :  { %639 = vmatmul.mubr.f32.gmra.mrb[12].mxu1 %v496_v61 }
 0x176   :  { %644 = vmatprep.mubr.f32.mxu1 %v1007_v34 }
 0x179   :  { %645 = vmatmul.mubr.f32.gmra.mrb[14].mxu1 %v497_v59 }
 0x17a   :  { %650 = vmatprep.mubr.f32.mxu1 %v1007_v34 }
 0x17d   :  { %651 = vmatmul.mubr.f32.gmra.mrb[16].mxu1 %v498_v24 }
 0x17e   :  { %656 = vmatprep.mubr.f32.mxu1 %v1007_v34 }
 0x181   :  { %657 = vmatmul.mubr.f32.gmra.mrb[18].mxu1 %v499_v48 }
 0x182   :  { %662 = vmatprep.mubr.f32.mxu1 %v1007_v34 }
 0x185   :  { %663 = vmatmul.mubr.f32.gmra.mrb[20].mxu1 %v500_v23 }
 0x186   :  { %668 = vmatprep.mubr.f32.mxu1 %v1007_v34 }
 0x189   :  { %669 = vmatmul.mubr.f32.gmra.mrb[22].mxu1 %v501_v8 }
 0x18a   :  { %674 = vmatprep.mubr.f32.mxu1 %v1007_v34 }
 0x18d   :  { %675 = vmatmul.mubr.f32.gmra.mrb[24].mxu1 %v502_v22 }
 0x18e   :  { %680 = vmatprep.mubr.f32.mxu1 %v1007_v34 }
 0x191   :  { %681 = vmatmul.mubr.f32.gmra.mrb[26].mxu1 %v503_v53 }
 0x192   :  { %686 = vmatprep.mubr.f32.mxu1 %v1007_v34 }
 0x195   :  { %687 = vmatmul.mubr.f32.gmra.mrb[28].mxu1 %v504_v54 }
 0x196   :  { %692 = vmatprep.mubr.f32.mxu1 %v1007_v34 }
 0x199   :  { %693 = vmatmul.mubr.f32.gmra.mrb[30].mxu1 %v505_v43 }
 0x230   :  { %v604_v7 = vpop.f32.mrb[0].mxu1 }
 0x231   :  { %699 = vst [vmem:[%s2109_s6] sm:$0xff] %v604_v7  ;;  %v606_v55 = vpop.f32.mrb[1].mxu1  ;;  %v799_v62 = vmul.f32 %v604_v7, %v604_v7 }
 0x232   :  { %700 = vst [vmem:[%s2109_s6 + $0x8] sm:$0xff] %v606_v55  ;;  %v800_v34 = vmul.f32 %v606_v55, %v606_v55 }
 0x234   :  { %v610_v56 = vpop.f32.mrb[2].mxu1 }
 0x235   :  { %701 = vst [vmem:[%s2109_s6 + $0x10] sm:$0xff] %v610_v56  ;;  %v732_v14 = vadd.f32 %v610_v56, %v604_v7  ;;  %v801_v10 = vmul.f32 %v610_v56, %v610_v56  ;;  %v612_v63 = vpop.f32.mrb[3].mxu1 }
 0x236   :  { %702 = vst [vmem:[%s2109_s6 + $0x18] sm:$0xff] %v612_v63  ;;  %v753_v4 = vadd.f32 %v612_v63, %v606_v55  ;;  %v802_v20 = vmul.f32 %v612_v63, %v612_v63 }
 0x237   :  { %v831_v5 = vadd.f32 %v801_v10, %v799_v62 }
 0x238   :  { %v852_v6 = vadd.f32 %v802_v20, %v800_v34  ;;  %v616_v21 = vpop.f32.mrb[4].mxu1 }
 0x239   :  { %703 = vst [vmem:[%s2109_s6 + $0x20] sm:$0xff] %v616_v21  ;;  %v733_v40 = vadd.f32 %v732_v14, %v616_v21  ;;  %v803_v45 = vmul.f32 %v616_v21, %v616_v21  ;;  %v618_v50 = vpop.f32.mrb[5].mxu1 }
 0x23a   :  { %704 = vst [vmem:[%s2109_s6 + $0x28] sm:$0xff] %v618_v50  ;;  %v754_v12 = vadd.f32 %v753_v4, %v618_v50  ;;  %v804_v17 = vmul.f32 %v618_v50, %v618_v50 }
 0x23b   :  { %v832_v18 = vadd.f32 %v831_v5, %v803_v45 }
 0x23c   :  { %v853_v25 = vadd.f32 %v852_v6, %v804_v17  ;;  %v622_v19 = vpop.f32.mrb[6].mxu1 }
 0x23d   :  { %705 = vst [vmem:[%s2109_s6 + $0x30] sm:$0xff] %v622_v19  ;;  %v734_v29 = vadd.f32 %v733_v40, %v622_v19  ;;  %v805_v30 = vmul.f32 %v622_v19, %v622_v19  ;;  %v624_v35 = vpop.f32.mrb[7].mxu1 }
 0x23e   :  { %706 = vst [vmem:[%s2109_s6 + $0x38] sm:$0xff] %v624_v35  ;;  %v755_v0 = vadd.f32 %v754_v12, %v624_v35  ;;  %v806_v26 = vmul.f32 %v624_v35, %v624_v35 }
 0x23f   :  { %v833_v2 = vadd.f32 %v832_v18, %v805_v30 }
 0x240   :  { %v854_v32 = vadd.f32 %v853_v25, %v806_v26  ;;  %v628_v1 = vpop.f32.mrb[8].mxu1 }
 0x241   :  { %707 = vst [vmem:[%s2109_s6 + $0x40] sm:$0xff] %v628_v1  ;;  %v735_v3 = vadd.f32 %v734_v29, %v628_v1  ;;  %v807_v28 = vmul.f32 %v628_v1, %v628_v1  ;;  %v630_v41 = vpop.f32.mrb[9].mxu1 }
 0x242   :  { %708 = vst [vmem:[%s2109_s6 + $0x48] sm:$0xff] %v630_v41  ;;  %v756_v42 = vadd.f32 %v755_v0, %v630_v41  ;;  %v808_v38 = vmul.f32 %v630_v41, %v630_v41 }
 0x243   :  { %v834_v11 = vadd.f32 %v833_v2, %v807_v28 }
 0x244   :  { %v855_v46 = vadd.f32 %v854_v32, %v808_v38  ;;  %v634_v57 = vpop.f32.mrb[10].mxu1 }
 0x245   :  { %709 = vst [vmem:[%s2109_s6 + $0x50] sm:$0xff] %v634_v57  ;;  %v736_v39 = vadd.f32 %v735_v3, %v634_v57  ;;  %v809_v47 = vmul.f32 %v634_v57, %v634_v57  ;;  %v636_v58 = vpop.f32.mrb[11].mxu1 }
 0x246   :  { %710 = vst [vmem:[%s2109_s6 + $0x58] sm:$0xff] %v636_v58  ;;  %v757_v49 = vadd.f32 %v756_v42, %v636_v58  ;;  %v810_v27 = vmul.f32 %v636_v58, %v636_v58 }
 0x247   :  { %v835_v51 = vadd.f32 %v834_v11, %v809_v47 }
 0x248   :  { %v856_v52 = vadd.f32 %v855_v46, %v810_v27  ;;  %v640_v9 = vpop.f32.mrb[12].mxu1 }
 0x249   :  { %711 = vst [vmem:[%s2109_s6 + $0x60] sm:$0xff] %v640_v9  ;;  %v737_v31 = vadd.f32 %v736_v39, %v640_v9  ;;  %v811_v37 = vmul.f32 %v640_v9, %v640_v9  ;;  %v642_v33 = vpop.f32.mrb[13].mxu1 }
 0x24a   :  { %712 = vst [vmem:[%s2109_s6 + $0x68] sm:$0xff] %v642_v33  ;;  %v758_v13 = vadd.f32 %v757_v49, %v642_v33  ;;  %v812_v15 = vmul.f32 %v642_v33, %v642_v33 }
 0x24b   :  { %v836_v16 = vadd.f32 %v835_v51, %v811_v37 }
 0x24c   :  { %v857_v61 = vadd.f32 %v856_v52, %v812_v15  ;;  %v646_v59 = vpop.f32.mrb[14].mxu1 }
 0x24d   :  { %713 = vst [vmem:[%s2109_s6 + $0x70] sm:$0xff] %v646_v59  ;;  %v738_v24 = vadd.f32 %v737_v31, %v646_v59  ;;  %v813_v48 = vmul.f32 %v646_v59, %v646_v59  ;;  %v648_v23 = vpop.f32.mrb[15].mxu1 }
 0x24e   :  { %714 = vst [vmem:[%s2109_s6 + $0x78] sm:$0xff] %v648_v23  ;;  %v759_v8 = vadd.f32 %v758_v13, %v648_v23  ;;  %v814_v22 = vmul.f32 %v648_v23, %v648_v23 }
 0x24f   :  { %v837_v53 = vadd.f32 %v836_v16, %v813_v48 }
 0x250   :  { %v858_v54 = vadd.f32 %v857_v61, %v814_v22  ;;  %v652_v43 = vpop.f32.mrb[16].mxu1 }
 0x251   :  { %715 = vst [vmem:[%s2109_s6 + $0x80] sm:$0xff] %v652_v43  ;;  %v739_v44 = vadd.f32 %v738_v24, %v652_v43  ;;  %v815_v7 = vmul.f32 %v652_v43, %v652_v43  ;;  %v654_v55 = vpop.f32.mrb[17].mxu1 }
 0x252   :  { %716 = vst [vmem:[%s2109_s6 + $0x88] sm:$0xff] %v654_v55  ;;  %v760_v56 = vadd.f32 %v759_v8, %v654_v55  ;;  %v816_v62 = vmul.f32 %v654_v55, %v654_v55 }
 0x253   :  { %v838_v14 = vadd.f32 %v837_v53, %v815_v7 }
 0x254   :  { %v859_v10 = vadd.f32 %v858_v54, %v816_v62  ;;  %v658_v63 = vpop.f32.mrb[18].mxu1 }
 0x255   :  { %717 = vst [vmem:[%s2109_s6 + $0x90] sm:$0xff] %v658_v63  ;;  %v740_v34 = vadd.f32 %v739_v44, %v658_v63  ;;  %v817_v4 = vmul.f32 %v658_v63, %v658_v63  ;;  %v660_v20 = vpop.f32.mrb[19].mxu1 }
 0x256   :  { %718 = vst [vmem:[%s2109_s6 + $0x98] sm:$0xff] %v660_v20  ;;  %v761_v5 = vadd.f32 %v760_v56, %v660_v20  ;;  %v818_v6 = vmul.f32 %v660_v20, %v660_v20 }
 0x257   :  { %v839_v21 = vadd.f32 %v838_v14, %v817_v4 }
 0x258   :  { %v860_v40 = vadd.f32 %v859_v10, %v818_v6  ;;  %v664_v45 = vpop.f32.mrb[20].mxu1  ;;  %v1008_v10 = vmov 1966171168  }
 0x259   :  { %719 = vst [vmem:[%s2109_s6 + $0xa0] sm:$0xff] %v664_v45  ;;  %v741_v50 = vadd.f32 %v740_v34, %v664_v45  ;;  %v819_v12 = vmul.f32 %v664_v45, %v664_v45  ;;  %v666_v17 = vpop.f32.mrb[21].mxu1  ;;  %v778_v63 = vunpack.c.l.s4 %v1008_v10 }
 0x25a   :  { %720 = vst [vmem:[%s2109_s6 + $0xa8] sm:$0xff] %v666_v17  ;;  %v762_v18 = vadd.f32 %v761_v5, %v666_v17  ;;  %v820_v25 = vmul.f32 %v666_v17, %v666_v17 }
 0x25b   :  { %v840_v19 = vadd.f32 %v839_v21, %v819_v12 }
 0x25c   :  { %v861_v29 = vadd.f32 %v860_v40, %v820_v25  ;;  %v670_v30 = vpop.f32.mrb[22].mxu1 }
 0x25d   :  { %721 = vst [vmem:[%s2109_s6 + $0xb0] sm:$0xff] %v670_v30  ;;  %v742_v35 = vadd.f32 %v741_v50, %v670_v30  ;;  %v821_v0 = vmul.f32 %v670_v30, %v670_v30  ;;  %v672_v26 = vpop.f32.mrb[23].mxu1  ;;  %v779_v50 = vunpack.c.0.s8 %v778_v63 }
 0x25e   :  { %722 = vst [vmem:[%s2109_s6 + $0xb8] sm:$0xff] %v672_v26  ;;  %v763_v2 = vadd.f32 %v762_v18, %v672_v26  ;;  %v822_v32 = vmul.f32 %v672_v26, %v672_v26 }
 0x25f   :  { %v841_v1 = vadd.f32 %v840_v19, %v821_v0  ;;  %v782_v0 = vsub.s32 %v779_v50, %v1146_v36 }
 0x260   :  { %v862_v3 = vadd.f32 %v861_v29, %v822_v32  ;;  %v676_v28 = vpop.f32.mrb[24].mxu1 }
 0x261   :  { %723 = vst [vmem:[%s2109_s6 + $0xc0] sm:$0xff] %v676_v28  ;;  %v743_v41 = vadd.f32 %v742_v35, %v676_v28  ;;  %v823_v42 = vmul.f32 %v676_v28, %v676_v28  ;;  %v678_v38 = vpop.f32.mrb[25].mxu1 }
 0x262   :  { %724 = vst [vmem:[%s2109_s6 + $0xc8] sm:$0xff] %v678_v38  ;;  %v764_v11 = vadd.f32 %v763_v2, %v678_v38  ;;  %v824_v46 = vmul.f32 %v678_v38, %v678_v38 }
 0x263   :  { %v842_v57 = vadd.f32 %v841_v1, %v823_v42 }
 0x264   :  { %v863_v39 = vadd.f32 %v862_v3, %v824_v46  ;;  %v682_v47 = vpop.f32.mrb[26].mxu1 }
 0x265   :  { %725 = vst [vmem:[%s2109_s6 + $0xd0] sm:$0xff] %v682_v47  ;;  %v744_v58 = vadd.f32 %v743_v41, %v682_v47  ;;  %v825_v49 = vmul.f32 %v682_v47, %v682_v47  ;;  %v684_v27 = vpop.f32.mrb[27].mxu1  ;;  %v731_v41 = vld [vmem:[%s2107_s7] sm:$0x3] }
 0x266   :  { %726 = vst [vmem:[%s2109_s6 + $0xd8] sm:$0xff] %v684_v27  ;;  %v765_v51 = vadd.f32 %v764_v11, %v684_v27  ;;  %v826_v52 = vmul.f32 %v684_v27, %v684_v27  ;;  %v798_v11 = vld [vmem:[%s2108_s8] sm:$0x3] }
 0x267   :  { %v843_v9 = vadd.f32 %v842_v57, %v825_v49 }
 0x268   :  { %v864_v31 = vadd.f32 %v863_v39, %v826_v52  ;;  %v688_v37 = vpop.f32.mrb[28].mxu1 }
 0x269   :  { %727 = vst [vmem:[%s2109_s6 + $0xe0] sm:$0xff] %v688_v37  ;;  %v745_v33 = vadd.f32 %v744_v58, %v688_v37  ;;  %v827_v13 = vmul.f32 %v688_v37, %v688_v37  ;;  %v690_v15 = vpop.f32.mrb[29].mxu1 }
 0x26a   :  { %728 = vst [vmem:[%s2109_s6 + $0xe8] sm:$0xff] %v690_v15  ;;  %v766_v16 = vadd.f32 %v765_v51, %v690_v15  ;;  %v828_v61 = vmul.f32 %v690_v15, %v690_v15 }
 0x26b   :  { %v844_v59 = vadd.f32 %v843_v9, %v827_v13 }
 0x26c   :  { %v865_v24 = vadd.f32 %v864_v31, %v828_v61  ;;  %v694_v48 = vpop.f32.mrb[30].mxu1 }
 0x26d   :  { %729 = vst [vmem:[%s2109_s6 + $0xf0] sm:$0xff] %v694_v48  ;;  %v746_v23 = vadd.f32 %v745_v33, %v694_v48  ;;  %v829_v8 = vmul.f32 %v694_v48, %v694_v48  ;;  %v696_v22 = vpop.f32.mrb[31].mxu1 }
 0x26e   :  { %730 = vst [vmem:[%s2109_s6 + $0xf8] sm:$0xff] %v696_v22  ;;  %v767_v53 = vadd.f32 %v766_v16, %v696_v22  ;;  %v830_v54 = vmul.f32 %v696_v22, %v696_v22 }
 0x26f   :  { %v747_v43 = vrot.slane %v746_v23, 4  ;;  %v845_v44 = vadd.f32 %v844_v59, %v829_v8 }
 0x270   :  { %v768_v7 = vrot.slane %v767_v53, 4  ;;  %v866_v55 = vadd.f32 %v865_v24, %v830_v54 }
 0x271   :  { %v748_v56 = vadd.f32 %v747_v43, %v746_v23  ;;  %v846_v62 = vrot.slane %v845_v44, 4 }
 0x272   :  { %v769_v14 = vadd.f32 %v768_v7, %v767_v53  ;;  %v867_v34 = vrot.slane %v866_v55, 4 }
 0x273   :  { %v749_v4 = vrot.slane %v748_v56, 2  ;;  %v847_v20 = vadd.f32 %v846_v62, %v845_v44 }
 0x274   :  { %v770_v5 = vrot.slane %v769_v14, 2  ;;  %v868_v6 = vadd.f32 %v867_v34, %v866_v55 }
 0x275   :  { %v750_v21 = vadd.f32 %v749_v4, %v748_v56  ;;  %v848_v40 = vrot.slane %v847_v20, 2 }
 0x276   :  { %v771_v45 = vadd.f32 %v770_v5, %v769_v14  ;;  %v869_v12 = vrot.slane %v868_v6, 2 }
 0x277   :  { %v751_v17 = vrot.slane %v750_v21, 1  ;;  %v849_v18 = vadd.f32 %v848_v40, %v847_v20 }
 0x278   :  { %v772_v25 = vrot.slane %v771_v45, 1  ;;  %v870_v19 = vadd.f32 %v869_v12, %v868_v6 }
 0x279   :  { %v752_v29 = vadd.f32 %v751_v17, %v750_v21  ;;  %v850_v30 = vrot.slane %v849_v18, 1 }
 0x27a   :  { %v773_v35 = vadd.f32 %v772_v25, %v771_v45  ;;  %v871_v26 = vrot.slane %v870_v19, 1 }
 0x27b   :  { %v851_v2 = vadd.f32 %v850_v30, %v849_v18 }
 0x27c   :  { %v776_v32 = vcombine.low %v752_v29, %v773_v35  ;;  %v872_v1 = vadd.f32 %v871_v26, %v870_v19 }
 0x27e   :  { %v783_v3 = vrot.slane %v776_v32, %v782_v0  ;;  %v875_v28 = vcombine.low %v851_v2, %v872_v1 }
 0x280   :  { %v790_v42 = vrot.slane %v783_v3, %v782_v0  ;;  %v882_v38 = vrot.slane %v875_v28, %v782_v0 }
 0x282   :  { %v792_v46 = vadd.f32 %v790_v42, %v731_v41  ;;  %v889_v57 = vrot.slane %v882_v38, %v782_v0 }
 0x284   :  { %797 = vst.msk [vmem:[%s2107_s7] sm:$0x3] %vm1971_vm0, %v792_v46  ;;  %v891_v36 = vadd.f32 %v889_v57, %v798_v11 }
 0x286   :  { %892 = vst.msk [vmem:[%s2108_s8] sm:$0x3] %vm1971_vm0, %v891_v36 }

</bundles_post_ra>
